<compile_context>
chip_gen: v6e
topology: v6e:2x2x1
jax: 0.10.0
libtpu: 0.0.40
codegen_flags: <defaults>
</compile_context>

<pallas_src>
import functools

import jax
import jax.numpy as jnp
from jax.experimental import pallas as pl
from jax.experimental.pallas import tpu as pltpu

NUM_ACTIONS = 6


def _round_up(x, m):
    return ((x + m - 1) // m) * m


# ----------------------------------------------------------------------------
# Pallas kernels
# ----------------------------------------------------------------------------
def _mm_bias_act_kernel(a_ref, b_ref, bias_ref, o_ref, *, apply_relu):
    """Single-shot matmul (full K in one tile) + bias + optional ReLU."""
    out = jnp.dot(a_ref[...], b_ref[...], preferred_element_type=jnp.float32)
    out = out + bias_ref[...]
    if apply_relu:
        out = jnp.maximum(out, 0.0)
    o_ref[...] = out.astype(o_ref.dtype)


def _mm_bias_act_acc_kernel(a_ref, b_ref, bias_ref, o_ref, acc_ref, *, apply_relu):
    """K-tiled matmul with f32 accumulator; bias/ReLU applied on the last K step."""
    k = pl.program_id(2)

    @pl.when(k == 0)
    def _():
        acc_ref[...] = jnp.zeros_like(acc_ref)

    acc_ref[...] += jnp.dot(a_ref[...], b_ref[...], preferred_element_type=jnp.float32)

    @pl.when(k == pl.num_programs(2) - 1)
    def _():
        out = acc_ref[...] + bias_ref[...]
        if apply_relu:
            out = jnp.maximum(out, 0.0)
        o_ref[...] = out.astype(o_ref.dtype)


def _fc_head_kernel(x_ref, w2_ref, b2_ref, w3_ref, b3_ref, w4_ref, b4_ref, o_ref):
    """fc2 -> ReLU -> fc3 -> ReLU -> fc4, all weights resident in VMEM."""
    h = jnp.dot(x_ref[...], w2_ref[...], preferred_element_type=jnp.float32)
    h = jnp.maximum(h + b2_ref[...], 0.0).astype(jnp.bfloat16)
    h = jnp.dot(h, w3_ref[...], preferred_element_type=jnp.float32)
    h = jnp.maximum(h + b3_ref[...], 0.0).astype(jnp.bfloat16)
    out = jnp.dot(h, w4_ref[...], preferred_element_type=jnp.float32) + b4_ref[...]
    o_ref[...] = out.astype(o_ref.dtype)


# ----------------------------------------------------------------------------
# Wrappers around pallas_call
# ----------------------------------------------------------------------------
def matmul_bias_act(a, b, bias2d, *, tm, tn, tk, apply_relu, out_dtype=jnp.bfloat16):
    """relu?(a @ b + bias).  a:(M,K), b:(K,N) (bf16), bias2d:(1,N) f32."""
    M, K = a.shape
    Kb, N = b.shape
    assert K == Kb and K % tk == 0 and N % tn == 0
    Mp = _round_up(M, tm)
    if Mp != M:
        a = jnp.pad(a, ((0, Mp - M), (0, 0)))
    mg, ng, kg = Mp // tm, N // tn, K // tk

    if kg == 1:
        out = pl.pallas_call(
            functools.partial(_mm_bias_act_kernel, apply_relu=apply_relu),
            out_shape=jax.ShapeDtypeStruct((Mp, N), out_dtype),
            grid_spec=pltpu.PrefetchScalarGridSpec(
                num_scalar_prefetch=0,
                grid=(mg, ng),
                in_specs=[
                    pl.BlockSpec((tm, tk), lambda i, j: (i, 0)),
                    pl.BlockSpec((tk, tn), lambda i, j: (0, j)),
                    pl.BlockSpec((1, tn), lambda i, j: (0, j)),
                ],
                out_specs=pl.BlockSpec((tm, tn), lambda i, j: (i, j)),
            ),
            compiler_params=pltpu.CompilerParams(
                dimension_semantics=("parallel", "parallel")
            ),
        )(a, b, bias2d)
    else:
        out = pl.pallas_call(
            functools.partial(_mm_bias_act_acc_kernel, apply_relu=apply_relu),
            out_shape=jax.ShapeDtypeStruct((Mp, N), out_dtype),
            grid_spec=pltpu.PrefetchScalarGridSpec(
                num_scalar_prefetch=0,
                grid=(mg, ng, kg),
                in_specs=[
                    pl.BlockSpec((tm, tk), lambda i, j, k: (i, k)),
                    pl.BlockSpec((tk, tn), lambda i, j, k: (k, j)),
                    pl.BlockSpec((1, tn), lambda i, j, k: (0, j)),
                ],
                out_specs=pl.BlockSpec((tm, tn), lambda i, j, k: (i, j)),
                scratch_shapes=[pltpu.VMEM((tm, tn), jnp.float32)],
            ),
            compiler_params=pltpu.CompilerParams(
                dimension_semantics=("parallel", "parallel", "arbitrary")
            ),
        )(a, b, bias2d)
    return out if Mp == M else out[:M]


def fc_head(x, p):
    """Fused fc2/fc3/fc4 head.  x: (M, 512) bf16 -> (M, NUM_ACTIONS) f32."""
    M = x.shape[0]
    out = pl.pallas_call(
        _fc_head_kernel,
        out_shape=jax.ShapeDtypeStruct((M, p["fc4_w"].shape[1]), jnp.float32),
    )(x, p["fc2_w"], p["fc2_b"], p["fc3_w"], p["fc3_b"], p["fc4_w"], p["fc4_b"])
    return out[:, :NUM_ACTIONS]


# ----------------------------------------------------------------------------
# Glue: NHWC im2col (plain JAX, no transposes) so convs become MXU matmuls.
# ----------------------------------------------------------------------------
def im2col_nhwc(x, kh, kw, stride, padding):
    """x: (N, H, W, C) -> (N*oh*ow, kh*kw*C), column order (kh, kw, C)."""
    if padding:
        x = jnp.pad(x, ((0, 0), (padding, padding), (padding, padding), (0, 0)))
    n, h, w, c = x.shape
    oh = (h - kh) // stride + 1
    ow = (w - kw) // stride + 1
    cols = []
    for i in range(kh):
        for j in range(kw):
            cols.append(x[:, i:i + stride * oh:stride, j:j + stride * ow:stride, :])
    patches = jnp.concatenate(cols, axis=-1)          # (N, oh, ow, kh*kw*C)
    return patches.reshape(n * oh * ow, kh * kw * c), oh, ow


def conv2d_relu_nhwc(x, w_mat, bias2d, kh, kw, stride, padding, *, tm=128):
    """x NHWC, w_mat (kh*kw*C, O) bf16.  Returns NHWC (N, oh, ow, O) bf16."""
    n = x.shape[0]
    patches, oh, ow = im2col_nhwc(x, kh, kw, stride, padding)
    K = patches.shape[1]
    n_out = w_mat.shape[1]
    out = matmul_bias_act(
        patches, w_mat, bias2d,
        tm=tm, tn=n_out, tk=K,            # full K, full N -> no reduction axis
        apply_relu=True, out_dtype=jnp.bfloat16,
    )
    return out.reshape(n, oh, ow, n_out)


# ----------------------------------------------------------------------------
# Parameters: synthetic PyTorch-layout init + one-time kernel-layout prep.
# ----------------------------------------------------------------------------
def init_params(key):
    def mk(k, shape, scale=0.05):
        return scale * jax.random.normal(k, shape, dtype=jnp.float32)

    keys = jax.random.split(key, 14)
    return {
        "conv1_w": mk(keys[0], (32, 3, 8, 8)),
        "conv1_b": mk(keys[1], (32,)),
        "conv2_w": mk(keys[2], (64, 32, 4, 4)),
        "conv2_b": mk(keys[3], (64,)),
        "conv3_w": mk(keys[4], (128, 64, 3, 3)),
        "conv3_b": mk(keys[5], (128,)),
        "fc1_w": mk(keys[6], (512, 128 * 19 * 8), scale=0.01),  # PyTorch (out, in)
        "fc1_b": mk(keys[7], (512,)),
        "fc2_w": mk(keys[8], (128, 512), scale=0.02),
        "fc2_b": mk(keys[9], (128,)),
        "fc3_w": mk(keys[10], (32, 128), scale=0.05),
        "fc3_b": mk(keys[11], (32,)),
        "fc4_w": mk(keys[12], (6, 32), scale=0.1),
        "fc4_b": mk(keys[13], (6,)),
    }


def prepare_params(params):
    """One-time layout prep: transpose/reorder/pad/cast weights for the kernels."""
    bf16 = jnp.bfloat16

    def conv_w(w):  # (O, C, kh, kw) -> (kh*kw*C, O), matching im2col column order
        o, c, kh, kw = w.shape
        return jnp.transpose(w, (2, 3, 1, 0)).reshape(kh * kw * c, o).astype(bf16)

    def bias2d(b, pad_to=None):
        b = b.reshape(1, -1).astype(jnp.float32)
        if pad_to is not None and b.shape[1] < pad_to:
            b = jnp.pad(b, ((0, 0), (0, pad_to - b.shape[1])))
        return b

    p = {
        "conv1_w": conv_w(params["conv1_w"]), "conv1_b": bias2d(params["conv1_b"]),
        "conv2_w": conv_w(params["conv2_w"]), "conv2_b": bias2d(params["conv2_b"]),
        "conv3_w": conv_w(params["conv3_w"]), "conv3_b": bias2d(params["conv3_b"]),
    }
    # fc1: PyTorch flatten is (c, h, w); our NHWC conv output flattens (h, w, c).
    # Permute the weight rows once here so the forward needs no transpose.
    w1 = params["fc1_w"].reshape(512, 128, 19, 8)           # [out, c, h, w]
    w1 = jnp.transpose(w1, (2, 3, 1, 0)).reshape(19 * 8 * 128, 512)
    p["fc1_w"] = w1.astype(bf16)
    p["fc1_b"] = bias2d(params["fc1_b"])

    # Fused head: fc2 exact shape; fc3/fc4 zero-padded to 128 lanes so every
    # in-kernel matmul is 128-lane aligned (zero pads contribute nothing).
    p["fc2_w"] = params["fc2_w"].T.astype(bf16)             # (512, 128)
    p["fc2_b"] = bias2d(params["fc2_b"])
    w3 = params["fc3_w"].T.astype(bf16)                     # (128, 32)
    p["fc3_w"] = jnp.pad(w3, ((0, 0), (0, 128 - 32)))
    p["fc3_b"] = bias2d(params["fc3_b"], pad_to=128)
    w4 = params["fc4_w"].T.astype(bf16)                     # (32, 6)
    p["fc4_w"] = jnp.pad(w4, ((0, 128 - 32), (0, 128 - 6)))
    p["fc4_b"] = bias2d(params["fc4_b"], pad_to=128)
    return p


# ----------------------------------------------------------------------------
# Forward pass (matches DeepQModel.forward semantics).
# ----------------------------------------------------------------------------
def deep_q_forward(prepared, obs):
    x = obs.reshape(-1, 3, 185, 95).astype(jnp.float32)
    x = jnp.transpose(x, (0, 2, 3, 1)).astype(jnp.bfloat16)   # NCHW -> NHWC once
    x = conv2d_relu_nhwc(x, prepared["conv1_w"], prepared["conv1_b"], 8, 8, 4, 1)
    x = conv2d_relu_nhwc(x, prepared["conv2_w"], prepared["conv2_b"], 4, 4, 2, 0)
    x = conv2d_relu_nhwc(x, prepared["conv3_w"], prepared["conv3_b"], 3, 3, 1, 0)
    n = x.shape[0]
    x = x.reshape(n, 19 * 8 * 128)           # (h, w, c) flatten; fc1_w rows match
    x = matmul_bias_act(
        x, prepared["fc1_w"], prepared["fc1_b"],
        tm=n, tn=256, tk=2432,               # grid (1, 2, 8): 16 steps, 2 parallel N blocks
        apply_relu=True, out_dtype=jnp.bfloat16,
    )
    return fc_head(x, prepared)              # fused fc2/fc3/fc4 -> (n, 6) f32


if __name__ == "__main__":
    key = jax.random.PRNGKey(0)
    pkey, xkey = jax.random.split(key)
    params = init_params(pkey)
    prepared = prepare_params(params)        # one-time layout prep (hoisted out of forward)

    # Smallest shape consistent with the module: batch=2 frames of 3x185x95
    # (spatial dims are fixed by fc1 expecting 128*19*8 features).
    obs = jax.random.normal(xkey, (2, 3, 185, 95), dtype=jnp.float32)

    fwd = jax.jit(deep_q_forward)
    actions = jax.block_until_ready(fwd(prepared, obs))

    assert actions.shape == (2, NUM_ACTIONS), actions.shape
    assert bool(jnp.all(jnp.isfinite(actions)))
    print("KERNEL_OK")
</pallas_src>

<mosaic_0001>
module attributes {stable_mosaic.version = 11 : i64} {
  func.func @_mm_bias_act_kernel(%arg0: i32, %arg1: i32, %arg2: memref<128x192xbf16, #tpu.memory_space<vmem>>, %arg3: memref<192x32xbf16, #tpu.memory_space<vmem>>, %arg4: memref<1x32xf32, #tpu.memory_space<vmem>>, %arg5: memref<128x32xbf16, #tpu.memory_space<vmem>>) attributes {dimension_semantics = [#tpu.dimension_semantics<parallel>, #tpu.dimension_semantics<parallel>], iteration_bounds = array<i64: 17, 1>, scalar_prefetch = 0 : i64, scratch_operands = 0 : i64, tpu.core_type = #tpu.core_type<tc>, window_params = [{transform_indices = @transform_0, window_bounds = array<i64: 128, 192>}, {transform_indices = @transform_1, window_bounds = array<i64: 192, 32>}, {transform_indices = @transform_2, window_bounds = array<i64: 1, 32>}, {transform_indices = @transform_3, window_bounds = array<i64: 128, 32>}]} {
    %c0 = arith.constant 0 : index
    %c0_0 = arith.constant 0 : index
    %0 = vector.load %arg2[%c0, %c0_0] : memref<128x192xbf16, #tpu.memory_space<vmem>>, vector<128x192xbf16>
    %c0_1 = arith.constant 0 : index
    %c0_2 = arith.constant 0 : index
    %1 = vector.load %arg3[%c0_1, %c0_2] : memref<192x32xbf16, #tpu.memory_space<vmem>>, vector<192x32xbf16>
    %cst = arith.constant dense<0.000000e+00> : vector<128x32xf32>
    %2 = tpu.matmul %0, %1, %cst {dimension_numbers = #tpu.dot_dimension_numbers<[1], [0], [0], [1], [0, 0, 1, 1], [], []>} : vector<128x192xbf16>, vector<192x32xbf16>, vector<128x32xf32> -> vector<128x32xf32>
    %c0_3 = arith.constant 0 : index
    %c0_4 = arith.constant 0 : index
    %3 = vector.load %arg4[%c0_3, %c0_4] : memref<1x32xf32, #tpu.memory_space<vmem>>, vector<1x32xf32>
    %4 = vector.broadcast %3 : vector<1x32xf32> to vector<128x32xf32>
    %5 = arith.addf %2, %4 : vector<128x32xf32>
    %cst_5 = arith.constant 0.000000e+00 : f32
    %6 = vector.broadcast %cst_5 : f32 to vector<128x32xf32>
    %7 = arith.maximumf %5, %6 : vector<128x32xf32>
    %8 = arith.truncf %7 : vector<128x32xf32> to vector<128x32xbf16>
    %c0_6 = arith.constant 0 : index
    %c0_7 = arith.constant 0 : index
    %9 = vector.load %arg5[%c0_6, %c0_7] : memref<128x32xbf16, #tpu.memory_space<vmem>>, vector<128x32xbf16>
    tpu.vector_store %arg5[%c0_6, %c0_7], %8 {strides = array<i32>} : memref<128x32xbf16, #tpu.memory_space<vmem>>, vector<128x32xbf16>,
    return
  }
  func.func @transform_0(%arg0: i32, %arg1: i32) -> (i32, i32) {
    %c0_i32 = arith.constant 0 : i32
    %c0_i32_0 = arith.constant 0 : i32
    return %arg0, %c0_i32 : i32, i32
  }
  func.func @transform_1(%arg0: i32, %arg1: i32) -> (i32, i32) {
    %c0_i32 = arith.constant 0 : i32
    %c0_i32_0 = arith.constant 0 : i32
    return %c0_i32, %arg1 : i32, i32
  }
  func.func @transform_2(%arg0: i32, %arg1: i32) -> (i32, i32) {
    %c0_i32 = arith.constant 0 : i32
    %c0_i32_0 = arith.constant 0 : i32
    return %c0_i32, %arg1 : i32, i32
  }
  func.func @transform_3(%arg0: i32, %arg1: i32) -> (i32, i32) {
    %c0_i32 = arith.constant 0 : i32
    return %arg0, %arg1 : i32, i32
  }
}

module attributes {stable_mosaic.version = 11 : i64} {
  func.func @_mm_bias_act_kernel(%arg0: i32, %arg1: i32, %arg2: memref<128x512xbf16, #tpu.memory_space<vmem>>, %arg3: memref<512x64xbf16, #tpu.memory_space<vmem>>, %arg4: memref<1x64xf32, #tpu.memory_space<vmem>>, %arg5: memref<128x64xbf16, #tpu.memory_space<vmem>>) attributes {dimension_semantics = [#tpu.dimension_semantics<parallel>, #tpu.dimension_semantics<parallel>], iteration_bounds = array<i64: 4, 1>, scalar_prefetch = 0 : i64, scratch_operands = 0 : i64, tpu.core_type = #tpu.core_type<tc>, window_params = [{transform_indices = @transform_0, window_bounds = array<i64: 128, 512>}, {transform_indices = @transform_1, window_bounds = array<i64: 512, 64>}, {transform_indices = @transform_2, window_bounds = array<i64: 1, 64>}, {transform_indices = @transform_3, window_bounds = array<i64: 128, 64>}]} {
    %c0 = arith.constant 0 : index
    %c0_0 = arith.constant 0 : index
    %0 = vector.load %arg2[%c0, %c0_0] : memref<128x512xbf16, #tpu.memory_space<vmem>>, vector<128x512xbf16>
    %c0_1 = arith.constant 0 : index
    %c0_2 = arith.constant 0 : index
    %1 = vector.load %arg3[%c0_1, %c0_2] : memref<512x64xbf16, #tpu.memory_space<vmem>>, vector<512x64xbf16>
    %cst = arith.constant dense<0.000000e+00> : vector<128x64xf32>
    %2 = tpu.matmul %0, %1, %cst {dimension_numbers = #tpu.dot_dimension_numbers<[1], [0], [0], [1], [0, 0, 1, 1], [], []>} : vector<128x512xbf16>, vector<512x64xbf16>, vector<128x64xf32> -> vector<128x64xf32>
    %c0_3 = arith.constant 0 : index
    %c0_4 = arith.constant 0 : index
    %3 = vector.load %arg4[%c0_3, %c0_4] : memref<1x64xf32, #tpu.memory_space<vmem>>, vector<1x64xf32>
    %4 = vector.broadcast %3 : vector<1x64xf32> to vector<128x64xf32>
    %5 = arith.addf %2, %4 : vector<128x64xf32>
    %cst_5 = arith.constant 0.000000e+00 : f32
    %6 = vector.broadcast %cst_5 : f32 to vector<128x64xf32>
    %7 = arith.maximumf %5, %6 : vector<128x64xf32>
    %8 = arith.truncf %7 : vector<128x64xf32> to vector<128x64xbf16>
    %c0_6 = arith.constant 0 : index
    %c0_7 = arith.constant 0 : index
    %9 = vector.load %arg5[%c0_6, %c0_7] : memref<128x64xbf16, #tpu.memory_space<vmem>>, vector<128x64xbf16>
    tpu.vector_store %arg5[%c0_6, %c0_7], %8 {strides = array<i32>} : memref<128x64xbf16, #tpu.memory_space<vmem>>, vector<128x64xbf16>,
    return
  }
  func.func @transform_0(%arg0: i32, %arg1: i32) -> (i32, i32) {
    %c0_i32 = arith.constant 0 : i32
    %c0_i32_0 = arith.constant 0 : i32
    return %arg0, %c0_i32 : i32, i32
  }
  func.func @transform_1(%arg0: i32, %arg1: i32) -> (i32, i32) {
    %c0_i32 = arith.constant 0 : i32
    %c0_i32_0 = arith.constant 0 : i32
    return %c0_i32, %arg1 : i32, i32
  }
  func.func @transform_2(%arg0: i32, %arg1: i32) -> (i32, i32) {
    %c0_i32 = arith.constant 0 : i32
    %c0_i32_0 = arith.constant 0 : i32
    return %c0_i32, %arg1 : i32, i32
  }
  func.func @transform_3(%arg0: i32, %arg1: i32) -> (i32, i32) {
    %c0_i32 = arith.constant 0 : i32
    return %arg0, %arg1 : i32, i32
  }
}

module attributes {stable_mosaic.version = 11 : i64} {
  func.func @_mm_bias_act_kernel(%arg0: i32, %arg1: i32, %arg2: memref<128x576xbf16, #tpu.memory_space<vmem>>, %arg3: memref<576x128xbf16, #tpu.memory_space<vmem>>, %arg4: memref<1x128xf32, #tpu.memory_space<vmem>>, %arg5: memref<128x128xbf16, #tpu.memory_space<vmem>>) attributes {dimension_semantics = [#tpu.dimension_semantics<parallel>, #tpu.dimension_semantics<parallel>], iteration_bounds = array<i64: 3, 1>, scalar_prefetch = 0 : i64, scratch_operands = 0 : i64, tpu.core_type = #tpu.core_type<tc>, window_params = [{transform_indices = @transform_0, window_bounds = array<i64: 128, 576>}, {transform_indices = @transform_1, window_bounds = array<i64: 576, 128>}, {transform_indices = @transform_2, window_bounds = array<i64: 1, 128>}, {transform_indices = @transform_3, window_bounds = array<i64: 128, 128>}]} {
    %c0 = arith.constant 0 : index
    %c0_0 = arith.constant 0 : index
    %0 = vector.load %arg2[%c0, %c0_0] : memref<128x576xbf16, #tpu.memory_space<vmem>>, vector<128x576xbf16>
    %c0_1 = arith.constant 0 : index
    %c0_2 = arith.constant 0 : index
    %1 = vector.load %arg3[%c0_1, %c0_2] : memref<576x128xbf16, #tpu.memory_space<vmem>>, vector<576x128xbf16>
    %cst = arith.constant dense<0.000000e+00> : vector<128x128xf32>
    %2 = tpu.matmul %0, %1, %cst {dimension_numbers = #tpu.dot_dimension_numbers<[1], [0], [0], [1], [0, 0, 1, 1], [], []>} : vector<128x576xbf16>, vector<576x128xbf16>, vector<128x128xf32> -> vector<128x128xf32>
    %c0_3 = arith.constant 0 : index
    %c0_4 = arith.constant 0 : index
    %3 = vector.load %arg4[%c0_3, %c0_4] : memref<1x128xf32, #tpu.memory_space<vmem>>, vector<1x128xf32>
    %4 = vector.broadcast %3 : vector<1x128xf32> to vector<128x128xf32>
    %5 = arith.addf %2, %4 : vector<128x128xf32>
    %cst_5 = arith.constant 0.000000e+00 : f32
    %6 = vector.broadcast %cst_5 : f32 to vector<128x128xf32>
    %7 = arith.maximumf %5, %6 : vector<128x128xf32>
    %8 = arith.truncf %7 : vector<128x128xf32> to vector<128x128xbf16>
    %c0_6 = arith.constant 0 : index
    %c0_7 = arith.constant 0 : index
    %9 = vector.load %arg5[%c0_6, %c0_7] : memref<128x128xbf16, #tpu.memory_space<vmem>>, vector<128x128xbf16>
    tpu.vector_store %arg5[%c0_6, %c0_7], %8 {strides = array<i32>} : memref<128x128xbf16, #tpu.memory_space<vmem>>, vector<128x128xbf16>,
    return
  }
  func.func @transform_0(%arg0: i32, %arg1: i32) -> (i32, i32) {
    %c0_i32 = arith.constant 0 : i32
    %c0_i32_0 = arith.constant 0 : i32
    return %arg0, %c0_i32 : i32, i32
  }
  func.func @transform_1(%arg0: i32, %arg1: i32) -> (i32, i32) {
    %c0_i32 = arith.constant 0 : i32
    %c0_i32_0 = arith.constant 0 : i32
    return %c0_i32, %arg1 : i32, i32
  }
  func.func @transform_2(%arg0: i32, %arg1: i32) -> (i32, i32) {
    %c0_i32 = arith.constant 0 : i32
    %c0_i32_0 = arith.constant 0 : i32
    return %c0_i32, %arg1 : i32, i32
  }
  func.func @transform_3(%arg0: i32, %arg1: i32) -> (i32, i32) {
    %c0_i32 = arith.constant 0 : i32
    return %arg0, %arg1 : i32, i32
  }
}

module attributes {stable_mosaic.version = 11 : i64} {
  func.func @_mm_bias_act_acc_kernel(%arg0: i32, %arg1: i32, %arg2: i32, %arg3: memref<2x2432xbf16, #tpu.memory_space<vmem>>, %arg4: memref<2432x256xbf16, #tpu.memory_space<vmem>>, %arg5: memref<1x256xf32, #tpu.memory_space<vmem>>, %arg6: memref<2x256xbf16, #tpu.memory_space<vmem>>, %arg7: memref<2x256xf32, #tpu.memory_space<vmem>>) attributes {dimension_semantics = [#tpu.dimension_semantics<parallel>, #tpu.dimension_semantics<parallel>, #tpu.dimension_semantics<arbitrary>], iteration_bounds = array<i64: 1, 2, 8>, scalar_prefetch = 0 : i64, scratch_operands = 1 : i64, tpu.core_type = #tpu.core_type<tc>, window_params = [{transform_indices = @transform_0, window_bounds = array<i64: 2, 2432>}, {transform_indices = @transform_1, window_bounds = array<i64: 2432, 256>}, {transform_indices = @transform_2, window_bounds = array<i64: 1, 256>}, {transform_indices = @transform_3, window_bounds = array<i64: 2, 256>}]} {
    %c0_i32 = arith.constant 0 : i32
    %0 = arith.cmpi eq, %arg2, %c0_i32 : i32
    %1 = arith.extui %0 : i1 to i32
    %c0_i32_0 = arith.constant 0 : i32
    %2 = arith.cmpi ne, %1, %c0_i32_0 : i32
    scf.if %2 {
      %cst_9 = arith.constant 0.000000e+00 : f32
      %12 = vector.broadcast %cst_9 : f32 to vector<2x256xf32>
      %c0_10 = arith.constant 0 : index
      %c0_11 = arith.constant 0 : index
      %13 = vector.load %arg7[%c0_10, %c0_11] : memref<2x256xf32, #tpu.memory_space<vmem>>, vector<2x256xf32>
      tpu.vector_store %arg7[%c0_10, %c0_11], %12 {strides = array<i32>} : memref<2x256xf32, #tpu.memory_space<vmem>>, vector<2x256xf32>,
    } else {
    }
    %c0 = arith.constant 0 : index
    %c0_1 = arith.constant 0 : index
    %3 = vector.load %arg7[%c0, %c0_1] : memref<2x256xf32, #tpu.memory_space<vmem>>, vector<2x256xf32>
    %c0_2 = arith.constant 0 : index
    %c0_3 = arith.constant 0 : index
    %4 = vector.load %arg3[%c0_2, %c0_3] : memref<2x2432xbf16, #tpu.memory_space<vmem>>, vector<2x2432xbf16>
    %c0_4 = arith.constant 0 : index
    %c0_5 = arith.constant 0 : index
    %5 = vector.load %arg4[%c0_4, %c0_5] : memref<2432x256xbf16, #tpu.memory_space<vmem>>, vector<2432x256xbf16>
    %cst = arith.constant dense<0.000000e+00> : vector<2x256xf32>
    %6 = tpu.matmul %4, %5, %cst {dimension_numbers = #tpu.dot_dimension_numbers<[1], [0], [0], [1], [0, 0, 1, 1], [], []>} : vector<2x2432xbf16>, vector<2432x256xbf16>, vector<2x256xf32> -> vector<2x256xf32>
    %7 = arith.addf %3, %6 : vector<2x256xf32>
    %c0_6 = arith.constant 0 : index
    %c0_7 = arith.constant 0 : index
    %8 = vector.load %arg7[%c0_6, %c0_7] : memref<2x256xf32, #tpu.memory_space<vmem>>, vector<2x256xf32>
    tpu.vector_store %arg7[%c0_6, %c0_7], %7 {strides = array<i32>} : memref<2x256xf32, #tpu.memory_space<vmem>>, vector<2x256xf32>,
    %c7_i32 = arith.constant 7 : i32
    %9 = arith.cmpi eq, %arg2, %c7_i32 : i32
    %10 = arith.extui %9 : i1 to i32
    %c0_i32_8 = arith.constant 0 : i32
    %11 = arith.cmpi ne, %10, %c0_i32_8 : i32
    scf.if %11 {
      %c0_9 = arith.constant 0 : index
      %c0_10 = arith.constant 0 : index
      %12 = vector.load %arg7[%c0_9, %c0_10] : memref<2x256xf32, #tpu.memory_space<vmem>>, vector<2x256xf32>
      %c0_11 = arith.constant 0 : index
      %c0_12 = arith.constant 0 : index
      %13 = vector.load %arg5[%c0_11, %c0_12] : memref<1x256xf32, #tpu.memory_space<vmem>>, vector<1x256xf32>
      %14 = vector.broadcast %13 : vector<1x256xf32> to vector<2x256xf32>
      %15 = arith.addf %12, %14 : vector<2x256xf32>
      %cst_13 = arith.constant 0.000000e+00 : f32
      %16 = vector.broadcast %cst_13 : f32 to vector<2x256xf32>
      %17 = arith.maximumf %15, %16 : vector<2x256xf32>
      %18 = arith.truncf %17 : vector<2x256xf32> to vector<2x256xbf16>
      %c0_14 = arith.constant 0 : index
      %c0_15 = arith.constant 0 : index
      %19 = vector.load %arg6[%c0_14, %c0_15] : memref<2x256xbf16, #tpu.memory_space<vmem>>, vector<2x256xbf16>
      tpu.vector_store %arg6[%c0_14, %c0_15], %18 {strides = array<i32>} : memref<2x256xbf16, #tpu.memory_space<vmem>>, vector<2x256xbf16>,
    } else {
    }
    return
  }
  func.func @transform_0(%arg0: i32, %arg1: i32, %arg2: i32) -> (i32, i32) {
    %c0_i32 = arith.constant 0 : i32
    return %arg0, %arg2 : i32, i32
  }
  func.func @transform_1(%arg0: i32, %arg1: i32, %arg2: i32) -> (i32, i32) {
    %c0_i32 = arith.constant 0 : i32
    return %arg2, %arg1 : i32, i32
  }
  func.func @transform_2(%arg0: i32, %arg1: i32, %arg2: i32) -> (i32, i32) {
    %c0_i32 = arith.constant 0 : i32
    %c0_i32_0 = arith.constant 0 : i32
    return %c0_i32, %arg1 : i32, i32
  }
  func.func @transform_3(%arg0: i32, %arg1: i32, %arg2: i32) -> (i32, i32) {
    %c0_i32 = arith.constant 0 : i32
    return %arg0, %arg1 : i32, i32
  }
}

module attributes {stable_mosaic.version = 11 : i64} {
  func.func @_fc_head_kernel(%arg0: memref<2x512xbf16, #tpu.memory_space<vmem>>, %arg1: memref<512x128xbf16, #tpu.memory_space<vmem>>, %arg2: memref<1x128xf32, #tpu.memory_space<vmem>>, %arg3: memref<128x128xbf16, #tpu.memory_space<vmem>>, %arg4: memref<1x128xf32, #tpu.memory_space<vmem>>, %arg5: memref<128x128xbf16, #tpu.memory_space<vmem>>, %arg6: memref<1x128xf32, #tpu.memory_space<vmem>>, %arg7: memref<2x128xf32, #tpu.memory_space<vmem>>) attributes {dimension_semantics = [], scalar_prefetch = 0 : i64, scratch_operands = 0 : i64, tpu.core_type = #tpu.core_type<tc>} {
    %c0 = arith.constant 0 : index
    %c0_0 = arith.constant 0 : index
    %0 = vector.load %arg0[%c0, %c0_0] : memref<2x512xbf16, #tpu.memory_space<vmem>>, vector<2x512xbf16>
    %c0_1 = arith.constant 0 : index
    %c0_2 = arith.constant 0 : index
    %1 = vector.load %arg1[%c0_1, %c0_2] : memref<512x128xbf16, #tpu.memory_space<vmem>>, vector<512x128xbf16>
    %cst = arith.constant dense<0.000000e+00> : vector<2x128xf32>
    %2 = tpu.matmul %0, %1, %cst {dimension_numbers = #tpu.dot_dimension_numbers<[1], [0], [0], [1], [0, 0, 1, 1], [], []>} : vector<2x512xbf16>, vector<512x128xbf16>, vector<2x128xf32> -> vector<2x128xf32>
    %c0_3 = arith.constant 0 : index
    %c0_4 = arith.constant 0 : index
    %3 = vector.load %arg2[%c0_3, %c0_4] : memref<1x128xf32, #tpu.memory_space<vmem>>, vector<1x128xf32>
    %4 = vector.broadcast %3 : vector<1x128xf32> to vector<2x128xf32>
    %5 = arith.addf %2, %4 : vector<2x128xf32>
    %cst_5 = arith.constant 0.000000e+00 : f32
    %6 = vector.broadcast %cst_5 : f32 to vector<2x128xf32>
    %7 = arith.maximumf %5, %6 : vector<2x128xf32>
    %8 = arith.truncf %7 : vector<2x128xf32> to vector<2x128xbf16>
    %c0_6 = arith.constant 0 : index
    %c0_7 = arith.constant 0 : index
    %9 = vector.load %arg3[%c0_6, %c0_7] : memref<128x128xbf16, #tpu.memory_space<vmem>>, vector<128x128xbf16>
    %cst_8 = arith.constant dense<0.000000e+00> : vector<2x128xf32>
    %10 = tpu.matmul %8, %9, %cst_8 {dimension_numbers = #tpu.dot_dimension_numbers<[1], [0], [0], [1], [0, 0, 1, 1], [], []>} : vector<2x128xbf16>, vector<128x128xbf16>, vector<2x128xf32> -> vector<2x128xf32>
    %c0_9 = arith.constant 0 : index
    %c0_10 = arith.constant 0 : index
    %11 = vector.load %arg4[%c0_9, %c0_10] : memref<1x128xf32, #tpu.memory_space<vmem>>, vector<1x128xf32>
    %12 = vector.broadcast %11 : vector<1x128xf32> to vector<2x128xf32>
    %13 = arith.addf %10, %12 : vector<2x128xf32>
    %cst_11 = arith.constant 0.000000e+00 : f32
    %14 = vector.broadcast %cst_11 : f32 to vector<2x128xf32>
    %15 = arith.maximumf %13, %14 : vector<2x128xf32>
    %16 = arith.truncf %15 : vector<2x128xf32> to vector<2x128xbf16>
    %c0_12 = arith.constant 0 : index
    %c0_13 = arith.constant 0 : index
    %17 = vector.load %arg5[%c0_12, %c0_13] : memref<128x128xbf16, #tpu.memory_space<vmem>>, vector<128x128xbf16>
    %cst_14 = arith.constant dense<0.000000e+00> : vector<2x128xf32>
    %18 = tpu.matmul %16, %17, %cst_14 {dimension_numbers = #tpu.dot_dimension_numbers<[1], [0], [0], [1], [0, 0, 1, 1], [], []>} : vector<2x128xbf16>, vector<128x128xbf16>, vector<2x128xf32> -> vector<2x128xf32>
    %c0_15 = arith.constant 0 : index
    %c0_16 = arith.constant 0 : index
    %19 = vector.load %arg6[%c0_15, %c0_16] : memref<1x128xf32, #tpu.memory_space<vmem>>, vector<1x128xf32>
    %20 = vector.broadcast %19 : vector<1x128xf32> to vector<2x128xf32>
    %21 = arith.addf %18, %20 : vector<2x128xf32>
    %c0_17 = arith.constant 0 : index
    %c0_18 = arith.constant 0 : index
    %22 = vector.load %arg7[%c0_17, %c0_18] : memref<2x128xf32, #tpu.memory_space<vmem>>, vector<2x128xf32>
    tpu.vector_store %arg7[%c0_17, %c0_18], %21 {strides = array<i32>} : memref<2x128xf32, #tpu.memory_space<vmem>>, vector<2x128xf32>,
    return
  }
}

</mosaic_0001>

<bundles_post_ra>
// kernel: deep_q_forward.5
= control target key start
LH: loop header
LB: loop body
LE: loop exit
PB: predicated region body
PF: predicated region fallthrough
CT: control target
= control target key end

     0   :  { %s955_s12 = smov 0   ;;  %s957_s13 = smov 0   ;;  %s1133_s0 = inlined_call_operand.vmem [shape: bf16[2176,192], index: 0, kind: input, shape index: {}]   ;;  %s1134_s1 = inlined_call_operand.vmem [shape: bf16[192,32], index: 1, kind: input, shape index: {}]   ;;  %s1135_s2 = inlined_call_operand.vmem [shape: f32[1,32], index: 2, kind: input, shape index: {}]   ;;  %s1136_s3 = inlined_call_operand.vmem [shape: bf16[2176,32], index: 3, kind: output, shape index: {}]  }
   0x1   :  { %s959_s14 = smov 0  }
   0x2 LB: > { %s25_s15 = sadd.s32 1, %s928_s13  ;;  %p747_p0 = scmp.ge.s32.totalorder %s932_s14, 1  ;;  %s932_s14 = sphi %s959_s14, %s13_s14   ;;  %s928_s13 = sphi %s957_s13, %s1138_s13   ;;  %s924_s12 = sphi %s955_s12, %s1137_s12  }
   0x3   : > { %p27_p1 = scmp.ge.s32.totalorder %s25_s15, 17  ;;  %p170_p2 = scmp.lt.s32.totalorder %s932_s14, 18 }
   0x5   : > { %s1140_s15 = smov (%p27_p1, %s25_s15), 0  ;;  %p171_p3 = pnand %p747_p0, %p170_p2 }
   0x6   : > { %s748_s18 = sshll.u32 (!%p171_p3), %s924_s12, 4 }
   0x7   : > { %174 = sbr.rel (%p171_p3) target bundleno = 289 (0x121), region = 32  ;;  %p206_p4 = scmp.lt.s32.totalorder (!%p171_p3), %s748_s18, 271 }
   0xc   : > { %v874_v0 = vld [vmem:[%s1134_s1 + $0x38] sm:$0xff]   ;;  %v934_v1 = vmov 0   ;;  %v875_v2 = vld [vmem:[%s1134_s1 + $0x30] sm:$0xff]   ;;  %s1142_s18 = smov (!%p206_p4, %s748_s18), 271  ;;  %v876_v3 = vld [vmem:[%s1134_s1 + $0x28] sm:$0xff]   ;;  %vm420_vm0 = vcmask 523264  }
   0xd   : > { %445 = vmatprep.subr.bf16.mxu0 %v934_v1  ;;  %825 = vmatprep.subr.bf16.mxu1 %v934_v1  ;;  %s808_s23 = sshll.u32 %s1142_s18, 3  ;;  %v877_v4 = vld [vmem:[%s1134_s1 + $0x20] sm:$0xff]   ;;  %v878_v6 = vld [vmem:[%s1134_s1 + $0x18] sm:$0xff]   ;;  %v879_v8 = vld [vmem:[%s1134_s1 + $0x10] sm:$0xff]   ;;  %s752_s24 = sshll.u32 %s1142_s18, 2  ;;  %vm622_vm1 = vcmask 257024  }
   0xe   : > { %446 = vmatpush1.bf16.msra.mxu0 %v874_v0  ;;  %837 = vmatpush1.bf16.msra.mxu1 %v874_v0  ;;  %s997_s28 = scalar_lea.vmem %s1133_s0, %s808_s23  ;;  %v880_v9 = vld [vmem:[%s1134_s1 + $0x8] sm:$0xff]   ;;  %v881_v10 = vld [vmem:[%s1134_s1] sm:$0xff]   ;;  %v882_v11 = vld [vmem:[%s1134_s1 + $0x58] sm:$0xff]   ;;  %s1076_s27 = scalar_lea.vmem %s1136_s3, %s752_s24 }
   0xf   : > { %447 = vmatprep.subr.bf16.mxu0 %v934_v1  ;;  %826 = vmatprep.subr.bf16.mxu1 %v934_v1  ;;  %v888_v5 = vld [vmem:[%s997_s28 + $0x4] ss:$8 sps:$4 sm:$0xff]   ;;  %v883_v12 = vld [vmem:[%s1134_s1 + $0x50] sm:$0xff]   ;;  %v886_v15 = vld [vmem:[%s997_s28] ss:$8 sps:$4 sm:$0xff]  }
  0x10   : > { %v891_v7 = vld [vmem:[%s997_s28 + $0x44] ss:$8 sps:$4 sm:$0xff]   ;;  %782 = vmatprep.mubr.msk.bf16.mxu0 %vm420_vm0, %v888_v5  ;;  %v889_v16 = vld [vmem:[%s997_s28 + $0x40] ss:$8 sps:$4 sm:$0xff]   ;;  %v892_v17 = vld [vmem:[%s997_s28 + $0x14] ss:$8 sps:$4 sm:$0xff]  }
  0x11   : > { %786 = vmatprep.mubr.msk.bf16.mxu1 %vm420_vm0, %v891_v7  ;;  %v884_v13 = vld [vmem:[%s1134_s1 + $0x48] sm:$0xff]   ;;  %v885_v14 = vld [vmem:[%s1134_s1 + $0x40] sm:$0xff]   ;;  %v894_v18 = vld [vmem:[%s997_s28 + $0x54] ss:$8 sps:$4 sm:$0xff]  }
  0x12   : > { %448 = vmatpush1.bf16.msra.mxu0 %v875_v2  ;;  %838 = vmatpush1.bf16.msra.mxu1 %v875_v2  ;;  %v896_v19 = vld [vmem:[%s997_s28 + $0x10] ss:$8 sps:$4 sm:$0xff]   ;;  %v898_v21 = vld [vmem:[%s997_s28 + $0x24] ss:$8 sps:$4 sm:$0xff]   ;;  %v902_v23 = vld [vmem:[%s997_s28 + $0x20] ss:$8 sps:$4 sm:$0xff]  }
  0x13   : > { %449 = vmatprep.subr.bf16.mxu0 %v934_v1  ;;  %827 = vmatprep.subr.bf16.mxu1 %v934_v1  ;;  %v897_v20 = vld [vmem:[%s997_s28 + $0x50] ss:$8 sps:$4 sm:$0xff]   ;;  %v900_v22 = vld [vmem:[%s997_s28 + $0x64] ss:$8 sps:$4 sm:$0xff]   ;;  %v903_v24 = vld [vmem:[%s997_s28 + $0x60] ss:$8 sps:$4 sm:$0xff]  }
  0x14   : > { %v904_v25 = vld [vmem:[%s997_s28 + $0x34] ss:$8 sps:$4 sm:$0xff]   ;;  %v908_v27 = vld [vmem:[%s997_s28 + $0x30] ss:$8 sps:$4 sm:$0xff]   ;;  %v1068_v29 = vld [vmem:[%s1135_s2] ss:$0 sm:$0xff] }
  0x15   : > { %v906_v26 = vld [vmem:[%s997_s28 + $0x74] ss:$8 sps:$4 sm:$0xff]   ;;  %v909_v28 = vld [vmem:[%s997_s28 + $0x70] ss:$8 sps:$4 sm:$0xff]  }
  0x16   : > { %450 = vmatpush1.bf16.msra.mxu0 %v876_v3  ;;  %839 = vmatpush1.bf16.msra.mxu1 %v876_v3 }
  0x17   : > { %451 = vmatprep.subr.bf16.mxu0 %v934_v1  ;;  %828 = vmatprep.subr.bf16.mxu1 %v934_v1 }
  0x1a   : > { %452 = vmatpush1.bf16.msra.mxu0 %v877_v4  ;;  %840 = vmatpush1.bf16.msra.mxu1 %v877_v4 }
  0x1b   : > { %453 = vmatprep.subr.bf16.mxu0 %v934_v1  ;;  %829 = vmatprep.subr.bf16.mxu1 %v934_v1 }
  0x1e   : > { %454 = vmatpush1.bf16.msra.mxu0 %v878_v6  ;;  %841 = vmatpush1.bf16.msra.mxu1 %v878_v6 }
  0x1f   : > { %455 = vmatprep.subr.bf16.mxu0 %v934_v1  ;;  %830 = vmatprep.subr.bf16.mxu1 %v934_v1 }
  0x22   : > { %456 = vmatpush1.bf16.msra.mxu0 %v879_v8  ;;  %842 = vmatpush1.bf16.msra.mxu1 %v879_v8 }
  0x23   : > { %457 = vmatprep.subr.bf16.mxu0 %v934_v1  ;;  %831 = vmatprep.subr.bf16.mxu1 %v934_v1 }
  0x26   : > { %458 = vmatpush1.bf16.msra.mxu0 %v880_v9  ;;  %843 = vmatpush1.bf16.msra.mxu1 %v880_v9 }
  0x27   : > { %459 = vmatprep.subr.bf16.mxu0 %v934_v1  ;;  %832 = vmatprep.subr.bf16.mxu1 %v934_v1 }
  0x2a   : > { %460 = vmatpush1.bf16.msra.mxu0 %v881_v10  ;;  %844 = vmatpush1.bf16.msra.mxu1 %v881_v10 }
  0x2b   : > { %469 = vmatprep.subr.bf16.mxu0 %v934_v1  ;;  %833 = vmatprep.subr.bf16.mxu1 %v934_v1 }
  0x2e   : > { %470 = vmatpush2.bf16.msra.mxu0 %v882_v11  ;;  %845 = vmatpush2.bf16.msra.mxu1 %v882_v11 }
  0x2f   : > { %471 = vmatprep.subr.bf16.mxu0 %v934_v1  ;;  %834 = vmatprep.subr.bf16.mxu1 %v934_v1 }
  0x32   : > { %472 = vmatpush2.bf16.msra.mxu0 %v883_v12  ;;  %846 = vmatpush2.bf16.msra.mxu1 %v883_v12 }
  0x33   : > { %473 = vmatprep.subr.bf16.mxu0 %v934_v1  ;;  %835 = vmatprep.subr.bf16.mxu1 %v934_v1 }
  0x36   : > { %474 = vmatpush2.bf16.msra.mxu0 %v884_v13  ;;  %847 = vmatpush2.bf16.msra.mxu1 %v884_v13 }
  0x37   : > { %475 = vmatprep.subr.bf16.mxu0 %v934_v1  ;;  %836 = vmatprep.subr.bf16.mxu1 %v934_v1 }
  0x3a   : > { %476 = vmatpush2.bf16.msra.mxu0 %v885_v14  ;;  %848 = vmatpush2.bf16.msra.mxu1 %v885_v14 }
  0x3d   : > { %478 = vmatmul.mubr.bf16.vlgmr.msra.gmra.mxu0 %v886_v15  ;;  %510 = vmatmul.mubr.bf16.vlgmr.msra.gmra.mxu1 %v889_v16 }
  0x3e   : > { %783 = vmatprep.mubr.msk.bf16.mxu0 %vm420_vm0, %v892_v17  ;;  %787 = vmatprep.mubr.msk.bf16.mxu1 %vm420_vm0, %v894_v18 }
  0x45   : > { %486 = vmatmul.mubr.bf16.gmra.mxu0 %v896_v19  ;;  %518 = vmatmul.mubr.bf16.gmra.mxu1 %v897_v20 }
  0x46   : > { %784 = vmatprep.mubr.msk.bf16.mxu0 %vm420_vm0, %v898_v21  ;;  %788 = vmatprep.mubr.msk.bf16.mxu1 %vm420_vm0, %v900_v22 }
  0x4d   : > { %494 = vmatmul.mubr.bf16.gmra.mxu0 %v902_v23  ;;  %526 = vmatmul.mubr.bf16.gmra.mxu1 %v903_v24 }
  0x4e   : > { %785 = vmatprep.mubr.msk.bf16.mxu0 %vm420_vm0, %v904_v25  ;;  %789 = vmatprep.mubr.msk.bf16.mxu1 %vm420_vm0, %v906_v26 }
  0x55   : > { %502 = vmatmul.mubr.bf16.gmra.mxu0 %v908_v27  ;;  %534 = vmatmul.mubr.bf16.gmra.mxu1 %v909_v28 }
  0xfd   : > { %v479_v30 = vpop.f32.mrf.mxu0  ;;  %v511_v31 = vpop.f32.mrf.mxu1 }
  0xfe   : > { %v480_v32 = vadd.f32 %v1068_v29, %v479_v30  ;;  %v512_v33 = vadd.f32 %v1068_v29, %v511_v31 }
  0xff   : > { %v481_v34 = vpop.f32.mrf.mxu0  ;;  %v513_v35 = vpop.f32.mrf.mxu1 }
 0x100   : > { %v542_v36 = vmax.f32 %v480_v32, 0.0  ;;  %v550_v37 = vmax.f32 %v512_v33, 0.0 }
 0x101   : > { %v482_v38 = vpop.f32.mrf.mxu0  ;;  %v514_v39 = vpop.f32.mrf.mxu1 }
 0x102   : > { %v809_v40 = vpack.c.bf16 %v542_v36, %v542_v36  ;;  %v817_v41 = vpack.c.bf16 %v550_v37, %v550_v37  ;;  %v483_v42 = vadd.f32 %v1068_v29, %v482_v38  ;;  %v515_v43 = vadd.f32 %v1068_v29, %v514_v39 }
 0x103   : > { %v484_v44 = vpop.f32.mrf.mxu0  ;;  %v516_v45 = vpop.f32.mrf.mxu1 }
 0x104   : > { %623 = vst.msk [vmem:[%s1076_s27] sm:$0xf] %vm622_vm1, %v809_v40  ;;  %631 = vst.msk [vmem:[%s1076_s27 + $0x20] sm:$0xf] %vm622_vm1, %v817_v41  ;;  %v543_v46 = vmax.f32 %v483_v42, 0.0  ;;  %v551_v47 = vmax.f32 %v515_v43, 0.0 }
 0x105   : > { %v487_v48 = vpop.f32.mrf.mxu0  ;;  %v519_v49 = vpop.f32.mrf.mxu1 }
 0x106   : > { %v810_v50 = vpack.c.bf16 %v543_v46, %v543_v46  ;;  %v818_v51 = vpack.c.bf16 %v551_v47, %v551_v47  ;;  %v488_v52 = vadd.f32 %v1068_v29, %v487_v48  ;;  %v520_v53 = vadd.f32 %v1068_v29, %v519_v49 }
 0x107   : > { %v489_v54 = vpop.f32.mrf.mxu0  ;;  %v521_v55 = vpop.f32.mrf.mxu1 }
 0x108   : > { %624 = vst.msk [vmem:[%s1076_s27 + $0x4] sm:$0xf] %vm622_vm1, %v810_v50  ;;  %632 = vst.msk [vmem:[%s1076_s27 + $0x24] sm:$0xf] %vm622_vm1, %v818_v51  ;;  %v544_v56 = vmax.f32 %v488_v52, 0.0  ;;  %v552_v57 = vmax.f32 %v520_v53, 0.0 }
 0x109   : > { %v490_v58 = vpop.f32.mrf.mxu0  ;;  %v522_v59 = vpop.f32.mrf.mxu1 }
 0x10a   : > { %v811_v60 = vpack.c.bf16 %v544_v56, %v544_v56  ;;  %v819_v61 = vpack.c.bf16 %v552_v57, %v552_v57  ;;  %v491_v62 = vadd.f32 %v1068_v29, %v490_v58  ;;  %v523_v63 = vadd.f32 %v1068_v29, %v522_v59 }
 0x10b   : > { %v492_v0 = vpop.f32.mrf.mxu0  ;;  %v524_v1 = vpop.f32.mrf.mxu1 }
 0x10c   : > { %625 = vst.msk [vmem:[%s1076_s27 + $0x8] sm:$0xf] %vm622_vm1, %v811_v60  ;;  %633 = vst.msk [vmem:[%s1076_s27 + $0x28] sm:$0xf] %vm622_vm1, %v819_v61  ;;  %v545_v2 = vmax.f32 %v491_v62, 0.0  ;;  %v553_v3 = vmax.f32 %v523_v63, 0.0 }
 0x10d   : > { %v495_v4 = vpop.f32.mrf.mxu0  ;;  %v527_v5 = vpop.f32.mrf.mxu1 }
 0x10e   : > { %v812_v6 = vpack.c.bf16 %v545_v2, %v545_v2  ;;  %v820_v7 = vpack.c.bf16 %v553_v3, %v553_v3  ;;  %v496_v8 = vadd.f32 %v1068_v29, %v495_v4  ;;  %v528_v9 = vadd.f32 %v1068_v29, %v527_v5 }
 0x10f   : > { %v497_v10 = vpop.f32.mrf.mxu0  ;;  %v529_v11 = vpop.f32.mrf.mxu1 }
 0x110   : > { %626 = vst.msk [vmem:[%s1076_s27 + $0xc] sm:$0xf] %vm622_vm1, %v812_v6  ;;  %634 = vst.msk [vmem:[%s1076_s27 + $0x2c] sm:$0xf] %vm622_vm1, %v820_v7  ;;  %v546_v12 = vmax.f32 %v496_v8, 0.0  ;;  %v554_v13 = vmax.f32 %v528_v9, 0.0 }
 0x111   : > { %v498_v14 = vpop.f32.mrf.mxu0  ;;  %v530_v15 = vpop.f32.mrf.mxu1 }
 0x112   : > { %v813_v16 = vpack.c.bf16 %v546_v12, %v546_v12  ;;  %v821_v17 = vpack.c.bf16 %v554_v13, %v554_v13  ;;  %v499_v18 = vadd.f32 %v1068_v29, %v498_v14  ;;  %v531_v19 = vadd.f32 %v1068_v29, %v530_v15 }
 0x113   : > { %v500_v20 = vpop.f32.mrf.mxu0  ;;  %v532_v21 = vpop.f32.mrf.mxu1 }
 0x114   : > { %627 = vst.msk [vmem:[%s1076_s27 + $0x10] sm:$0xf] %vm622_vm1, %v813_v16  ;;  %635 = vst.msk [vmem:[%s1076_s27 + $0x30] sm:$0xf] %vm622_vm1, %v821_v17  ;;  %v547_v22 = vmax.f32 %v499_v18, 0.0  ;;  %v555_v23 = vmax.f32 %v531_v19, 0.0 }
 0x115   : > { %v503_v24 = vpop.f32.mrf.mxu0  ;;  %v535_v25 = vpop.f32.mrf.mxu1 }
 0x116   : > { %v814_v26 = vpack.c.bf16 %v547_v22, %v547_v22  ;;  %v822_v27 = vpack.c.bf16 %v555_v23, %v555_v23  ;;  %v504_v28 = vadd.f32 %v1068_v29, %v503_v24  ;;  %v536_v30 = vadd.f32 %v1068_v29, %v535_v25 }
 0x117   : > { %v505_v31 = vpop.f32.mrf.mxu0  ;;  %v537_v32 = vpop.f32.mrf.mxu1 }
 0x118   : > { %628 = vst.msk [vmem:[%s1076_s27 + $0x14] sm:$0xf] %vm622_vm1, %v814_v26  ;;  %636 = vst.msk [vmem:[%s1076_s27 + $0x34] sm:$0xf] %vm622_vm1, %v822_v27  ;;  %v548_v33 = vmax.f32 %v504_v28, 0.0  ;;  %v556_v34 = vmax.f32 %v536_v30, 0.0 }
 0x119   : > { %v506_v35 = vpop.f32.mrf.mxu0  ;;  %v538_v36 = vpop.f32.mrf.mxu1 }
 0x11a   : > { %v815_v37 = vpack.c.bf16 %v548_v33, %v548_v33  ;;  %v823_v38 = vpack.c.bf16 %v556_v34, %v556_v34  ;;  %v507_v39 = vadd.f32 %v1068_v29, %v506_v35  ;;  %v539_v40 = vadd.f32 %v1068_v29, %v538_v36 }
 0x11b   : > { %v508_v41 = vpop.f32.mrf.mxu0  ;;  %v540_v42 = vpop.f32.mrf.mxu1 }
 0x11c   : > { %629 = vst.msk [vmem:[%s1076_s27 + $0x18] sm:$0xf] %vm622_vm1, %v815_v37  ;;  %637 = vst.msk [vmem:[%s1076_s27 + $0x38] sm:$0xf] %vm622_vm1, %v823_v38  ;;  %v549_v43 = vmax.f32 %v507_v39, 0.0  ;;  %v557_v44 = vmax.f32 %v539_v40, 0.0 }
 0x11e   : > { %v816_v45 = vpack.c.bf16 %v549_v43, %v549_v43  ;;  %v824_v46 = vpack.c.bf16 %v557_v44, %v557_v44 }
 0x120   : > { %630 = vst.msk [vmem:[%s1076_s27 + $0x1c] sm:$0xf] %vm622_vm1, %v816_v45  ;;  %638 = vst.msk [vmem:[%s1076_s27 + $0x3c] sm:$0xf] %vm622_vm1, %v824_v46 }
 0x121 PF: > { %s13_s14 = sadd.s32 1, %s932_s14   ;;  %s1137_s12 = smov %s928_s13 }
 0x122   : > { %p10_p5 = scmp.ge.s32.totalorder %s13_s14, 19   ;;  %s1138_s13 = smov %s1140_s15 }
 0x124   :  { %12 = sbr.rel (!%p10_p5) target bundleno = 2 (0x2), region = 68 }

// kernel: deep_q_forward.6
= control target key start
LH: loop header
LB: loop body
LE: loop exit
PB: predicated region body
PF: predicated region fallthrough
CT: control target
= control target key end

     0   :  { %s1465_s12 = smov 0   ;;  %s1467_s13 = smov 0   ;;  %s1690_s0 = inlined_call_operand.vmem [shape: bf16[512,512], index: 0, kind: input, shape index: {}]   ;;  %s1691_s1 = inlined_call_operand.vmem [shape: bf16[512,64], index: 1, kind: input, shape index: {}]   ;;  %s1692_s2 = inlined_call_operand.vmem [shape: f32[1,64], index: 2, kind: input, shape index: {}]   ;;  %s1693_s3 = inlined_call_operand.vmem [shape: bf16[512,64], index: 3, kind: output, shape index: {}]  }
   0x1   :  { %s1469_s14 = smov 0  }
   0x2 LB: > { %s25_s15 = sadd.s32 1, %s1439_s13  ;;  %p1083_p0 = scmp.ge.s32.totalorder %s1443_s14, 1  ;;  %s1443_s14 = sphi %s1469_s14, %s13_s14   ;;  %s1439_s13 = sphi %s1467_s13, %s1695_s13   ;;  %s1435_s12 = sphi %s1465_s12, %s1694_s12  }
   0x3   : > { %p27_p1 = scmp.ge.s32.totalorder %s25_s15, 4  ;;  %p170_p2 = scmp.lt.s32.totalorder %s1443_s14, 5 }
   0x5   : > { %s1697_s15 = smov (%p27_p1, %s25_s15), 0  ;;  %p171_p3 = pnand %p1083_p0, %p170_p2 }
   0x6   : > { %s1084_s25 = sshll.u32 (!%p171_p3), %s1435_s12, 4 }
   0x7   : > { %174 = sbr.rel (%p171_p3) target bundleno = 312 (0x138), region = 32  ;;  %p206_p4 = scmp.lt.s32.totalorder (!%p171_p3), %s1084_s25, 63 }
   0xc   : > { %v1341_v0 = vld [vmem:[%s1691_s1 + $0x78] sm:$0xff]   ;;  %v1345_v4 = vld [vmem:[%s1691_s1 + $0x70] sm:$0xff]   ;;  %v1349_v8 = vld [vmem:[%s1691_s1 + $0x68] sm:$0xff]   ;;  %s1699_s25 = smov (!%p206_p4, %s1084_s25), 63  ;;  %vm958_vm0 = vcmask 519168  }
   0xd   : > { %v1342_v1 = vld [vmem:[%s1691_s1 + $0xf8] sm:$0xff]   ;;  %1189 = vmatprep.subr.bf16.mxu0 %v1341_v0  ;;  %v1346_v5 = vld [vmem:[%s1691_s1 + $0xf0] sm:$0xff]   ;;  %v1350_v9 = vld [vmem:[%s1691_s1 + $0xe8] sm:$0xff]   ;;  %s1172_s24 = sshll.u32 %s1699_s25, 4  ;;  %s1088_s17 = sshll.u32 %s1699_s25, 2 }
   0xe   : > { %v1343_v2 = vld [vmem:[%s1691_s1 + $0x38] sm:$0xff]   ;;  %1253 = vmatprep.subr.bf16.mxu1 %v1342_v1  ;;  %v1347_v6 = vld [vmem:[%s1691_s1 + $0x30] sm:$0xff]   ;;  %v1351_v10 = vld [vmem:[%s1691_s1 + $0x28] sm:$0xff]   ;;  %s1582_s12 = scalar_lea.vmem %s1690_s0, %s1172_s24  ;;  %s1633_s20 = scalar_lea.vmem %s1693_s3, %s1088_s17 }
   0xf   : > { %v1344_v3 = vld [vmem:[%s1691_s1 + $0xb8] sm:$0xff]   ;;  %1190 = vmatpush3.bf16.msra.mxu0 %v1343_v2  ;;  %v1348_v7 = vld [vmem:[%s1691_s1 + $0xb0] sm:$0xff]   ;;  %v1352_v11 = vld [vmem:[%s1691_s1 + $0xa8] sm:$0xff]  }
  0x10   : > { %1254 = vmatpush3.bf16.msra.mxu1 %v1344_v3  ;;  %1191 = vmatprep.subr.bf16.mxu0 %v1345_v4  ;;  %v1353_v12 = vld [vmem:[%s1691_s1 + $0x60] sm:$0xff]   ;;  %v1357_v16 = vld [vmem:[%s1691_s1 + $0x58] sm:$0xff]   ;;  %v1361_v20 = vld [vmem:[%s1691_s1 + $0x50] sm:$0xff]  }
  0x11   : > { %1255 = vmatprep.subr.bf16.mxu1 %v1346_v5  ;;  %v1354_v13 = vld [vmem:[%s1691_s1 + $0xe0] sm:$0xff]   ;;  %v1358_v17 = vld [vmem:[%s1691_s1 + $0xd8] sm:$0xff]   ;;  %v1362_v21 = vld [vmem:[%s1691_s1 + $0xd0] sm:$0xff]  }
  0x12   : > { %v1355_v14 = vld [vmem:[%s1691_s1 + $0x20] sm:$0xff]   ;;  %v1359_v18 = vld [vmem:[%s1691_s1 + $0x18] sm:$0xff]   ;;  %v1363_v22 = vld [vmem:[%s1691_s1 + $0x10] sm:$0xff]  }
  0x13   : > { %1192 = vmatpush3.bf16.msra.mxu0 %v1347_v6  ;;  %v1356_v15 = vld [vmem:[%s1691_s1 + $0xa0] sm:$0xff]   ;;  %v1360_v19 = vld [vmem:[%s1691_s1 + $0x98] sm:$0xff]   ;;  %v1364_v23 = vld [vmem:[%s1691_s1 + $0x90] sm:$0xff]  }
  0x14   : > { %1256 = vmatpush3.bf16.msra.mxu1 %v1348_v7  ;;  %1193 = vmatprep.subr.bf16.mxu0 %v1349_v8  ;;  %v1365_v24 = vld [vmem:[%s1691_s1 + $0x48] sm:$0xff]   ;;  %v1369_v28 = vld [vmem:[%s1691_s1 + $0x40] sm:$0xff]  }
  0x15   : > { %1257 = vmatprep.subr.bf16.mxu1 %v1350_v9  ;;  %v1366_v25 = vld [vmem:[%s1691_s1 + $0xc8] sm:$0xff]   ;;  %v1370_v29 = vld [vmem:[%s1691_s1 + $0xc0] sm:$0xff]  }
  0x16   : > { %v1367_v26 = vld [vmem:[%s1691_s1 + $0x8] sm:$0xff]   ;;  %v1371_v30 = vld [vmem:[%s1691_s1] sm:$0xff]  }
  0x17   : > { %1194 = vmatpush3.bf16.msra.mxu0 %v1351_v10  ;;  %v1368_v27 = vld [vmem:[%s1691_s1 + $0x88] sm:$0xff]   ;;  %v1372_v31 = vld [vmem:[%s1691_s1 + $0x80] sm:$0xff]  }
  0x18   : > { %1258 = vmatpush3.bf16.msra.mxu1 %v1352_v11  ;;  %1195 = vmatprep.subr.bf16.mxu0 %v1353_v12  ;;  %v1373_v32 = vld [vmem:[%s1582_s12] ss:$16 sps:$4 sm:$0xff]   ;;  %v1375_v33 = vld [vmem:[%s1582_s12 + $0x4] ss:$16 sps:$4 sm:$0xff]   ;;  %v1376_v34 = vld [vmem:[%s1582_s12 + $0x8] ss:$16 sps:$4 sm:$0xff]  }
  0x19   : > { %1259 = vmatprep.subr.bf16.mxu1 %v1354_v13  ;;  %v1378_v35 = vld [vmem:[%s1582_s12 + $0xc] ss:$16 sps:$4 sm:$0xff]   ;;  %716 = vmatprep.mubr.bf16.mxu0 %v1375_v33  ;;  %v1379_v36 = vld [vmem:[%s1582_s12 + $0x24] ss:$16 sps:$4 sm:$0xff]   ;;  %v1383_v38 = vld [vmem:[%s1582_s12 + $0x20] ss:$16 sps:$4 sm:$0xff]  }
  0x1a   : > { %813 = vmatprep.mubr.bf16.mxu1 %v1378_v35  ;;  %v1381_v37 = vld [vmem:[%s1582_s12 + $0x2c] ss:$16 sps:$4 sm:$0xff]   ;;  %v1384_v39 = vld [vmem:[%s1582_s12 + $0x28] ss:$16 sps:$4 sm:$0xff]   ;;  %v1385_v40 = vld [vmem:[%s1582_s12 + $0x44] ss:$16 sps:$4 sm:$0xff]  }
  0x1b   : > { %1196 = vmatpush3.bf16.msra.mxu0 %v1355_v14  ;;  %v1387_v41 = vld [vmem:[%s1582_s12 + $0x4c] ss:$16 sps:$4 sm:$0xff]   ;;  %v1389_v42 = vld [vmem:[%s1582_s12 + $0x40] ss:$16 sps:$4 sm:$0xff]   ;;  %v1390_v43 = vld [vmem:[%s1582_s12 + $0x48] ss:$16 sps:$4 sm:$0xff]  }
  0x1c   : > { %1260 = vmatpush3.bf16.msra.mxu1 %v1356_v15  ;;  %1197 = vmatprep.subr.bf16.mxu0 %v1357_v16  ;;  %v1391_v44 = vld [vmem:[%s1582_s12 + $0x64] ss:$16 sps:$4 sm:$0xff]   ;;  %v1393_v45 = vld [vmem:[%s1582_s12 + $0x6c] ss:$16 sps:$4 sm:$0xff]   ;;  %v1395_v46 = vld [vmem:[%s1582_s12 + $0x60] ss:$16 sps:$4 sm:$0xff]  }
  0x1d   : > { %1261 = vmatprep.subr.bf16.mxu1 %v1358_v17  ;;  %v1396_v47 = vld [vmem:[%s1582_s12 + $0x68] ss:$16 sps:$4 sm:$0xff]   ;;  %v1397_v48 = vld [vmem:[%s1582_s12 + $0x84] ss:$16 sps:$4 sm:$0xff]   ;;  %v1399_v49 = vld [vmem:[%s1582_s12 + $0x8c] ss:$16 sps:$4 sm:$0xff]  }
  0x1e   : > { %v1401_v50 = vld [vmem:[%s1582_s12 + $0x80] ss:$16 sps:$4 sm:$0xff]   ;;  %v1402_v51 = vld [vmem:[%s1582_s12 + $0x88] ss:$16 sps:$4 sm:$0xff]   ;;  %v1403_v52 = vld [vmem:[%s1582_s12 + $0xa4] ss:$16 sps:$4 sm:$0xff]  }
  0x1f   : > { %1198 = vmatpush3.bf16.msra.mxu0 %v1359_v18  ;;  %v1405_v53 = vld [vmem:[%s1582_s12 + $0xac] ss:$16 sps:$4 sm:$0xff]   ;;  %v1407_v54 = vld [vmem:[%s1582_s12 + $0xa0] ss:$16 sps:$4 sm:$0xff]   ;;  %v1408_v55 = vld [vmem:[%s1582_s12 + $0xa8] ss:$16 sps:$4 sm:$0xff]  }
  0x20   : > { %1262 = vmatpush3.bf16.msra.mxu1 %v1360_v19  ;;  %1199 = vmatprep.subr.bf16.mxu0 %v1361_v20  ;;  %v1409_v56 = vld [vmem:[%s1582_s12 + $0xc4] ss:$16 sps:$4 sm:$0xff]   ;;  %v1411_v57 = vld [vmem:[%s1582_s12 + $0xcc] ss:$16 sps:$4 sm:$0xff]   ;;  %v1413_v58 = vld [vmem:[%s1582_s12 + $0xc0] ss:$16 sps:$4 sm:$0xff]  }
  0x21   : > { %1263 = vmatprep.subr.bf16.mxu1 %v1362_v21  ;;  %v1414_v59 = vld [vmem:[%s1582_s12 + $0xc8] ss:$16 sps:$4 sm:$0xff]   ;;  %v1415_v60 = vld [vmem:[%s1582_s12 + $0xe4] ss:$16 sps:$4 sm:$0xff]   ;;  %v1417_v61 = vld [vmem:[%s1582_s12 + $0xec] ss:$16 sps:$4 sm:$0xff]  }
  0x22   : > { %v1419_v62 = vld [vmem:[%s1582_s12 + $0xe0] ss:$16 sps:$4 sm:$0xff]   ;;  %v1420_v63 = vld [vmem:[%s1582_s12 + $0xe8] ss:$16 sps:$4 sm:$0xff]  }
  0x23   : > { %1200 = vmatpush3.bf16.msra.mxu0 %v1363_v22  ;;  %v1625_v2 = vld [vmem:[%s1692_s2] ss:$0 sm:$0xff] }
  0x24   : > { %1264 = vmatpush3.bf16.msra.mxu1 %v1364_v23  ;;  %1201 = vmatprep.subr.bf16.mxu0 %v1365_v24 }
  0x25   : > { %1265 = vmatprep.subr.bf16.mxu1 %v1366_v25 }
  0x27   : > { %1202 = vmatpush3.bf16.msra.mxu0 %v1367_v26 }
  0x28   : > { %1266 = vmatpush3.bf16.msra.mxu1 %v1368_v27  ;;  %1203 = vmatprep.subr.bf16.mxu0 %v1369_v28 }
  0x29   : > { %1267 = vmatprep.subr.bf16.mxu1 %v1370_v29 }
  0x2b   : > { %1204 = vmatpush3.bf16.msra.mxu0 %v1371_v30 }
  0x2c   : > { %1268 = vmatpush3.bf16.msra.mxu1 %v1372_v31 }
  0x2e   : > { %717 = vmatmul.mubr.bf16.vlgmr.msra.gmra.mxu0 %v1373_v32 }
  0x2f   : > { %814 = vmatmul.mubr.bf16.vlgmr.msra.gmra.mxu1 %v1376_v34  ;;  %724 = vmatprep.mubr.bf16.mxu0 %v1379_v36 }
  0x30   : > { %821 = vmatprep.mubr.bf16.mxu1 %v1381_v37 }
  0x36   : > { %725 = vmatmul.mubr.bf16.gmra.mxu0 %v1383_v38 }
  0x37   : > { %822 = vmatmul.mubr.bf16.gmra.mxu1 %v1384_v39  ;;  %732 = vmatprep.mubr.bf16.mxu0 %v1385_v40 }
  0x38   : > { %829 = vmatprep.mubr.bf16.mxu1 %v1387_v41 }
  0x3e   : > { %733 = vmatmul.mubr.bf16.gmra.mxu0 %v1389_v42 }
  0x3f   : > { %830 = vmatmul.mubr.bf16.gmra.mxu1 %v1390_v43  ;;  %740 = vmatprep.mubr.bf16.mxu0 %v1391_v44 }
  0x40   : > { %837 = vmatprep.mubr.bf16.mxu1 %v1393_v45 }
  0x46   : > { %741 = vmatmul.mubr.bf16.gmra.mxu0 %v1395_v46 }
  0x47   : > { %838 = vmatmul.mubr.bf16.gmra.mxu1 %v1396_v47  ;;  %748 = vmatprep.mubr.bf16.mxu0 %v1397_v48 }
  0x48   : > { %845 = vmatprep.mubr.bf16.mxu1 %v1399_v49 }
  0x4e   : > { %749 = vmatmul.mubr.bf16.gmra.mxu0 %v1401_v50 }
  0x4f   : > { %846 = vmatmul.mubr.bf16.gmra.mxu1 %v1402_v51  ;;  %756 = vmatprep.mubr.bf16.mxu0 %v1403_v52 }
  0x50   : > { %853 = vmatprep.mubr.bf16.mxu1 %v1405_v53 }
  0x56   : > { %757 = vmatmul.mubr.bf16.gmra.mxu0 %v1407_v54 }
  0x57   : > { %854 = vmatmul.mubr.bf16.gmra.mxu1 %v1408_v55  ;;  %764 = vmatprep.mubr.bf16.mxu0 %v1409_v56 }
  0x58   : > { %861 = vmatprep.mubr.bf16.mxu1 %v1411_v57 }
  0x5e   : > { %765 = vmatmul.mubr.bf16.gmra.mxu0 %v1413_v58 }
  0x5f   : > { %862 = vmatmul.mubr.bf16.gmra.mxu1 %v1414_v59  ;;  %772 = vmatprep.mubr.bf16.mxu0 %v1415_v60 }
  0x60   : > { %869 = vmatprep.mubr.bf16.mxu1 %v1417_v61 }
  0x66   : > { %773 = vmatmul.mubr.bf16.gmra.mxu0 %v1419_v62 }
  0x67   : > { %870 = vmatmul.mubr.bf16.gmra.mxu1 %v1420_v63 }
  0xee   : > { %v1205_v0 = vpop.f32.mrf.mxu0 }
  0xef   : > { %v1269_v1 = vpop.f32.mrf.mxu1 }
  0xf0   : > { %v1206_v3 = vpop.f32.mrf.mxu0 }
  0xf1   : > { %v1207_v4 = vadd.f32 %v1206_v3, %v1205_v0  ;;  %v1270_v5 = vpop.f32.mrf.mxu1 }
  0xf2   : > { %v1208_v6 = vpop.f32.mrf.mxu0  ;;  %v1271_v8 = vadd.f32 %v1270_v5, %v1269_v1 }
  0xf3   : > { %v719_v7 = vadd.f32 %v1207_v4, %v1625_v2  ;;  %v1272_v9 = vpop.f32.mrf.mxu1 }
  0xf4   : > { %v1209_v10 = vpop.f32.mrf.mxu0 }
  0xf5   : > { %v816_v11 = vadd.f32 %v1271_v8, %v719_v7  ;;  %v1210_v12 = vadd.f32 %v1209_v10, %v1208_v6  ;;  %v1273_v13 = vpop.f32.mrf.mxu1 }
  0xf6   : > { %v1211_v14 = vpop.f32.mrf.mxu0  ;;  %v1274_v17 = vadd.f32 %v1273_v13, %v1272_v9 }
  0xf7   : > { %v878_v15 = vmax.f32 %v816_v11, 0.0  ;;  %v722_v16 = vadd.f32 %v1210_v12, %v1625_v2  ;;  %v1275_v18 = vpop.f32.mrf.mxu1 }
  0xf8   : > { %v1212_v19 = vpop.f32.mrf.mxu0 }
  0xf9   : > { %v1173_v20 = vpack.c.bf16 %v878_v15, %v878_v15  ;;  %v819_v21 = vadd.f32 %v1274_v17, %v722_v16  ;;  %v1213_v22 = vadd.f32 %v1212_v19, %v1211_v14  ;;  %v1276_v23 = vpop.f32.mrf.mxu1 }
  0xfa   : > { %v1214_v24 = vpop.f32.mrf.mxu0  ;;  %v1277_v27 = vadd.f32 %v1276_v23, %v1275_v18 }
  0xfb   : > { %959 = vst.msk [vmem:[%s1633_s20] sm:$0xf] %vm958_vm0, %v1173_v20  ;;  %v879_v25 = vmax.f32 %v819_v21, 0.0  ;;  %v727_v26 = vadd.f32 %v1213_v22, %v1625_v2  ;;  %v1278_v28 = vpop.f32.mrf.mxu1 }
  0xfc   : > { %v1215_v29 = vpop.f32.mrf.mxu0 }
  0xfd   : > { %v1174_v30 = vpack.c.bf16 %v879_v25, %v879_v25  ;;  %v824_v31 = vadd.f32 %v1277_v27, %v727_v26  ;;  %v1216_v32 = vadd.f32 %v1215_v29, %v1214_v24  ;;  %v1279_v33 = vpop.f32.mrf.mxu1 }
  0xfe   : > { %v1217_v34 = vpop.f32.mrf.mxu0  ;;  %v1280_v37 = vadd.f32 %v1279_v33, %v1278_v28 }
  0xff   : > { %960 = vst.msk [vmem:[%s1633_s20 + $0x4] sm:$0xf] %vm958_vm0, %v1174_v30  ;;  %v880_v35 = vmax.f32 %v824_v31, 0.0  ;;  %v730_v36 = vadd.f32 %v1216_v32, %v1625_v2  ;;  %v1281_v38 = vpop.f32.mrf.mxu1 }
 0x100   : > { %v1218_v39 = vpop.f32.mrf.mxu0 }
 0x101   : > { %v1175_v40 = vpack.c.bf16 %v880_v35, %v880_v35  ;;  %v827_v41 = vadd.f32 %v1280_v37, %v730_v36  ;;  %v1219_v42 = vadd.f32 %v1218_v39, %v1217_v34  ;;  %v1282_v43 = vpop.f32.mrf.mxu1 }
 0x102   : > { %v1220_v44 = vpop.f32.mrf.mxu0  ;;  %v1283_v47 = vadd.f32 %v1282_v43, %v1281_v38 }
 0x103   : > { %961 = vst.msk [vmem:[%s1633_s20 + $0x8] sm:$0xf] %vm958_vm0, %v1175_v40  ;;  %v881_v45 = vmax.f32 %v827_v41, 0.0  ;;  %v735_v46 = vadd.f32 %v1219_v42, %v1625_v2  ;;  %v1284_v48 = vpop.f32.mrf.mxu1 }
 0x104   : > { %v1221_v49 = vpop.f32.mrf.mxu0 }
 0x105   : > { %v1176_v50 = vpack.c.bf16 %v881_v45, %v881_v45  ;;  %v832_v51 = vadd.f32 %v1283_v47, %v735_v46  ;;  %v1222_v52 = vadd.f32 %v1221_v49, %v1220_v44  ;;  %v1285_v53 = vpop.f32.mrf.mxu1 }
 0x106   : > { %v1223_v54 = vpop.f32.mrf.mxu0  ;;  %v1286_v57 = vadd.f32 %v1285_v53, %v1284_v48 }
 0x107   : > { %962 = vst.msk [vmem:[%s1633_s20 + $0xc] sm:$0xf] %vm958_vm0, %v1176_v50  ;;  %v882_v55 = vmax.f32 %v832_v51, 0.0  ;;  %v738_v56 = vadd.f32 %v1222_v52, %v1625_v2  ;;  %v1287_v58 = vpop.f32.mrf.mxu1 }
 0x108   : > { %v1224_v59 = vpop.f32.mrf.mxu0 }
 0x109   : > { %v1177_v60 = vpack.c.bf16 %v882_v55, %v882_v55  ;;  %v835_v61 = vadd.f32 %v1286_v57, %v738_v56  ;;  %v1225_v62 = vadd.f32 %v1224_v59, %v1223_v54  ;;  %v1288_v63 = vpop.f32.mrf.mxu1 }
 0x10a   : > { %v1226_v0 = vpop.f32.mrf.mxu0  ;;  %v1289_v4 = vadd.f32 %v1288_v63, %v1287_v58 }
 0x10b   : > { %963 = vst.msk [vmem:[%s1633_s20 + $0x10] sm:$0xf] %vm958_vm0, %v1177_v60  ;;  %v883_v1 = vmax.f32 %v835_v61, 0.0  ;;  %v743_v3 = vadd.f32 %v1225_v62, %v1625_v2  ;;  %v1290_v5 = vpop.f32.mrf.mxu1 }
 0x10c   : > { %v1227_v6 = vpop.f32.mrf.mxu0 }
 0x10d   : > { %v1178_v7 = vpack.c.bf16 %v883_v1, %v883_v1  ;;  %v840_v8 = vadd.f32 %v1289_v4, %v743_v3  ;;  %v1228_v9 = vadd.f32 %v1227_v6, %v1226_v0  ;;  %v1291_v10 = vpop.f32.mrf.mxu1 }
 0x10e   : > { %v1229_v11 = vpop.f32.mrf.mxu0  ;;  %v1292_v14 = vadd.f32 %v1291_v10, %v1290_v5 }
 0x10f   : > { %964 = vst.msk [vmem:[%s1633_s20 + $0x14] sm:$0xf] %vm958_vm0, %v1178_v7  ;;  %v884_v12 = vmax.f32 %v840_v8, 0.0  ;;  %v746_v13 = vadd.f32 %v1228_v9, %v1625_v2  ;;  %v1293_v15 = vpop.f32.mrf.mxu1 }
 0x110   : > { %v1230_v16 = vpop.f32.mrf.mxu0 }
 0x111   : > { %v1179_v17 = vpack.c.bf16 %v884_v12, %v884_v12  ;;  %v843_v18 = vadd.f32 %v1292_v14, %v746_v13  ;;  %v1231_v19 = vadd.f32 %v1230_v16, %v1229_v11  ;;  %v1294_v20 = vpop.f32.mrf.mxu1 }
 0x112   : > { %v1232_v21 = vpop.f32.mrf.mxu0  ;;  %v1295_v24 = vadd.f32 %v1294_v20, %v1293_v15 }
 0x113   : > { %965 = vst.msk [vmem:[%s1633_s20 + $0x18] sm:$0xf] %vm958_vm0, %v1179_v17  ;;  %v885_v22 = vmax.f32 %v843_v18, 0.0  ;;  %v751_v23 = vadd.f32 %v1231_v19, %v1625_v2  ;;  %v1296_v25 = vpop.f32.mrf.mxu1 }
 0x114   : > { %v1233_v26 = vpop.f32.mrf.mxu0 }
 0x115   : > { %v1180_v27 = vpack.c.bf16 %v885_v22, %v885_v22  ;;  %v848_v28 = vadd.f32 %v1295_v24, %v751_v23  ;;  %v1234_v29 = vadd.f32 %v1233_v26, %v1232_v21  ;;  %v1297_v30 = vpop.f32.mrf.mxu1 }
 0x116   : > { %v1235_v31 = vpop.f32.mrf.mxu0  ;;  %v1298_v34 = vadd.f32 %v1297_v30, %v1296_v25 }
 0x117   : > { %966 = vst.msk [vmem:[%s1633_s20 + $0x1c] sm:$0xf] %vm958_vm0, %v1180_v27  ;;  %v886_v32 = vmax.f32 %v848_v28, 0.0  ;;  %v754_v33 = vadd.f32 %v1234_v29, %v1625_v2  ;;  %v1299_v35 = vpop.f32.mrf.mxu1 }
 0x118   : > { %v1236_v36 = vpop.f32.mrf.mxu0 }
 0x119   : > { %v1181_v37 = vpack.c.bf16 %v886_v32, %v886_v32  ;;  %v851_v38 = vadd.f32 %v1298_v34, %v754_v33  ;;  %v1237_v39 = vadd.f32 %v1236_v36, %v1235_v31  ;;  %v1300_v40 = vpop.f32.mrf.mxu1 }
 0x11a   : > { %v1238_v41 = vpop.f32.mrf.mxu0  ;;  %v1301_v44 = vadd.f32 %v1300_v40, %v1299_v35 }
 0x11b   : > { %967 = vst.msk [vmem:[%s1633_s20 + $0x20] sm:$0xf] %vm958_vm0, %v1181_v37  ;;  %v887_v42 = vmax.f32 %v851_v38, 0.0  ;;  %v759_v43 = vadd.f32 %v1237_v39, %v1625_v2  ;;  %v1302_v45 = vpop.f32.mrf.mxu1 }
 0x11c   : > { %v1239_v46 = vpop.f32.mrf.mxu0 }
 0x11d   : > { %v1182_v47 = vpack.c.bf16 %v887_v42, %v887_v42  ;;  %v856_v48 = vadd.f32 %v1301_v44, %v759_v43  ;;  %v1240_v49 = vadd.f32 %v1239_v46, %v1238_v41  ;;  %v1303_v50 = vpop.f32.mrf.mxu1 }
 0x11e   : > { %v1241_v51 = vpop.f32.mrf.mxu0  ;;  %v1304_v54 = vadd.f32 %v1303_v50, %v1302_v45 }
 0x11f   : > { %968 = vst.msk [vmem:[%s1633_s20 + $0x24] sm:$0xf] %vm958_vm0, %v1182_v47  ;;  %v888_v52 = vmax.f32 %v856_v48, 0.0  ;;  %v762_v53 = vadd.f32 %v1240_v49, %v1625_v2  ;;  %v1305_v55 = vpop.f32.mrf.mxu1 }
 0x120   : > { %v1242_v56 = vpop.f32.mrf.mxu0 }
 0x121   : > { %v1183_v57 = vpack.c.bf16 %v888_v52, %v888_v52  ;;  %v859_v58 = vadd.f32 %v1304_v54, %v762_v53  ;;  %v1243_v59 = vadd.f32 %v1242_v56, %v1241_v51  ;;  %v1306_v60 = vpop.f32.mrf.mxu1 }
 0x122   : > { %v1244_v61 = vpop.f32.mrf.mxu0  ;;  %v1307_v0 = vadd.f32 %v1306_v60, %v1305_v55 }
 0x123   : > { %969 = vst.msk [vmem:[%s1633_s20 + $0x28] sm:$0xf] %vm958_vm0, %v1183_v57  ;;  %v889_v62 = vmax.f32 %v859_v58, 0.0  ;;  %v767_v63 = vadd.f32 %v1243_v59, %v1625_v2  ;;  %v1308_v1 = vpop.f32.mrf.mxu1 }
 0x124   : > { %v1245_v3 = vpop.f32.mrf.mxu0 }
 0x125   : > { %v1184_v4 = vpack.c.bf16 %v889_v62, %v889_v62  ;;  %v864_v5 = vadd.f32 %v1307_v0, %v767_v63  ;;  %v1246_v6 = vadd.f32 %v1245_v3, %v1244_v61  ;;  %v1309_v7 = vpop.f32.mrf.mxu1 }
 0x126   : > { %v1247_v8 = vpop.f32.mrf.mxu0  ;;  %v1310_v11 = vadd.f32 %v1309_v7, %v1308_v1 }
 0x127   : > { %970 = vst.msk [vmem:[%s1633_s20 + $0x2c] sm:$0xf] %vm958_vm0, %v1184_v4  ;;  %v890_v9 = vmax.f32 %v864_v5, 0.0  ;;  %v770_v10 = vadd.f32 %v1246_v6, %v1625_v2  ;;  %v1311_v12 = vpop.f32.mrf.mxu1 }
 0x128   : > { %v1248_v13 = vpop.f32.mrf.mxu0 }
 0x129   : > { %v1185_v14 = vpack.c.bf16 %v890_v9, %v890_v9  ;;  %v867_v15 = vadd.f32 %v1310_v11, %v770_v10  ;;  %v1249_v16 = vadd.f32 %v1248_v13, %v1247_v8  ;;  %v1312_v17 = vpop.f32.mrf.mxu1 }
 0x12a   : > { %v1250_v18 = vpop.f32.mrf.mxu0  ;;  %v1313_v21 = vadd.f32 %v1312_v17, %v1311_v12 }
 0x12b   : > { %971 = vst.msk [vmem:[%s1633_s20 + $0x30] sm:$0xf] %vm958_vm0, %v1185_v14  ;;  %v891_v19 = vmax.f32 %v867_v15, 0.0  ;;  %v775_v20 = vadd.f32 %v1249_v16, %v1625_v2  ;;  %v1314_v22 = vpop.f32.mrf.mxu1 }
 0x12c   : > { %v1251_v23 = vpop.f32.mrf.mxu0 }
 0x12d   : > { %v1186_v24 = vpack.c.bf16 %v891_v19, %v891_v19  ;;  %v872_v25 = vadd.f32 %v1313_v21, %v775_v20  ;;  %v1252_v26 = vadd.f32 %v1251_v23, %v1250_v18  ;;  %v1315_v27 = vpop.f32.mrf.mxu1 }
 0x12e   : > { %v1316_v30 = vadd.f32 %v1315_v27, %v1314_v22 }
 0x12f   : > { %972 = vst.msk [vmem:[%s1633_s20 + $0x34] sm:$0xf] %vm958_vm0, %v1186_v24  ;;  %v892_v28 = vmax.f32 %v872_v25, 0.0  ;;  %v778_v29 = vadd.f32 %v1252_v26, %v1625_v2 }
 0x131   : > { %v1187_v31 = vpack.c.bf16 %v892_v28, %v892_v28  ;;  %v875_v32 = vadd.f32 %v1316_v30, %v778_v29 }
 0x133   : > { %973 = vst.msk [vmem:[%s1633_s20 + $0x38] sm:$0xf] %vm958_vm0, %v1187_v31  ;;  %v893_v33 = vmax.f32 %v875_v32, 0.0 }
 0x135   : > { %v1188_v34 = vpack.c.bf16 %v893_v33, %v893_v33 }
 0x137   : > { %974 = vst.msk [vmem:[%s1633_s20 + $0x3c] sm:$0xf] %vm958_vm0, %v1188_v34 }
 0x138 PF: > { %s13_s14 = sadd.s32 1, %s1443_s14   ;;  %s1694_s12 = smov %s1439_s13 }
 0x139   : > { %p10_p5 = scmp.ge.s32.totalorder %s13_s14, 6   ;;  %s1695_s13 = smov %s1697_s15 }
 0x13b   :  { %12 = sbr.rel (!%p10_p5) target bundleno = 2 (0x2), region = 68 }

// kernel: deep_q_forward.7
= control target key start
LH: loop header
LB: loop body
LE: loop exit
PB: predicated region body
PF: predicated region fallthrough
CT: control target
= control target key end

     0   :  { %s1796_s12 = smov 0   ;;  %s1798_s13 = smov 0   ;;  %s2079_s0 = inlined_call_operand.vmem [shape: bf16[384,576], index: 0, kind: input, shape index: {}]   ;;  %s2080_s1 = inlined_call_operand.vmem [shape: bf16[576,128], index: 1, kind: input, shape index: {}]   ;;  %s2081_s2 = inlined_call_operand.vmem [shape: f32[1,128], index: 2, kind: input, shape index: {}]   ;;  %s2082_s3 = inlined_call_operand.vmem [shape: bf16[384,128], index: 3, kind: output, shape index: {}]  }
   0x1   :  { %s1800_s14 = smov 0  }
   0x2 LB: > { %s25_s15 = sadd.s32 1, %s1770_s13  ;;  %p1292_p0 = scmp.ge.s32.totalorder %s1774_s14, 1  ;;  %s1774_s14 = sphi %s1800_s14, %s13_s14   ;;  %s1770_s13 = sphi %s1798_s13, %s2092_s13   ;;  %s1766_s12 = sphi %s1796_s12, %s2091_s12  }
   0x3   : > { %p27_p1 = scmp.ge.s32.totalorder %s25_s15, 3  ;;  %p170_p2 = scmp.lt.s32.totalorder %s1774_s14, 4 }
   0x5   : > { %s2094_s15 = smov (%p27_p1, %s25_s15), 0  ;;  %p171_p3 = pnand %p1292_p0, %p170_p2 }
   0x7   : > { %174 = sbr.rel (%p171_p3) target bundleno = 325 (0x145), region = 32 }
   0xc   : > { %v1660_v0 = vld [vmem:[%s2080_s1 + $0x78] sm:$0xff]   ;;  %v1664_v4 = vld [vmem:[%s2080_s1 + $0x70] sm:$0xff]   ;;  %v1668_v8 = vld [vmem:[%s2080_s1 + $0x68] sm:$0xff]   ;;  %s1293_s23 = sshll.u32 %s1766_s12, 4  ;;  %vm772_vm0 = vcmask 523264  }
   0xd   : > { %v1661_v1 = vld [vmem:[%s2080_s1 + $0xf8] sm:$0xff]   ;;  %1463 = vmatprep.subr.bf16.mxu0 %v1660_v0  ;;  %v1665_v5 = vld [vmem:[%s2080_s1 + $0xf0] sm:$0xff]   ;;  %v1669_v9 = vld [vmem:[%s2080_s1 + $0xe8] sm:$0xff]   ;;  %p206_p4 = scmp.lt.s32.totalorder %s1293_s23, 47 }
   0xe   : > { %v1662_v2 = vld [vmem:[%s2080_s1 + $0x38] sm:$0xff]   ;;  %1527 = vmatprep.subr.bf16.mxu1 %v1661_v1  ;;  %v1666_v6 = vld [vmem:[%s2080_s1 + $0x30] sm:$0xff]   ;;  %v1670_v10 = vld [vmem:[%s2080_s1 + $0x28] sm:$0xff]  }
   0xf   : > { %v1663_v3 = vld [vmem:[%s2080_s1 + $0xb8] sm:$0xff]   ;;  %1464 = vmatpush3.bf16.msra.mxu0 %v1662_v2  ;;  %v1667_v7 = vld [vmem:[%s2080_s1 + $0xb0] sm:$0xff]   ;;  %v1671_v11 = vld [vmem:[%s2080_s1 + $0xa8] sm:$0xff]   ;;  %s2096_s23 = smov (!%p206_p4, %s1293_s23), 47 }
  0x10   : > { %1528 = vmatpush3.bf16.msra.mxu1 %v1663_v3  ;;  %1465 = vmatprep.subr.bf16.mxu0 %v1664_v4  ;;  %v1672_v12 = vld [vmem:[%s2080_s1 + $0x60] sm:$0xff]   ;;  %v1676_v16 = vld [vmem:[%s2080_s1 + $0x58] sm:$0xff]   ;;  %v1680_v20 = vld [vmem:[%s2080_s1 + $0x50] sm:$0xff]   ;;  %s1635_s22 = smul.u32 20, %s2096_s23  ;;  %s1296_s26 = sshll.u32 %s2096_s23, 2 }
  0x11   : > { %1529 = vmatprep.subr.bf16.mxu1 %v1665_v5  ;;  %v1673_v13 = vld [vmem:[%s2080_s1 + $0xe0] sm:$0xff]   ;;  %v1677_v17 = vld [vmem:[%s2080_s1 + $0xd8] sm:$0xff]   ;;  %v1681_v21 = vld [vmem:[%s2080_s1 + $0xd0] sm:$0xff]   ;;  %s2054_s28 = scalar_lea.vmem %s2082_s3, %s1296_s26 }
  0x12   : > { %v1674_v14 = vld [vmem:[%s2080_s1 + $0x20] sm:$0xff]   ;;  %v1678_v18 = vld [vmem:[%s2080_s1 + $0x18] sm:$0xff]   ;;  %v1682_v22 = vld [vmem:[%s2080_s1 + $0x10] sm:$0xff]   ;;  %s1913_s6 = scalar_lea.vmem %s2079_s0, %s1635_s22 }
  0x13   : > { %1466 = vmatpush3.bf16.msra.mxu0 %v1666_v6  ;;  %v1675_v15 = vld [vmem:[%s2080_s1 + $0xa0] sm:$0xff]   ;;  %v1679_v19 = vld [vmem:[%s2080_s1 + $0x98] sm:$0xff]   ;;  %v1683_v23 = vld [vmem:[%s2080_s1 + $0x90] sm:$0xff]  }
  0x14   : > { %1530 = vmatpush3.bf16.msra.mxu1 %v1667_v7  ;;  %1467 = vmatprep.subr.bf16.mxu0 %v1668_v8  ;;  %v1684_v24 = vld [vmem:[%s2080_s1 + $0x48] sm:$0xff]   ;;  %v1688_v28 = vld [vmem:[%s2080_s1 + $0x40] sm:$0xff]   ;;  %v1698_v36 = vld [vmem:[%s2080_s1 + $0x118] sm:$0xff]  }
  0x15   : > { %1531 = vmatprep.subr.bf16.mxu1 %v1669_v9  ;;  %v1685_v25 = vld [vmem:[%s2080_s1 + $0xc8] sm:$0xff]   ;;  %v1689_v29 = vld [vmem:[%s2080_s1 + $0xc0] sm:$0xff]   ;;  %v1711_v42 = vld [vmem:[%s2080_s1 + $0x110] sm:$0xff]  }
  0x16   : > { %v1686_v26 = vld [vmem:[%s2080_s1 + $0x8] sm:$0xff]   ;;  %v1690_v30 = vld [vmem:[%s2080_s1] sm:$0xff]   ;;  %v1707_v43 = vld [vmem:[%s1913_s6 + $0x5c] ss:$20 sps:$4 sm:$0xff]  }
  0x17   : > { %1468 = vmatpush3.bf16.msra.mxu0 %v1670_v10  ;;  %v1687_v27 = vld [vmem:[%s2080_s1 + $0x88] sm:$0xff]   ;;  %v1691_v31 = vld [vmem:[%s2080_s1 + $0x80] sm:$0xff]   ;;  %v1712_v47 = vld [vmem:[%s1913_s6 + $0x7c] ss:$20 sps:$4 sm:$0xff]  }
  0x18   : > { %1532 = vmatpush3.bf16.msra.mxu1 %v1671_v11  ;;  %1469 = vmatprep.subr.bf16.mxu0 %v1672_v12  ;;  %v1692_v32 = vld [vmem:[%s1913_s6] ss:$20 sps:$4 sm:$0xff]   ;;  %v1694_v33 = vld [vmem:[%s1913_s6 + $0x4] ss:$20 sps:$4 sm:$0xff]   ;;  %v1695_v34 = vld [vmem:[%s1913_s6 + $0x8] ss:$20 sps:$4 sm:$0xff]  }
  0x19   : > { %1533 = vmatprep.subr.bf16.mxu1 %v1673_v13  ;;  %v1697_v35 = vld [vmem:[%s1913_s6 + $0xc] ss:$20 sps:$4 sm:$0xff]   ;;  %829 = vmatprep.mubr.bf16.mxu0 %v1694_v33  ;;  %v1701_v38 = vld [vmem:[%s1913_s6 + $0x34] ss:$20 sps:$4 sm:$0xff]   ;;  %v1704_v40 = vld [vmem:[%s1913_s6 + $0x30] ss:$20 sps:$4 sm:$0xff]  }
  0x1a   : > { %926 = vmatprep.mubr.bf16.mxu1 %v1697_v35  ;;  %v1699_v37 = vld [vmem:[%s1913_s6 + $0x2c] ss:$20 sps:$4 sm:$0xff]   ;;  %v1703_v39 = vld [vmem:[%s1913_s6 + $0x28] ss:$20 sps:$4 sm:$0xff]   ;;  %v1709_v44 = vld [vmem:[%s1913_s6 + $0x50] ss:$20 sps:$4 sm:$0xff]  }
  0x1b   : > { %1470 = vmatpush3.bf16.msra.mxu0 %v1674_v14  ;;  %v1705_v41 = vld [vmem:[%s1913_s6 + $0x54] ss:$20 sps:$4 sm:$0xff]   ;;  %v1710_v45 = vld [vmem:[%s1913_s6 + $0x58] ss:$20 sps:$4 sm:$0xff]   ;;  %v1737_v49 = vld [vmem:[%s2080_s1 + $0x100] sm:$0xff]  }
  0x1c   : > { %1534 = vmatpush3.bf16.msra.mxu1 %v1675_v15  ;;  %1471 = vmatprep.subr.bf16.mxu0 %v1676_v16  ;;  %v1724_v46 = vld [vmem:[%s2080_s1 + $0x108] sm:$0xff]   ;;  %v1714_v48 = vld [vmem:[%s1913_s6 + $0x84] ss:$20 sps:$4 sm:$0xff]   ;;  %v1717_v51 = vld [vmem:[%s1913_s6 + $0x80] ss:$20 sps:$4 sm:$0xff]  }
  0x1d   : > { %1535 = vmatprep.subr.bf16.mxu1 %v1677_v17  ;;  %v1716_v50 = vld [vmem:[%s1913_s6 + $0x78] ss:$20 sps:$4 sm:$0xff]   ;;  %v1722_v54 = vld [vmem:[%s1913_s6 + $0xa0] ss:$20 sps:$4 sm:$0xff]   ;;  %v1723_v55 = vld [vmem:[%s1913_s6 + $0xa8] ss:$20 sps:$4 sm:$0xff]  }
  0x1e   : > { %v1718_v52 = vld [vmem:[%s1913_s6 + $0xa4] ss:$20 sps:$4 sm:$0xff]   ;;  %v1720_v53 = vld [vmem:[%s1913_s6 + $0xac] ss:$20 sps:$4 sm:$0xff]   ;;  %v1727_v57 = vld [vmem:[%s1913_s6 + $0xd4] ss:$20 sps:$4 sm:$0xff]  }
  0x1f   : > { %1472 = vmatpush3.bf16.msra.mxu0 %v1678_v18  ;;  %v1725_v56 = vld [vmem:[%s1913_s6 + $0xcc] ss:$20 sps:$4 sm:$0xff]   ;;  %v1729_v58 = vld [vmem:[%s1913_s6 + $0xc8] ss:$20 sps:$4 sm:$0xff]   ;;  %v1730_v59 = vld [vmem:[%s1913_s6 + $0xd0] ss:$20 sps:$4 sm:$0xff]  }
  0x20   : > { %1536 = vmatpush3.bf16.msra.mxu1 %v1679_v19  ;;  %1473 = vmatprep.subr.bf16.mxu0 %v1680_v20  ;;  %v1731_v60 = vld [vmem:[%s1913_s6 + $0xf4] ss:$20 sps:$4 sm:$0xff]   ;;  %v1733_v61 = vld [vmem:[%s1913_s6 + $0xfc] ss:$20 sps:$4 sm:$0xff]   ;;  %v1736_v63 = vld [vmem:[%s1913_s6 + $0xf8] ss:$20 sps:$4 sm:$0xff]  }
  0x21   : > { %1537 = vmatprep.subr.bf16.mxu1 %v1681_v21  ;;  %v1735_v62 = vld [vmem:[%s1913_s6 + $0xf0] ss:$20 sps:$4 sm:$0xff]   ;;  %v1742_v2 = vld [vmem:[%s1913_s6 + $0x118] ss:$20 sps:$4 sm:$0xff]   ;;  %v1743_v3 = vld [vmem:[%s1913_s6 + $0x120] ss:$20 sps:$4 sm:$0xff]  }
  0x22   : > { %v1738_v0 = vld [vmem:[%s1913_s6 + $0x11c] ss:$20 sps:$4 sm:$0xff]   ;;  %v1740_v1 = vld [vmem:[%s1913_s6 + $0x124] ss:$20 sps:$4 sm:$0xff]   ;;  %v1748_v8 = vld [vmem:[%s1913_s6 + $0x60] ss:$20 sps:$4 sm:$0xff]  }
  0x23   : > { %1474 = vmatpush3.bf16.msra.mxu0 %v1682_v22  ;;  %v1744_v4 = vld [vmem:[%s1913_s6 + $0x10] ss:$20 sps:$4 sm:$0xff]   ;;  %v1746_v6 = vld [vmem:[%s1913_s6 + $0x38] ss:$20 sps:$4 sm:$0xff]   ;;  %v1749_v9 = vld [vmem:[%s1913_s6 + $0x100] ss:$20 sps:$4 sm:$0xff]  }
  0x24   : > { %1538 = vmatpush3.bf16.msra.mxu1 %v1683_v23  ;;  %1475 = vmatprep.subr.bf16.mxu0 %v1684_v24  ;;  %v1745_v5 = vld [vmem:[%s1913_s6 + $0xb0] ss:$20 sps:$4 sm:$0xff]   ;;  %v1747_v7 = vld [vmem:[%s1913_s6 + $0xd8] ss:$20 sps:$4 sm:$0xff]   ;;  %v1750_v10 = vld [vmem:[%s1913_s6 + $0x88] ss:$20 sps:$4 sm:$0xff]  }
  0x25   : > { %1539 = vmatprep.subr.bf16.mxu1 %v1685_v25  ;;  %v1751_v11 = vld [vmem:[%s1913_s6 + $0x128] ss:$20 sps:$4 sm:$0xff]   ;;  %v1984_v14 = vld [vmem:[%s2081_s2] ss:$0 sm:$0xff] }
  0x27   : > { %1476 = vmatpush3.bf16.msra.mxu0 %v1686_v26 }
  0x28   : > { %1540 = vmatpush3.bf16.msra.mxu1 %v1687_v27  ;;  %1477 = vmatprep.subr.bf16.mxu0 %v1688_v28 }
  0x29   : > { %1541 = vmatprep.subr.bf16.mxu1 %v1689_v29 }
  0x2b   : > { %1478 = vmatpush3.bf16.msra.mxu0 %v1690_v30 }
  0x2c   : > { %1542 = vmatpush3.bf16.msra.mxu1 %v1691_v31  ;;  %1603 = vmatprep.subr.bf16.mxu0 %v1698_v36 }
  0x2d   : > { %1627 = vmatprep.subr.bf16.mxu1 %v1698_v36 }
  0x2e   : > { %830 = vmatmul.mubr.bf16.vlgmr.msra.gmra.mxu0 %v1692_v32 }
  0x2f   : > { %927 = vmatmul.mubr.bf16.vlgmr.msra.gmra.mxu1 %v1695_v34  ;;  %1604 = vmatpush3.bf16.msra.mxu0 %v1698_v36 }
  0x30   : > { %1631 = vmatpush3.bf16.msra.mxu1 %v1698_v36  ;;  %837 = vmatprep.mubr.bf16.mxu0 %v1699_v37 }
  0x31   : > { %934 = vmatprep.mubr.bf16.mxu1 %v1701_v38  ;;  %1605 = vmatprep.subr.bf16.mxu0 %v1711_v42 }
  0x32   : > { %1628 = vmatprep.subr.bf16.mxu1 %v1711_v42 }
  0x33   : > { %1606 = vmatpush3.bf16.msra.mxu0 %v1711_v42 }
  0x34   : > { %1632 = vmatpush3.bf16.msra.mxu1 %v1711_v42  ;;  %1607 = vmatprep.subr.bf16.mxu0 %v1724_v46 }
  0x35   : > { %1629 = vmatprep.subr.bf16.mxu1 %v1724_v46 }
  0x36   : > { %838 = vmatmul.mubr.bf16.gmra.mxu0 %v1703_v39 }
  0x37   : > { %935 = vmatmul.mubr.bf16.gmra.mxu1 %v1704_v40  ;;  %845 = vmatprep.mubr.bf16.mxu0 %v1705_v41 }
  0x38   : > { %942 = vmatprep.mubr.bf16.mxu1 %v1707_v43  ;;  %1608 = vmatpush3.bf16.msra.mxu0 %v1724_v46 }
  0x39   : > { %1633 = vmatpush3.bf16.msra.mxu1 %v1724_v46  ;;  %1609 = vmatprep.subr.bf16.mxu0 %v1737_v49 }
  0x3a   : > { %1630 = vmatprep.subr.bf16.mxu1 %v1737_v49 }
  0x3c   : > { %1610 = vmatpush3.bf16.msra.mxu0 %v1737_v49 }
  0x3d   : > { %1634 = vmatpush3.bf16.msra.mxu1 %v1737_v49 }
  0x3e   : > { %846 = vmatmul.mubr.bf16.gmra.mxu0 %v1709_v44 }
  0x3f   : > { %943 = vmatmul.mubr.bf16.gmra.mxu1 %v1710_v45  ;;  %853 = vmatprep.mubr.bf16.mxu0 %v1712_v47 }
  0x40   : > { %950 = vmatprep.mubr.bf16.mxu1 %v1714_v48 }
  0x46   : > { %854 = vmatmul.mubr.bf16.gmra.mxu0 %v1716_v50 }
  0x47   : > { %951 = vmatmul.mubr.bf16.gmra.mxu1 %v1717_v51  ;;  %861 = vmatprep.mubr.bf16.mxu0 %v1718_v52 }
  0x48   : > { %958 = vmatprep.mubr.bf16.mxu1 %v1720_v53 }
  0x4e   : > { %862 = vmatmul.mubr.bf16.gmra.mxu0 %v1722_v54 }
  0x4f   : > { %959 = vmatmul.mubr.bf16.gmra.mxu1 %v1723_v55  ;;  %869 = vmatprep.mubr.bf16.mxu0 %v1725_v56 }
  0x50   : > { %966 = vmatprep.mubr.bf16.mxu1 %v1727_v57 }
  0x56   : > { %870 = vmatmul.mubr.bf16.gmra.mxu0 %v1729_v58 }
  0x57   : > { %967 = vmatmul.mubr.bf16.gmra.mxu1 %v1730_v59  ;;  %877 = vmatprep.mubr.bf16.mxu0 %v1731_v60 }
  0x58   : > { %974 = vmatprep.mubr.bf16.mxu1 %v1733_v61 }
  0x5e   : > { %878 = vmatmul.mubr.bf16.gmra.mxu0 %v1735_v62 }
  0x5f   : > { %975 = vmatmul.mubr.bf16.gmra.mxu1 %v1736_v63  ;;  %885 = vmatprep.mubr.bf16.mxu0 %v1738_v0 }
  0x60   : > { %982 = vmatprep.mubr.bf16.mxu1 %v1740_v1 }
  0x66   : > { %886 = vmatmul.mubr.bf16.gmra.mxu0 %v1742_v2 }
  0x67   : > { %983 = vmatmul.mubr.bf16.gmra.mxu1 %v1743_v3  ;;  %1611 = vmatprep.mubr.msk.bf16.mxu0 %vm772_vm0, %v1744_v4 }
  0x68   : > { %1619 = vmatprep.mubr.msk.bf16.mxu1 %vm772_vm0, %v1745_v5 }
  0x6e   : > { %1612 = vmatmul.mubr.msk.bf16.vlgmr.msra.gmra.mxu0 %vm772_vm0, %v1746_v6 }
  0x6f   : > { %1620 = vmatmul.mubr.msk.bf16.vlgmr.msra.gmra.mxu1 %vm772_vm0, %v1747_v7  ;;  %1615 = vmatprep.mubr.msk.bf16.mxu0 %vm772_vm0, %v1748_v8 }
  0x70   : > { %1623 = vmatprep.mubr.msk.bf16.mxu1 %vm772_vm0, %v1749_v9 }
  0x76   : > { %1616 = vmatmul.mubr.msk.bf16.gmra.mxu0 %vm772_vm0, %v1750_v10 }
  0x77   : > { %1624 = vmatmul.mubr.msk.bf16.gmra.mxu1 %vm772_vm0, %v1751_v11 }
  0xee   : > { %v1479_v12 = vpop.f32.mrf.mxu0 }
  0xef   : > { %v1543_v13 = vpop.f32.mrf.mxu1 }
  0xf0   : > { %v1480_v15 = vpop.f32.mrf.mxu0 }
  0xf1   : > { %v1481_v16 = vadd.f32 %v1480_v15, %v1479_v12  ;;  %v1544_v17 = vpop.f32.mrf.mxu1 }
  0xf2   : > { %v1482_v18 = vpop.f32.mrf.mxu0  ;;  %v1545_v20 = vadd.f32 %v1544_v17, %v1543_v13 }
  0xf3   : > { %v832_v19 = vadd.f32 %v1481_v16, %v1984_v14  ;;  %v1987_v21 = vpop.f32.mrf.mxu1 }
  0xf4   : > { %v1483_v22 = vpop.f32.mrf.mxu0 }
  0xf5   : > { %v1989_v23 = vpop.f32.mrf.mxu1  ;;  %v1991_v24 = vadd.f32 %v1545_v20, %v832_v19  ;;  %v1484_v6 = vadd.f32 %v1483_v22, %v1482_v18 }
  0xf6   : > { %v1485_v25 = vpop.f32.mrf.mxu0 }
  0xf7   : > { %2083 = vst [vmem:[#allocation2_spill] sm:$0xff] %v1991_v24  ;;  %v1549_v26 = vpop.f32.mrf.mxu1  ;;  %v835_v15 = vadd.f32 %v1484_v6, %v1984_v14 }
  0xf8   : > { %v1486_v27 = vpop.f32.mrf.mxu0 }
  0xf9   : > { %v1550_v28 = vpop.f32.mrf.mxu1  ;;  %v1487_v8 = vadd.f32 %v1486_v27, %v1485_v25  ;;  %v1548_v25 = vadd.f32 %v1989_v23, %v1987_v21 }
  0xfa   : > { %v1488_v29 = vpop.f32.mrf.mxu0  ;;  %v1551_v27 = vadd.f32 %v1550_v28, %v1549_v26 }
  0xfb   : > { %v1552_v30 = vpop.f32.mrf.mxu1  ;;  %v840_v19 = vadd.f32 %v1487_v8, %v1984_v14 }
  0xfc   : > { %v1489_v31 = vpop.f32.mrf.mxu0 }
  0xfd   : > { %v1553_v32 = vpop.f32.mrf.mxu1  ;;  %v1490_v9 = vadd.f32 %v1489_v31, %v1488_v29 }
  0xfe   : > { %v1491_v33 = vpop.f32.mrf.mxu0  ;;  %v1554_v29 = vadd.f32 %v1553_v32, %v1552_v30 }
  0xff   : > { %v1555_v34 = vpop.f32.mrf.mxu1  ;;  %v843_v20 = vadd.f32 %v1490_v9, %v1984_v14  ;;  %v932_v9 = vadd.f32 %v1548_v25, %v835_v15 }
 0x100   : > { %v1492_v35 = vpop.f32.mrf.mxu0 }
 0x101   : > { %v1556_v36 = vpop.f32.mrf.mxu1  ;;  %v1493_v10 = vadd.f32 %v1492_v35, %v1491_v33  ;;  %v940_v24 = vadd.f32 %v1554_v29, %v843_v20 }
 0x102   : > { %v1494_v37 = vpop.f32.mrf.mxu0  ;;  %v1557_v35 = vadd.f32 %v1556_v36, %v1555_v34 }
 0x103   : > { %v1993_v38 = vpop.f32.mrf.mxu1  ;;  %v848_v18 = vadd.f32 %v1493_v10, %v1984_v14  ;;  %v937_v10 = vadd.f32 %v1551_v27, %v840_v19 }
 0x104   : > { %v1495_v39 = vpop.f32.mrf.mxu0 }
 0x105   : > { %v1995_v40 = vpop.f32.mrf.mxu1  ;;  %v1496_v6 = vadd.f32 %v1495_v39, %v1494_v37  ;;  %v2025_v21 = vadd.f32 %v1557_v35, %v848_v18 }
 0x106   : > { %v1497_v41 = vpop.f32.mrf.mxu0  ;;  %v2029_v23 = vadd.f32 %v1995_v40, %v1993_v38 }
 0x107   : > { %v1997_v42 = vpop.f32.mrf.mxu1  ;;  %v2034_v34 = vadd.f32 %v1496_v6, %v1984_v14 }
 0x108   : > { %v1498_v43 = vpop.f32.mrf.mxu0 }
 0x109   : > { %v1562_v44 = vpop.f32.mrf.mxu1  ;;  %v1499_v16 = vadd.f32 %v1498_v43, %v1497_v41 }
 0x10a   : > { %v1500_v45 = vpop.f32.mrf.mxu0  ;;  %v1563_v26 = vadd.f32 %v1562_v44, %v1997_v42 }
 0x10b   : > { %v1999_v46 = vpop.f32.mrf.mxu1  ;;  %v856_v8 = vadd.f32 %v1499_v16, %v1984_v14 }
 0x10c   : > { %v1501_v47 = vpop.f32.mrf.mxu0 }
 0x10d   : > { %v2001_v48 = vpop.f32.mrf.mxu1  ;;  %v1502_v28 = vadd.f32 %v1501_v47, %v1500_v45 }
 0x10e   : > { %v1503_v49 = vpop.f32.mrf.mxu0 }
 0x10f   : > { %v2003_v50 = vpop.f32.mrf.mxu1 }
 0x110   : > { %v1504_v51 = vpop.f32.mrf.mxu0 }
 0x111   : > { %v1568_v52 = vpop.f32.mrf.mxu1  ;;  %v1505_v31 = vadd.f32 %v1504_v51, %v1503_v49 }
 0x112   : > { %v1506_v53 = vpop.f32.mrf.mxu0  ;;  %v1569_v51 = vadd.f32 %v1568_v52, %v2003_v50 }
 0x113   : > { %v1570_v54 = vpop.f32.mrf.mxu1  ;;  %v864_v30 = vadd.f32 %v1505_v31, %v1984_v14 }
 0x114   : > { %v1507_v55 = vpop.f32.mrf.mxu0 }
 0x115   : > { %v1571_v56 = vpop.f32.mrf.mxu1  ;;  %v1508_v41 = vadd.f32 %v1507_v55, %v1506_v53  ;;  %v953_v55 = vadd.f32 %v1563_v26, %v856_v8  ;;  %v961_v15 = vadd.f32 %v1569_v51, %v864_v30 }
 0x116   : > { %v1509_v57 = vpop.f32.mrf.mxu0  ;;  %v1572_v53 = vadd.f32 %v1571_v56, %v1570_v54 }
 0x117   : > { %v1573_v58 = vpop.f32.mrf.mxu1  ;;  %v867_v36 = vadd.f32 %v1508_v41, %v1984_v14 }
 0x118   : > { %v1510_v59 = vpop.f32.mrf.mxu0 }
 0x119   : > { %v1574_v60 = vpop.f32.mrf.mxu1  ;;  %v1511_v22 = vadd.f32 %v1510_v59, %v1509_v57  ;;  %v964_v56 = vadd.f32 %v1572_v53, %v867_v36 }
 0x11a   : > { %v1512_v61 = vpop.f32.mrf.mxu0  ;;  %v1575_v37 = vadd.f32 %v1574_v60, %v1573_v58  ;;  %v1566_v58 = vadd.f32 %v2001_v48, %v1999_v46 }
 0x11b   : > { %v1576_v62 = vpop.f32.mrf.mxu1  ;;  %v872_v57 = vadd.f32 %v1511_v22, %v1984_v14 }
 0x11c   : > { %v1513_v63 = vpop.f32.mrf.mxu0 }
 0x11d   : > { %v1577_v0 = vpop.f32.mrf.mxu1  ;;  %v1514_v43 = vadd.f32 %v1513_v63, %v1512_v61  ;;  %v969_v47 = vadd.f32 %v1575_v37, %v872_v57  ;;  %v859_v63 = vadd.f32 %v1502_v28, %v1984_v14 }
 0x11e   : > { %v1515_v1 = vpop.f32.mrf.mxu0  ;;  %v1578_v42 = vadd.f32 %v1577_v0, %v1576_v62 }
 0x11f   : > { %v2005_v2 = vpop.f32.mrf.mxu1  ;;  %v875_v39 = vadd.f32 %v1514_v43, %v1984_v14  ;;  %v956_v37 = vadd.f32 %v1566_v58, %v859_v63 }
 0x120   : > { %v1516_v3 = vpop.f32.mrf.mxu0 }
 0x121   : > { %v2007_v4 = vpop.f32.mrf.mxu1  ;;  %v1517_v44 = vadd.f32 %v1516_v3, %v1515_v1  ;;  %v972_v54 = vadd.f32 %v1578_v42, %v875_v39  ;;  %v2087_v1 = vld [vmem:[#allocation2_spill] sm:$0xff] }
 0x122   : > { %v1518_v5 = vpop.f32.mrf.mxu0  ;;  %v1581_v62 = vadd.f32 %v2007_v4, %v2005_v2 }
 0x123   : > { %v2009_v7 = vpop.f32.mrf.mxu1  ;;  %v880_v46 = vadd.f32 %v1517_v44, %v1984_v14 }
 0x124   : > { %2084 = vst [vmem:[#allocation3_spill] sm:$0xff] %v2009_v7  ;;  %v1519_v11 = vpop.f32.mrf.mxu0 }
 0x125   : > { %v2011_v12 = vpop.f32.mrf.mxu1  ;;  %v1520_v45 = vadd.f32 %v1519_v11, %v1518_v5  ;;  %v977_v30 = vadd.f32 %v1581_v62, %v880_v46 }
 0x126   : > { %2085 = vst [vmem:[#allocation4_spill] sm:$0xff] %v2011_v12  ;;  %v1521_v13 = vpop.f32.mrf.mxu0 }
 0x127   : > { %v2014_v17 = vpop.f32.mrf.mxu1  ;;  %v883_v48 = vadd.f32 %v1520_v45, %v1984_v14  ;;  %v948_v45 = vadd.f32 %v2029_v23, %v2034_v34 }
 0x128   : > { %2086 = vst [vmem:[#allocation5_spill] sm:$0xff] %v2014_v17  ;;  %v1522_v7 = vpop.f32.mrf.mxu0 }
 0x129   : > { %v1586_v33 = vpop.f32.mrf.mxu1  ;;  %v1523_v38 = vadd.f32 %v1522_v7, %v1521_v13 }
 0x12a   : > { %v1524_v12 = vpop.f32.mrf.mxu0 }
 0x12b   : > { %v2022_v17 = vpop.f32.mrf.mxu1  ;;  %v888_v0 = vadd.f32 %v1523_v38, %v1984_v14  ;;  %v2089_v39 = vld [vmem:[#allocation3_spill] sm:$0xff] }
 0x12c   : > { %v1525_v59 = vpop.f32.mrf.mxu0 }
 0x12d   : > { %v1589_v32 = vpop.f32.mrf.mxu1  ;;  %v1526_v19 = vadd.f32 %v1525_v59, %v1524_v12 }
 0x12e   : > { %v1613_v49 = vpop.f32.mrf.mxu0 }
 0x12f   : > { %v1621_v40 = vpop.f32.mrf.mxu1  ;;  %v1034_v60 = vadd.f32 %v1613_v49, %v937_v10  ;;  %v2088_v20 = vld [vmem:[#allocation5_spill] sm:$0xff]  ;;  %v891_v4 = vadd.f32 %v1526_v19, %v1984_v14  ;;  %v2090_v49 = vld [vmem:[#allocation4_spill] sm:$0xff] }
 0x130   : > { %v1025_v61 = vpop.f32.mrf.mxu0  ;;  %v1066_v50 = vadd.f32 %v1621_v40, %v969_v47  ;;  %v1587_v18 = vadd.f32 %v1586_v33, %v2088_v20  ;;  %v1584_v51 = vadd.f32 %v2090_v49, %v2089_v39 }
 0x131   : > { %v1057_v16 = vpop.f32.mrf.mxu1  ;;  %v1026_v3 = vadd.f32 %v1025_v61, %v2087_v1  ;;  %v1090_v22 = vmax.f32 %v1034_v60, 0.0 }
 0x132   : > { %v1614_v52 = vpop.f32.mrf.mxu0  ;;  %v1058_v11 = vadd.f32 %v1057_v16, %v961_v15  ;;  %v1098_v29 = vmax.f32 %v1066_v50, 0.0  ;;  %v985_v43 = vadd.f32 %v1587_v18, %v888_v0  ;;  %v980_v63 = vadd.f32 %v1584_v51, %v883_v48 }
 0x133   : > { %v1037_v5 = vadd.f32 %v1614_v52, %v940_v24  ;;  %v1622_v7 = vpop.f32.mrf.mxu1  ;;  %v1088_v6 = vmax.f32 %v1026_v3, 0.0 }
 0x134   : > { %v1069_v12 = vadd.f32 %v1622_v7, %v972_v54  ;;  %v1028_v13 = vpop.f32.mrf.mxu0  ;;  %v1096_v57 = vmax.f32 %v1058_v11, 0.0 }
 0x135   : > { %v1091_v25 = vmax.f32 %v1037_v5, 0.0  ;;  %v1029_v27 = vadd.f32 %v1028_v13, %v932_v9  ;;  %v1060_v2 = vpop.f32.mrf.mxu1  ;;  %v1590_v9 = vadd.f32 %v1589_v32, %v2022_v17 }
 0x136   : > { %v1099_v24 = vmax.f32 %v1069_v12, 0.0  ;;  %v1061_v31 = vadd.f32 %v1060_v2, %v964_v56  ;;  %v1617_v35 = vpop.f32.mrf.mxu0 }
 0x137   : > { %v1424_v41 = vpack.c.bf16 %v1091_v25, %v1090_v22  ;;  %v1089_v33 = vmax.f32 %v1029_v27, 0.0  ;;  %v1625_v8 = vpop.f32.mrf.mxu1  ;;  %v1050_v28 = vadd.f32 %v1617_v35, %v953_v55  ;;  %v988_v17 = vadd.f32 %v1590_v9, %v891_v4 }
 0x138   : > { %v1444_v14 = vpack.c.bf16 %v1099_v24, %v1098_v29  ;;  %v1097_v59 = vmax.f32 %v1061_v31, 0.0  ;;  %v1041_v10 = vpop.f32.mrf.mxu0  ;;  %v1082_v38 = vadd.f32 %v1625_v8, %v985_v43 }
 0x139   : > { %1456 = vst [vmem:[%s2054_s28 + $0x8] sm:$0xff] %v1424_v41   ;;  %v1419_v26 = vpack.c.bf16 %v1089_v33, %v1088_v6  ;;  %v1073_v36 = vpop.f32.mrf.mxu1  ;;  %v1042_v32 = vadd.f32 %v1041_v10, %v2025_v21  ;;  %v1094_v58 = vmax.f32 %v1050_v28, 0.0 }
 0x13a   : > { %1460 = vst [vmem:[%s2054_s28 + $0x28] sm:$0xff] %v1444_v14   ;;  %v1439_v53 = vpack.c.bf16 %v1097_v59, %v1096_v57  ;;  %v1618_v40 = vpop.f32.mrf.mxu0  ;;  %v1074_v55 = vadd.f32 %v1073_v36, %v977_v30  ;;  %v1102_v19 = vmax.f32 %v1082_v38, 0.0 }
 0x13b   : > { %1420 = vst [vmem:[%s2054_s28] sm:$0xff] %v1419_v26   ;;  %v1053_v42 = vadd.f32 %v1618_v40, %v956_v37  ;;  %v1626_v44 = vpop.f32.mrf.mxu1  ;;  %v1092_v52 = vmax.f32 %v1042_v32, 0.0 }
 0x13c   : > { %1459 = vst [vmem:[%s2054_s28 + $0x20] sm:$0xff] %v1439_v53   ;;  %v1085_v47 = vadd.f32 %v1626_v44, %v988_v17  ;;  %v1044_v61 = vpop.f32.mrf.mxu0  ;;  %v1100_v23 = vmax.f32 %v1074_v55, 0.0 }
 0x13d   : > { %v1095_v60 = vmax.f32 %v1053_v42, 0.0  ;;  %v1045_v15 = vadd.f32 %v1044_v61, %v948_v45  ;;  %v1076_v16 = vpop.f32.mrf.mxu1 }
 0x13e   : > { %v1103_v21 = vmax.f32 %v1085_v47, 0.0  ;;  %v1077_v50 = vadd.f32 %v1076_v16, %v980_v63 }
 0x13f   : > { %v1434_v54 = vpack.c.bf16 %v1095_v60, %v1094_v58  ;;  %v1093_v56 = vmax.f32 %v1045_v15, 0.0 }
 0x140   : > { %v1454_v34 = vpack.c.bf16 %v1103_v21, %v1102_v19  ;;  %v1101_v62 = vmax.f32 %v1077_v50, 0.0 }
 0x141   : > { %1458 = vst [vmem:[%s2054_s28 + $0x18] sm:$0xff] %v1434_v54   ;;  %v1429_v0 = vpack.c.bf16 %v1093_v56, %v1092_v52 }
 0x142   : > { %1462 = vst [vmem:[%s2054_s28 + $0x38] sm:$0xff] %v1454_v34   ;;  %v1449_v1 = vpack.c.bf16 %v1101_v62, %v1100_v23 }
 0x143   : > { %1457 = vst [vmem:[%s2054_s28 + $0x10] sm:$0xff] %v1429_v0  }
 0x144   : > { %1461 = vst [vmem:[%s2054_s28 + $0x30] sm:$0xff] %v1449_v1  }
 0x145 PF: > { %s13_s14 = sadd.s32 1, %s1774_s14   ;;  %s2091_s12 = smov %s1770_s13 }
 0x146   : > { %p10_p5 = scmp.ge.s32.totalorder %s13_s14, 5   ;;  %s2092_s13 = smov %s2094_s15 }
 0x148   :  { %12 = sbr.rel (!%p10_p5) target bundleno = 2 (0x2), region = 68 }

// kernel: deep_q_forward.9
= control target key start
LH: loop header
LB: loop body
LE: loop exit
PB: predicated region body
PF: predicated region fallthrough
CT: control target
= control target key end

     0   :  { %v112_v30 = vlaneseq  ;;  %v870_v34 = vmov 1966171168   ;;  %v871_v37 = vmov 0.0   ;;  %s1091_s0 = inlined_call_operand.vmem [shape: bf16[2,512], index: 0, kind: input, shape index: {}]   ;;  %s1092_s1 = inlined_call_operand.vmem [shape: bf16[512,128], index: 1, kind: input, shape index: {}]   ;;  %s1093_s2 = inlined_call_operand.vmem [shape: f32[1,128], index: 2, kind: input, shape index: {}]   ;;  %s1094_s3 = inlined_call_operand.vmem [shape: bf16[128,128], index: 3, kind: input, shape index: {}]   ;;  %s1095_s4 = inlined_call_operand.vmem [shape: f32[1,128], index: 4, kind: input, shape index: {}]   ;;  %s1096_s5 = inlined_call_operand.vmem [shape: bf16[128,128], index: 5, kind: input, shape index: {}]   ;;  %s1097_s6 = inlined_call_operand.vmem [shape: f32[1,128], index: 6, kind: input, shape index: {}]   ;;  %s1098_s7 = inlined_call_operand.hbm [shape: f32[2,128], index: 7, kind: output, shape index: {}]  }
   0x1   :  { %v800_v0 = vld [vmem:[%s1092_s1 + $0x78] sm:$0xff]   ;;  %v804_v4 = vld [vmem:[%s1092_s1 + $0x70] sm:$0xff]   ;;  %v808_v8 = vld [vmem:[%s1092_s1 + $0x68] sm:$0xff]   ;;  %v110_v35 = vunpack.c.l.s4 %v870_v34 }
   0x2   :  { %v801_v1 = vld [vmem:[%s1092_s1 + $0xf8] sm:$0xff]   ;;  %694 = vmatprep.subr.bf16.mxu0 %v800_v0  ;;  %v805_v5 = vld [vmem:[%s1092_s1 + $0xf0] sm:$0xff]   ;;  %v809_v9 = vld [vmem:[%s1092_s1 + $0xe8] sm:$0xff]   ;;  %v113_v36 = vshrl.u32 %v112_v30, 7 }
   0x3   :  { %v802_v2 = vld [vmem:[%s1092_s1 + $0x38] sm:$0xff]   ;;  %716 = vmatprep.subr.bf16.mxu1 %v801_v1  ;;  %v806_v6 = vld [vmem:[%s1092_s1 + $0x30] sm:$0xff]   ;;  %v810_v10 = vld [vmem:[%s1092_s1 + $0x28] sm:$0xff]   ;;  %v111_v39 = vunpack.c.0.s8 %v110_v35 }
   0x4   :  { %v803_v3 = vld [vmem:[%s1092_s1 + $0xb8] sm:$0xff]   ;;  %695 = vmatpush3.bf16.msra.mxu0 %v802_v2  ;;  %v807_v7 = vld [vmem:[%s1092_s1 + $0xb0] sm:$0xff]   ;;  %v811_v11 = vld [vmem:[%s1092_s1 + $0xa8] sm:$0xff]  }
   0x5   :  { %717 = vmatpush3.bf16.msra.mxu1 %v803_v3  ;;  %696 = vmatprep.subr.bf16.mxu0 %v804_v4  ;;  %v812_v12 = vld [vmem:[%s1092_s1 + $0x60] sm:$0xff]   ;;  %v816_v16 = vld [vmem:[%s1092_s1 + $0x58] sm:$0xff]   ;;  %v820_v20 = vld [vmem:[%s1092_s1 + $0x50] sm:$0xff]   ;;  %v114_v40 = vsub.s32 %v111_v39, %v113_v36 }
   0x6   :  { %718 = vmatprep.subr.bf16.mxu1 %v805_v5  ;;  %v813_v13 = vld [vmem:[%s1092_s1 + $0xe0] sm:$0xff]   ;;  %v817_v17 = vld [vmem:[%s1092_s1 + $0xd8] sm:$0xff]   ;;  %v821_v21 = vld [vmem:[%s1092_s1 + $0xd0] sm:$0xff]  }
   0x7   :  { %v814_v14 = vld [vmem:[%s1092_s1 + $0x20] sm:$0xff]   ;;  %v818_v18 = vld [vmem:[%s1092_s1 + $0x18] sm:$0xff]   ;;  %v822_v22 = vld [vmem:[%s1092_s1 + $0x10] sm:$0xff]  }
   0x8   :  { %697 = vmatpush3.bf16.msra.mxu0 %v806_v6  ;;  %v815_v15 = vld [vmem:[%s1092_s1 + $0xa0] sm:$0xff]   ;;  %v819_v19 = vld [vmem:[%s1092_s1 + $0x98] sm:$0xff]   ;;  %v823_v23 = vld [vmem:[%s1092_s1 + $0x90] sm:$0xff]  }
   0x9   :  { %719 = vmatpush3.bf16.msra.mxu1 %v807_v7  ;;  %698 = vmatprep.subr.bf16.mxu0 %v808_v8  ;;  %v824_v24 = vld [vmem:[%s1092_s1 + $0x48] sm:$0xff]   ;;  %v828_v28 = vld [vmem:[%s1092_s1 + $0x40] sm:$0xff]   ;;  %v832_v41 = vld [vmem:[%s1094_s3 + $0x38] sm:$0xff]  }
   0xa   :  { %720 = vmatprep.subr.bf16.mxu1 %v809_v9  ;;  %v825_v25 = vld [vmem:[%s1092_s1 + $0xc8] sm:$0xff]   ;;  %v829_v29 = vld [vmem:[%s1092_s1 + $0xc0] sm:$0xff]   ;;  %v833_v46 = vld [vmem:[%s1094_s3 + $0x30] sm:$0xff]  }
   0xb   :  { %v826_v26 = vld [vmem:[%s1092_s1 + $0x8] sm:$0xff]   ;;  %v830_v31 = vld [vmem:[%s1092_s1] sm:$0xff]  }
   0xc   :  { %699 = vmatpush3.bf16.msra.mxu0 %v810_v10  ;;  %v827_v27 = vld [vmem:[%s1092_s1 + $0x88] sm:$0xff]   ;;  %v831_v32 = vld [vmem:[%s1092_s1 + $0x80] sm:$0xff]  }
   0xd   :  { %721 = vmatpush3.bf16.msra.mxu1 %v811_v11  ;;  %700 = vmatprep.subr.bf16.mxu0 %v812_v12  ;;  %v643_v33 = vld.sshfl [vmem:[%s1091_s0] sm:$0x33 pattern:$0x75316420] }
   0xe   :  { %722 = vmatprep.subr.bf16.mxu1 %v813_v13  ;;  %v108_v38 = vcombine.high %v643_v33, %v643_v33  ;;  %v115_v43 = vrot.slane %v643_v33, %v114_v40 }
  0x10   :  { %701 = vmatpush3.bf16.msra.mxu0 %v814_v14  ;;  %v122_v42 = vrot.slane %v108_v38, %v114_v40  ;;  %v123_v45 = vcombine.high %v115_v43, %v115_v43 }
  0x11   :  { %723 = vmatpush3.bf16.msra.mxu1 %v815_v15  ;;  %702 = vmatprep.subr.bf16.mxu0 %v816_v16 }
  0x12   :  { %724 = vmatprep.subr.bf16.mxu1 %v817_v17  ;;  %353 = vmatprep.mubr.bf16.mxu0 %v122_v42  ;;  %v124_v44 = vcombine.high %v122_v42, %v122_v42 }
  0x14   :  { %703 = vmatpush3.bf16.msra.mxu0 %v818_v18  ;;  %393 = vmatprep.mubr.bf16.mxu1 %v124_v44 }
  0x15   :  { %725 = vmatpush3.bf16.msra.mxu1 %v819_v19  ;;  %704 = vmatprep.subr.bf16.mxu0 %v820_v20 }
  0x16   :  { %726 = vmatprep.subr.bf16.mxu1 %v821_v21 }
  0x18   :  { %705 = vmatpush3.bf16.msra.mxu0 %v822_v22 }
  0x19   :  { %727 = vmatpush3.bf16.msra.mxu1 %v823_v23  ;;  %706 = vmatprep.subr.bf16.mxu0 %v824_v24 }
  0x1a   :  { %728 = vmatprep.subr.bf16.mxu1 %v825_v25 }
  0x1c   :  { %707 = vmatpush3.bf16.msra.mxu0 %v826_v26 }
  0x1d   :  { %729 = vmatpush3.bf16.msra.mxu1 %v827_v27  ;;  %708 = vmatprep.subr.bf16.mxu0 %v828_v28 }
  0x1e   :  { %730 = vmatprep.subr.bf16.mxu1 %v829_v29 }
  0x20   :  { %709 = vmatpush3.bf16.msra.mxu0 %v830_v31 }
  0x21   :  { %731 = vmatpush3.bf16.msra.mxu1 %v831_v32  ;;  %756 = vmatprep.subr.bf16.mxu0 %v871_v37 }
  0x22   :  { %776 = vmatprep.subr.bf16.mxu1 %v871_v37 }
  0x23   :  { %354 = vmatmul.mubr.bf16.vlgmr.msra.gmra.mxu0 %v115_v43 }
  0x24   :  { %757 = vmatpush3.bf16.msra.mxu0 %v832_v41  ;;  %394 = vmatmul.mubr.bf16.vlgmr.msra.gmra.mxu1 %v123_v45 }
  0x25   :  { %758 = vmatprep.subr.bf16.mxu0 %v871_v37 }
  0x26   :  { %12 = vsyncpa [#allocation3], 0  ;;  %v834_v47 = vld [vmem:[%s1094_s3 + $0x28] sm:$0xff]   ;;  %v835_v48 = vld [vmem:[%s1094_s3 + $0x20] sm:$0xff]   ;;  %vm872_vm0 = vmmov 0   ;;  %s873_s30 = smov [#allocation2]  }
  0x27   :  { %v836_v49 = vld [vmem:[%s1094_s3 + $0x18] sm:$0xff]   ;;  %v837_v50 = vld [vmem:[%s1094_s3 + $0x10] sm:$0xff]   ;;  %v838_v51 = vld [vmem:[%s1094_s3 + $0x8] sm:$0xff]   ;;  %772 = vmatprep.mubr.msk.bf16.mxu0 %vm872_vm0, %v871_v37  ;;  %792 = vmatprep.mubr.msk.bf16.mxu1 %vm872_vm0, %v871_v37  ;;  %s634_s8 = sshll.u32 %s873_s30, 4  ;;  %s635_s8 = int_to_ptr.vmem [resolvable:$true] %s634_s8 }
  0x28   :  { %759 = vmatpush3.bf16.msra.mxu0 %v833_v46  ;;  %v839_v52 = vld [vmem:[%s1094_s3] sm:$0xff]   ;;  %v840_v53 = vld [vmem:[%s1096_s5 + $0x38] sm:$0xff]   ;;  %v841_v54 = vld [vmem:[%s1096_s5 + $0x30] sm:$0xff]   ;;  %p853_p1 = scmp.lt.s32.totalorder %s635_s8, %s635_s8 }
  0x29   :  { %760 = vmatprep.subr.bf16.mxu0 %v871_v37  ;;  %777 = vmatpush3.bf16.msra.mxu1 %v840_v53  ;;  %v842_v55 = vld [vmem:[%s1096_s5 + $0x28] sm:$0xff]   ;;  %v843_v56 = vld [vmem:[%s1096_s5 + $0x20] sm:$0xff]   ;;  %v844_v57 = vld [vmem:[%s1096_s5 + $0x18] sm:$0xff]  }
  0x2a   :  { %778 = vmatprep.subr.bf16.mxu1 %v871_v37  ;;  %v845_v58 = vld [vmem:[%s1096_s5 + $0x10] sm:$0xff]   ;;  %v642_v61 = vld [vmem:[%s1093_s2] ss:$0 sm:$0xff]  ;;  %v846_v10 = vld [vmem:[%s1096_s5 + $0x8] sm:$0xff]  }
  0x2b   :  { %v847_v11 = vld [vmem:[%s1096_s5] sm:$0xff]  }
  0x2c   :  { %761 = vmatpush3.bf16.msra.mxu0 %v834_v47  ;;  %v676_v12 = vld [vmem:[%s1095_s4] ss:$0 sm:$0xff]  ;;  %s848_s4 = scalar_lea.vmem %s635_s8, 32 }
  0x2d   :  { %762 = vmatprep.subr.bf16.mxu0 %v871_v37  ;;  %779 = vmatpush3.bf16.msra.mxu1 %v841_v54  ;;  %v685_v20 = vld [vmem:[%s1097_s6] ss:$0 sm:$0xff]  ;;  %p849_p0 = scmp.ne.s32.totalorder %s635_s8, %s848_s4  ;;  %p854_p2 = scmp.lt.s32.totalorder %s848_s4, %s848_s4 }
  0x2e   :  { %780 = vmatprep.subr.bf16.mxu1 %v871_v37 }
  0x2f   :  { %p855_p3 = por %p854_p2, %p853_p1 }
  0x30   :  { %763 = vmatpush3.bf16.msra.mxu0 %v835_v48 }
  0x31   :  { %764 = vmatprep.subr.bf16.mxu0 %v871_v37  ;;  %781 = vmatpush3.bf16.msra.mxu1 %v842_v55  ;;  %p856_p4 = pnand %p855_p3, %p849_p0 }
  0x32   :  { %782 = vmatprep.subr.bf16.mxu1 %v871_v37 }
  0x34   :  { %765 = vmatpush3.bf16.msra.mxu0 %v836_v49 }
  0x35   :  { %766 = vmatprep.subr.bf16.mxu0 %v871_v37  ;;  %783 = vmatpush3.bf16.msra.mxu1 %v843_v56 }
  0x36   :  { %784 = vmatprep.subr.bf16.mxu1 %v871_v37 }
  0x38   :  { %767 = vmatpush3.bf16.msra.mxu0 %v837_v50 }
  0x39   :  { %768 = vmatprep.subr.bf16.mxu0 %v871_v37  ;;  %785 = vmatpush3.bf16.msra.mxu1 %v844_v57 }
  0x3a   :  { %786 = vmatprep.subr.bf16.mxu1 %v871_v37 }
  0x3c   :  { %769 = vmatpush3.bf16.msra.mxu0 %v838_v51 }
  0x3d   :  { %770 = vmatprep.subr.bf16.mxu0 %v871_v37  ;;  %787 = vmatpush3.bf16.msra.mxu1 %v845_v58 }
  0x3e   :  { %788 = vmatprep.subr.bf16.mxu1 %v871_v37 }
  0x40   :  { %771 = vmatpush3.bf16.msra.mxu0 %v839_v52 }
  0x41   :  { %789 = vmatpush3.bf16.msra.mxu1 %v846_v10 }
  0x42   :  { %790 = vmatprep.subr.bf16.mxu1 %v871_v37 }
  0x45   :  { %791 = vmatpush3.bf16.msra.mxu1 %v847_v11 }
  0xe3   :  { %v710_v59 = vpop.f32.mrf.mxu0 }
  0xe4   :  { %v732_v60 = vpop.f32.mrf.mxu1 }
  0xe5   :  { %v711_v62 = vpop.f32.mrf.mxu0 }
  0xe6   :  { %v712_v63 = vadd.f32 %v711_v62, %v710_v59  ;;  %v733_v0 = vpop.f32.mrf.mxu1 }
  0xe7   :  { %v713_v1 = vpop.f32.mrf.mxu0  ;;  %v734_v3 = vadd.f32 %v733_v0, %v732_v60 }
  0xe8   :  { %v356_v2 = vadd.f32 %v712_v63, %v642_v61  ;;  %v735_v4 = vpop.f32.mrf.mxu1 }
  0xe9   :  { %v714_v5 = vpop.f32.mrf.mxu0 }
  0xea   :  { %v396_v6 = vadd.f32 %v734_v3, %v356_v2  ;;  %v736_v7 = vpop.f32.mrf.mxu1 }
  0xec   :  { %v401_v8 = vmax.f32 %v396_v6, 0.0 }
  0xee   :  { %v402_v9 = vpack.c.bf16 %v401_v8, %v401_v8 }
  0xf0   :  { %773 = vmatmul.mubr.bf16.vlgmr.msra.gmra.mxu0 %v402_v9 }
 0x1b0   :  { %v508_v13 = vpop.f32.mrf.mxu0 }
 0x1b1   :  { %v509_v14 = vadd.f32 %v676_v12, %v508_v13 }
 0x1b2   :  { %v774_v15 = vpop.f32.mrf.mxu0 }
 0x1b3   :  { %v514_v16 = vmax.f32 %v509_v14, 0.0 }
 0x1b4   :  { %v511_v17 = vpop.f32.mrf.mxu0 }
 0x1b5   :  { %v515_v18 = vpack.c.bf16 %v514_v16, %v514_v16 }
 0x1b6   :  { %v775_v19 = vpop.f32.mrf.mxu0 }
 0x1b7   :  { %793 = vmatmul.mubr.bf16.vlgmr.msra.gmra.mxu1 %v515_v18 }
 0x277   :  { %v621_v21 = vpop.f32.mrf.mxu1 }
 0x278   :  { %v622_v22 = vadd.f32 %v685_v20, %v621_v21 }
 0x279   :  { %v794_v23 = vpop.f32.mrf.mxu1 }
 0x27a   :  { %627 = vst [vmem:[#allocation2] sm:$0x3] %v622_v22 }
 0x27b   :  { %v624_v24 = vpop.f32.mrf.mxu1 }
 0x27c   :  { %859 = shalt.err (!%p856_p4)
}
 0x27d   :  { %637 = dma.vmem_to_hbm [thread:$0]  %s635_s8, 32, %s1098_s7, [#allocation3]   ;;  %v795_v25 = vpop.f32.mrf.mxu1 }
 0x27e   :  { %868 = dma.done.wait [#allocation3], 32  }
 0x27f   :  { %869 = vsyncadd [#allocation3], 4294967264 }
 0x280   :  { %641 = vsyncpa [#allocation3], 1 }

// kernel: deep_q_forward.8
= control target key start
LH: loop header
LB: loop body
LE: loop exit
PB: predicated region body
PF: predicated region fallthrough
CT: control target
= control target key end

     0   :  { %s5000_s12 = smov 0   ;;  %s5002_s13 = smov 0   ;;  %s6088_s0 = inlined_call_operand.vmem [shape: bf16[2,19456], index: 0, kind: input, shape index: {}]   ;;  %s6089_s1 = inlined_call_operand.vmem [shape: bf16[19456,512], index: 1, kind: input, shape index: {}]   ;;  %s6090_s2 = inlined_call_operand.vmem [shape: f32[1,512], index: 2, kind: input, shape index: {}]   ;;  %s6091_s3 = inlined_call_operand.vmem [shape: bf16[2,512], index: 3, kind: output, shape index: {}]  }
   0x1   :  { %s5004_s14 = smov 0   ;;  %s5006_s15 = smov 0  }
   0x2   :  { %s5008_s16 = smov 0   ;;  %s5010_s17 = smov 0  }
   0x3   :  { %s5012_s18 = smov 0  }
   0x4 LB: > { %s25_s19 = sadd.s32 1, %s4966_s16  ;;  %s28_s20 = sadd.s32 1, %s4970_s17  ;;  %s4974_s18 = sphi %s5012_s18, %s13_s18   ;;  %s4970_s17 = sphi %s5010_s17, %s6097_s17   ;;  %s4966_s16 = sphi %s5008_s16, %s6096_s16   ;;  %s4962_s15 = sphi %s5006_s15, %s6095_s15   ;;  %s4958_s14 = sphi %s5004_s14, %s6094_s14   ;;  %s4954_s13 = sphi %s5002_s13, %s6093_s13   ;;  %s4950_s12 = sphi %s5000_s12, %s6092_s12  }
   0x5   : > { %p26_p0 = scmp.ge.s32.totalorder %s25_s19, 8  ;;  %p76_p1 = scmp.ne.s32.totalorder %s4954_s13, %s4950_s12 }
   0x6   : > { %p77_p2 = scmp.eq.s32.totalorder %s4974_s18, 0  ;;  %s69_s24 = sadd.s32 1, %s4954_s13 }
   0x7   : > { %s6099_s19 = smov (%p26_p0, %s25_s19), 0  ;;  %s6101_s20 = smov (!%p26_p0, %s28_s20), %s4970_s17 }
   0x8   : > { %p78_p3 = por %p77_p2, %p76_p1  ;;  %p30_p4 = scmp.ge.s32.totalorder %s6101_s20, 2 }
   0x9   : > { %s64_s21 = ssub.s32 %s4966_s16, %s6099_s19  ;;  %p4081_p6 = scmp.ge.s32.totalorder %s4974_s18, 16 }
   0xa   : > { %s6103_s20 = smov (%p30_p4, %s6101_s20), 0 }
   0xb   : > { %s65_s22 = ssub.s32 %s4970_s17, %s6103_s20  ;;  %156 = sbr.rel (%p4081_p6) target bundleno = 176 (0xb0), region = 16 }
   0xc   : > { %s66_s23 = sor.u32 %s65_s22, %s64_s21 }
   0xd   : > { %p67_p5 = scmp.eq.s32.totalorder %s66_s23, 0 }
   0xf   : > { %s5051_s25 = scalar_select %p67_p5, %s4954_s13, %s69_s24  }
  0x10   : > { %171 = sbr.rel (!%p78_p3) target bundleno = 176 (0xb0), region = 24  ;;  %s173_s26 = sand.u32 (%p78_p3), 1, %s4954_s13  }
  0x11   : > { %s4400_s27 = smul.u32 (%p78_p3), 2432, %s173_s26  ;;  %s4082_s28 = sshll.u32 (%p78_p3), %s4970_s17, 1 }
  0x12   : > { %s4399_s29 = smul.u32 (%p78_p3), 1216, %s4966_s16 }
  0x13   : > { %s5065_s8 = scalar_lea.vmem (%p78_p3), [#allocation3], %s4400_s27 }
  0x14   : > { %s179_s30 = sadd.s32 (%p78_p3), %s4399_s29, %s4082_s28 }
  0x15   : > { %s4084_s4 = sshll.u32 %s179_s30, 2 }
  0x16   : > { %s5060_s7 = scalar_lea.vmem %s6089_s1, %s4084_s4 }
  0x17   : > { %v816_v0 = vld [vmem:[%s5060_s7] sm:$0xff]  ;;  %v818_v1 = vld [vmem:[%s5060_s7 + $0x10] sm:$0xff] }
  0x18   : > { %v820_v2 = vld [vmem:[%s5060_s7 + $0x20] sm:$0xff]  ;;  %817 = vst [vmem:[%s5065_s8] sm:$0xff] %v816_v0  ;;  %819 = vst [vmem:[%s5065_s8 + $0x8] sm:$0xff] %v818_v1  ;;  %v822_v3 = vld [vmem:[%s5060_s7 + $0x30] sm:$0xff] }
  0x19   : > { %821 = vst [vmem:[%s5065_s8 + $0x10] sm:$0xff] %v820_v2  ;;  %v824_v4 = vld [vmem:[%s5060_s7 + $0x40] sm:$0xff]  ;;  %v826_v5 = vld [vmem:[%s5060_s7 + $0x50] sm:$0xff]  ;;  %823 = vst [vmem:[%s5065_s8 + $0x18] sm:$0xff] %v822_v3 }
  0x1a   : > { %825 = vst [vmem:[%s5065_s8 + $0x20] sm:$0xff] %v824_v4  ;;  %827 = vst [vmem:[%s5065_s8 + $0x28] sm:$0xff] %v826_v5  ;;  %v828_v6 = vld [vmem:[%s5060_s7 + $0x60] sm:$0xff]  ;;  %v830_v7 = vld [vmem:[%s5060_s7 + $0x70] sm:$0xff] }
  0x1b   : > { %v832_v8 = vld [vmem:[%s5060_s7 + $0x80] sm:$0xff]  ;;  %829 = vst [vmem:[%s5065_s8 + $0x30] sm:$0xff] %v828_v6  ;;  %831 = vst [vmem:[%s5065_s8 + $0x38] sm:$0xff] %v830_v7  ;;  %v834_v9 = vld [vmem:[%s5060_s7 + $0x90] sm:$0xff] }
  0x1c   : > { %833 = vst [vmem:[%s5065_s8 + $0x40] sm:$0xff] %v832_v8  ;;  %v836_v10 = vld [vmem:[%s5060_s7 + $0xa0] sm:$0xff]  ;;  %v838_v11 = vld [vmem:[%s5060_s7 + $0xb0] sm:$0xff]  ;;  %835 = vst [vmem:[%s5065_s8 + $0x48] sm:$0xff] %v834_v9 }
  0x1d   : > { %837 = vst [vmem:[%s5065_s8 + $0x50] sm:$0xff] %v836_v10  ;;  %839 = vst [vmem:[%s5065_s8 + $0x58] sm:$0xff] %v838_v11  ;;  %v840_v12 = vld [vmem:[%s5060_s7 + $0xc0] sm:$0xff]  ;;  %v842_v13 = vld [vmem:[%s5060_s7 + $0xd0] sm:$0xff] }
  0x1e   : > { %v844_v14 = vld [vmem:[%s5060_s7 + $0xe0] sm:$0xff]  ;;  %841 = vst [vmem:[%s5065_s8 + $0x60] sm:$0xff] %v840_v12  ;;  %843 = vst [vmem:[%s5065_s8 + $0x68] sm:$0xff] %v842_v13  ;;  %v846_v15 = vld [vmem:[%s5060_s7 + $0xf0] sm:$0xff] }
  0x1f   : > { %845 = vst [vmem:[%s5065_s8 + $0x70] sm:$0xff] %v844_v14  ;;  %v848_v16 = vld [vmem:[%s5060_s7 + $0x100] sm:$0xff]  ;;  %v850_v17 = vld [vmem:[%s5060_s7 + $0x110] sm:$0xff]  ;;  %847 = vst [vmem:[%s5065_s8 + $0x78] sm:$0xff] %v846_v15 }
  0x20   : > { %849 = vst [vmem:[%s5065_s8 + $0x80] sm:$0xff] %v848_v16  ;;  %851 = vst [vmem:[%s5065_s8 + $0x88] sm:$0xff] %v850_v17  ;;  %v852_v18 = vld [vmem:[%s5060_s7 + $0x120] sm:$0xff]  ;;  %v854_v19 = vld [vmem:[%s5060_s7 + $0x130] sm:$0xff] }
  0x21   : > { %v856_v20 = vld [vmem:[%s5060_s7 + $0x140] sm:$0xff]  ;;  %853 = vst [vmem:[%s5065_s8 + $0x90] sm:$0xff] %v852_v18  ;;  %855 = vst [vmem:[%s5065_s8 + $0x98] sm:$0xff] %v854_v19  ;;  %v858_v21 = vld [vmem:[%s5060_s7 + $0x150] sm:$0xff] }
  0x22   : > { %857 = vst [vmem:[%s5065_s8 + $0xa0] sm:$0xff] %v856_v20  ;;  %v860_v22 = vld [vmem:[%s5060_s7 + $0x160] sm:$0xff]  ;;  %v862_v23 = vld [vmem:[%s5060_s7 + $0x170] sm:$0xff]  ;;  %859 = vst [vmem:[%s5065_s8 + $0xa8] sm:$0xff] %v858_v21 }
  0x23   : > { %861 = vst [vmem:[%s5065_s8 + $0xb0] sm:$0xff] %v860_v22  ;;  %863 = vst [vmem:[%s5065_s8 + $0xb8] sm:$0xff] %v862_v23  ;;  %v864_v24 = vld [vmem:[%s5060_s7 + $0x180] sm:$0xff]  ;;  %v866_v25 = vld [vmem:[%s5060_s7 + $0x190] sm:$0xff] }
  0x24   : > { %v868_v26 = vld [vmem:[%s5060_s7 + $0x1a0] sm:$0xff]  ;;  %865 = vst [vmem:[%s5065_s8 + $0xc0] sm:$0xff] %v864_v24  ;;  %867 = vst [vmem:[%s5065_s8 + $0xc8] sm:$0xff] %v866_v25  ;;  %v870_v27 = vld [vmem:[%s5060_s7 + $0x1b0] sm:$0xff] }
  0x25   : > { %869 = vst [vmem:[%s5065_s8 + $0xd0] sm:$0xff] %v868_v26  ;;  %v872_v28 = vld [vmem:[%s5060_s7 + $0x1c0] sm:$0xff]  ;;  %v874_v29 = vld [vmem:[%s5060_s7 + $0x1d0] sm:$0xff]  ;;  %871 = vst [vmem:[%s5065_s8 + $0xd8] sm:$0xff] %v870_v27 }
  0x26   : > { %873 = vst [vmem:[%s5065_s8 + $0xe0] sm:$0xff] %v872_v28  ;;  %875 = vst [vmem:[%s5065_s8 + $0xe8] sm:$0xff] %v874_v29  ;;  %v876_v30 = vld [vmem:[%s5060_s7 + $0x1e0] sm:$0xff]  ;;  %v878_v31 = vld [vmem:[%s5060_s7 + $0x1f0] sm:$0xff] }
  0x27   : > { %v880_v32 = vld [vmem:[%s5060_s7 + $0x200] sm:$0xff]  ;;  %877 = vst [vmem:[%s5065_s8 + $0xf0] sm:$0xff] %v876_v30  ;;  %879 = vst [vmem:[%s5065_s8 + $0xf8] sm:$0xff] %v878_v31  ;;  %v882_v33 = vld [vmem:[%s5060_s7 + $0x210] sm:$0xff] }
  0x28   : > { %881 = vst [vmem:[%s5065_s8 + $0x100] sm:$0xff] %v880_v32  ;;  %v884_v34 = vld [vmem:[%s5060_s7 + $0x220] sm:$0xff]  ;;  %v886_v35 = vld [vmem:[%s5060_s7 + $0x230] sm:$0xff]  ;;  %883 = vst [vmem:[%s5065_s8 + $0x108] sm:$0xff] %v882_v33 }
  0x29   : > { %885 = vst [vmem:[%s5065_s8 + $0x110] sm:$0xff] %v884_v34  ;;  %887 = vst [vmem:[%s5065_s8 + $0x118] sm:$0xff] %v886_v35  ;;  %v888_v36 = vld [vmem:[%s5060_s7 + $0x240] sm:$0xff]  ;;  %v890_v37 = vld [vmem:[%s5060_s7 + $0x250] sm:$0xff] }
  0x2a   : > { %v892_v38 = vld [vmem:[%s5060_s7 + $0x260] sm:$0xff]  ;;  %889 = vst [vmem:[%s5065_s8 + $0x120] sm:$0xff] %v888_v36  ;;  %891 = vst [vmem:[%s5065_s8 + $0x128] sm:$0xff] %v890_v37  ;;  %v894_v39 = vld [vmem:[%s5060_s7 + $0x270] sm:$0xff] }
  0x2b   : > { %893 = vst [vmem:[%s5065_s8 + $0x130] sm:$0xff] %v892_v38  ;;  %v896_v40 = vld [vmem:[%s5060_s7 + $0x280] sm:$0xff]  ;;  %v898_v41 = vld [vmem:[%s5060_s7 + $0x290] sm:$0xff]  ;;  %895 = vst [vmem:[%s5065_s8 + $0x138] sm:$0xff] %v894_v39 }
  0x2c   : > { %897 = vst [vmem:[%s5065_s8 + $0x140] sm:$0xff] %v896_v40  ;;  %899 = vst [vmem:[%s5065_s8 + $0x148] sm:$0xff] %v898_v41  ;;  %v900_v42 = vld [vmem:[%s5060_s7 + $0x2a0] sm:$0xff]  ;;  %v902_v43 = vld [vmem:[%s5060_s7 + $0x2b0] sm:$0xff] }
  0x2d   : > { %v904_v44 = vld [vmem:[%s5060_s7 + $0x2c0] sm:$0xff]  ;;  %901 = vst [vmem:[%s5065_s8 + $0x150] sm:$0xff] %v900_v42  ;;  %903 = vst [vmem:[%s5065_s8 + $0x158] sm:$0xff] %v902_v43  ;;  %v906_v45 = vld [vmem:[%s5060_s7 + $0x2d0] sm:$0xff] }
  0x2e   : > { %905 = vst [vmem:[%s5065_s8 + $0x160] sm:$0xff] %v904_v44  ;;  %v908_v46 = vld [vmem:[%s5060_s7 + $0x2e0] sm:$0xff]  ;;  %v910_v47 = vld [vmem:[%s5060_s7 + $0x2f0] sm:$0xff]  ;;  %907 = vst [vmem:[%s5065_s8 + $0x168] sm:$0xff] %v906_v45 }
  0x2f   : > { %909 = vst [vmem:[%s5065_s8 + $0x170] sm:$0xff] %v908_v46  ;;  %911 = vst [vmem:[%s5065_s8 + $0x178] sm:$0xff] %v910_v47  ;;  %v912_v48 = vld [vmem:[%s5060_s7 + $0x300] sm:$0xff]  ;;  %v914_v49 = vld [vmem:[%s5060_s7 + $0x310] sm:$0xff] }
  0x30   : > { %v916_v50 = vld [vmem:[%s5060_s7 + $0x320] sm:$0xff]  ;;  %913 = vst [vmem:[%s5065_s8 + $0x180] sm:$0xff] %v912_v48  ;;  %915 = vst [vmem:[%s5065_s8 + $0x188] sm:$0xff] %v914_v49  ;;  %v918_v51 = vld [vmem:[%s5060_s7 + $0x330] sm:$0xff] }
  0x31   : > { %917 = vst [vmem:[%s5065_s8 + $0x190] sm:$0xff] %v916_v50  ;;  %v920_v52 = vld [vmem:[%s5060_s7 + $0x340] sm:$0xff]  ;;  %v922_v53 = vld [vmem:[%s5060_s7 + $0x350] sm:$0xff]  ;;  %919 = vst [vmem:[%s5065_s8 + $0x198] sm:$0xff] %v918_v51 }
  0x32   : > { %921 = vst [vmem:[%s5065_s8 + $0x1a0] sm:$0xff] %v920_v52  ;;  %923 = vst [vmem:[%s5065_s8 + $0x1a8] sm:$0xff] %v922_v53  ;;  %v924_v54 = vld [vmem:[%s5060_s7 + $0x360] sm:$0xff]  ;;  %v926_v55 = vld [vmem:[%s5060_s7 + $0x370] sm:$0xff] }
  0x33   : > { %v928_v56 = vld [vmem:[%s5060_s7 + $0x380] sm:$0xff]  ;;  %925 = vst [vmem:[%s5065_s8 + $0x1b0] sm:$0xff] %v924_v54  ;;  %927 = vst [vmem:[%s5065_s8 + $0x1b8] sm:$0xff] %v926_v55  ;;  %v930_v57 = vld [vmem:[%s5060_s7 + $0x390] sm:$0xff] }
  0x34   : > { %929 = vst [vmem:[%s5065_s8 + $0x1c0] sm:$0xff] %v928_v56  ;;  %v932_v58 = vld [vmem:[%s5060_s7 + $0x3a0] sm:$0xff]  ;;  %v934_v59 = vld [vmem:[%s5060_s7 + $0x3b0] sm:$0xff]  ;;  %931 = vst [vmem:[%s5065_s8 + $0x1c8] sm:$0xff] %v930_v57 }
  0x35   : > { %933 = vst [vmem:[%s5065_s8 + $0x1d0] sm:$0xff] %v932_v58  ;;  %935 = vst [vmem:[%s5065_s8 + $0x1d8] sm:$0xff] %v934_v59  ;;  %v936_v60 = vld [vmem:[%s5060_s7 + $0x3c0] sm:$0xff]  ;;  %v938_v61 = vld [vmem:[%s5060_s7 + $0x3d0] sm:$0xff] }
  0x36   : > { %v940_v62 = vld [vmem:[%s5060_s7 + $0x3e0] sm:$0xff]  ;;  %937 = vst [vmem:[%s5065_s8 + $0x1e0] sm:$0xff] %v936_v60  ;;  %939 = vst [vmem:[%s5065_s8 + $0x1e8] sm:$0xff] %v938_v61  ;;  %v942_v63 = vld [vmem:[%s5060_s7 + $0x3f0] sm:$0xff] }
  0x37   : > { %941 = vst [vmem:[%s5065_s8 + $0x1f0] sm:$0xff] %v940_v62  ;;  %v944_v0 = vld [vmem:[%s5060_s7 + $0x400] sm:$0xff]  ;;  %v946_v1 = vld [vmem:[%s5060_s7 + $0x410] sm:$0xff]  ;;  %943 = vst [vmem:[%s5065_s8 + $0x1f8] sm:$0xff] %v942_v63 }
  0x38   : > { %945 = vst [vmem:[%s5065_s8 + $0x200] sm:$0xff] %v944_v0  ;;  %947 = vst [vmem:[%s5065_s8 + $0x208] sm:$0xff] %v946_v1  ;;  %v948_v2 = vld [vmem:[%s5060_s7 + $0x420] sm:$0xff]  ;;  %v950_v3 = vld [vmem:[%s5060_s7 + $0x430] sm:$0xff] }
  0x39   : > { %v952_v4 = vld [vmem:[%s5060_s7 + $0x440] sm:$0xff]  ;;  %949 = vst [vmem:[%s5065_s8 + $0x210] sm:$0xff] %v948_v2  ;;  %951 = vst [vmem:[%s5065_s8 + $0x218] sm:$0xff] %v950_v3  ;;  %v954_v5 = vld [vmem:[%s5060_s7 + $0x450] sm:$0xff] }
  0x3a   : > { %953 = vst [vmem:[%s5065_s8 + $0x220] sm:$0xff] %v952_v4  ;;  %v956_v6 = vld [vmem:[%s5060_s7 + $0x460] sm:$0xff]  ;;  %v958_v7 = vld [vmem:[%s5060_s7 + $0x470] sm:$0xff]  ;;  %955 = vst [vmem:[%s5065_s8 + $0x228] sm:$0xff] %v954_v5 }
  0x3b   : > { %957 = vst [vmem:[%s5065_s8 + $0x230] sm:$0xff] %v956_v6  ;;  %959 = vst [vmem:[%s5065_s8 + $0x238] sm:$0xff] %v958_v7  ;;  %v960_v8 = vld [vmem:[%s5060_s7 + $0x480] sm:$0xff]  ;;  %v962_v9 = vld [vmem:[%s5060_s7 + $0x490] sm:$0xff] }
  0x3c   : > { %v964_v10 = vld [vmem:[%s5060_s7 + $0x4a0] sm:$0xff]  ;;  %961 = vst [vmem:[%s5065_s8 + $0x240] sm:$0xff] %v960_v8  ;;  %963 = vst [vmem:[%s5065_s8 + $0x248] sm:$0xff] %v962_v9  ;;  %v966_v11 = vld [vmem:[%s5060_s7 + $0x4b0] sm:$0xff] }
  0x3d   : > { %965 = vst [vmem:[%s5065_s8 + $0x250] sm:$0xff] %v964_v10  ;;  %v968_v12 = vld [vmem:[%s5060_s7 + $0x4c0] sm:$0xff]  ;;  %v970_v13 = vld [vmem:[%s5060_s7 + $0x4d0] sm:$0xff]  ;;  %967 = vst [vmem:[%s5065_s8 + $0x258] sm:$0xff] %v966_v11 }
  0x3e   : > { %969 = vst [vmem:[%s5065_s8 + $0x260] sm:$0xff] %v968_v12  ;;  %971 = vst [vmem:[%s5065_s8 + $0x268] sm:$0xff] %v970_v13  ;;  %v972_v14 = vld [vmem:[%s5060_s7 + $0x4e0] sm:$0xff]  ;;  %v974_v15 = vld [vmem:[%s5060_s7 + $0x4f0] sm:$0xff] }
  0x3f   : > { %v976_v16 = vld [vmem:[%s5060_s7 + $0x500] sm:$0xff]  ;;  %973 = vst [vmem:[%s5065_s8 + $0x270] sm:$0xff] %v972_v14  ;;  %975 = vst [vmem:[%s5065_s8 + $0x278] sm:$0xff] %v974_v15  ;;  %v978_v17 = vld [vmem:[%s5060_s7 + $0x510] sm:$0xff] }
  0x40   : > { %977 = vst [vmem:[%s5065_s8 + $0x280] sm:$0xff] %v976_v16  ;;  %v980_v18 = vld [vmem:[%s5060_s7 + $0x520] sm:$0xff]  ;;  %v982_v19 = vld [vmem:[%s5060_s7 + $0x530] sm:$0xff]  ;;  %979 = vst [vmem:[%s5065_s8 + $0x288] sm:$0xff] %v978_v17 }
  0x41   : > { %981 = vst [vmem:[%s5065_s8 + $0x290] sm:$0xff] %v980_v18  ;;  %983 = vst [vmem:[%s5065_s8 + $0x298] sm:$0xff] %v982_v19  ;;  %v984_v20 = vld [vmem:[%s5060_s7 + $0x540] sm:$0xff]  ;;  %v986_v21 = vld [vmem:[%s5060_s7 + $0x550] sm:$0xff] }
  0x42   : > { %v988_v22 = vld [vmem:[%s5060_s7 + $0x560] sm:$0xff]  ;;  %985 = vst [vmem:[%s5065_s8 + $0x2a0] sm:$0xff] %v984_v20  ;;  %987 = vst [vmem:[%s5065_s8 + $0x2a8] sm:$0xff] %v986_v21  ;;  %v990_v23 = vld [vmem:[%s5060_s7 + $0x570] sm:$0xff] }
  0x43   : > { %989 = vst [vmem:[%s5065_s8 + $0x2b0] sm:$0xff] %v988_v22  ;;  %v992_v24 = vld [vmem:[%s5060_s7 + $0x580] sm:$0xff]  ;;  %v994_v25 = vld [vmem:[%s5060_s7 + $0x590] sm:$0xff]  ;;  %991 = vst [vmem:[%s5065_s8 + $0x2b8] sm:$0xff] %v990_v23 }
  0x44   : > { %993 = vst [vmem:[%s5065_s8 + $0x2c0] sm:$0xff] %v992_v24  ;;  %995 = vst [vmem:[%s5065_s8 + $0x2c8] sm:$0xff] %v994_v25  ;;  %v996_v26 = vld [vmem:[%s5060_s7 + $0x5a0] sm:$0xff]  ;;  %v998_v27 = vld [vmem:[%s5060_s7 + $0x5b0] sm:$0xff] }
  0x45   : > { %v1000_v28 = vld [vmem:[%s5060_s7 + $0x5c0] sm:$0xff]  ;;  %997 = vst [vmem:[%s5065_s8 + $0x2d0] sm:$0xff] %v996_v26  ;;  %999 = vst [vmem:[%s5065_s8 + $0x2d8] sm:$0xff] %v998_v27  ;;  %v1002_v29 = vld [vmem:[%s5060_s7 + $0x5d0] sm:$0xff] }
  0x46   : > { %1001 = vst [vmem:[%s5065_s8 + $0x2e0] sm:$0xff] %v1000_v28  ;;  %v1004_v30 = vld [vmem:[%s5060_s7 + $0x5e0] sm:$0xff]  ;;  %v1006_v31 = vld [vmem:[%s5060_s7 + $0x5f0] sm:$0xff]  ;;  %1003 = vst [vmem:[%s5065_s8 + $0x2e8] sm:$0xff] %v1002_v29 }
  0x47   : > { %1005 = vst [vmem:[%s5065_s8 + $0x2f0] sm:$0xff] %v1004_v30  ;;  %1007 = vst [vmem:[%s5065_s8 + $0x2f8] sm:$0xff] %v1006_v31  ;;  %v1008_v32 = vld [vmem:[%s5060_s7 + $0x600] sm:$0xff]  ;;  %v1010_v33 = vld [vmem:[%s5060_s7 + $0x610] sm:$0xff] }
  0x48   : > { %v1012_v34 = vld [vmem:[%s5060_s7 + $0x620] sm:$0xff]  ;;  %1009 = vst [vmem:[%s5065_s8 + $0x300] sm:$0xff] %v1008_v32  ;;  %1011 = vst [vmem:[%s5065_s8 + $0x308] sm:$0xff] %v1010_v33  ;;  %v1014_v35 = vld [vmem:[%s5060_s7 + $0x630] sm:$0xff] }
  0x49   : > { %1013 = vst [vmem:[%s5065_s8 + $0x310] sm:$0xff] %v1012_v34  ;;  %v1016_v36 = vld [vmem:[%s5060_s7 + $0x640] sm:$0xff]  ;;  %v1018_v37 = vld [vmem:[%s5060_s7 + $0x650] sm:$0xff]  ;;  %1015 = vst [vmem:[%s5065_s8 + $0x318] sm:$0xff] %v1014_v35 }
  0x4a   : > { %1017 = vst [vmem:[%s5065_s8 + $0x320] sm:$0xff] %v1016_v36  ;;  %1019 = vst [vmem:[%s5065_s8 + $0x328] sm:$0xff] %v1018_v37  ;;  %v1020_v38 = vld [vmem:[%s5060_s7 + $0x660] sm:$0xff]  ;;  %v1022_v39 = vld [vmem:[%s5060_s7 + $0x670] sm:$0xff] }
  0x4b   : > { %v1024_v40 = vld [vmem:[%s5060_s7 + $0x680] sm:$0xff]  ;;  %1021 = vst [vmem:[%s5065_s8 + $0x330] sm:$0xff] %v1020_v38  ;;  %1023 = vst [vmem:[%s5065_s8 + $0x338] sm:$0xff] %v1022_v39  ;;  %v1026_v41 = vld [vmem:[%s5060_s7 + $0x690] sm:$0xff] }
  0x4c   : > { %1025 = vst [vmem:[%s5065_s8 + $0x340] sm:$0xff] %v1024_v40  ;;  %v1028_v42 = vld [vmem:[%s5060_s7 + $0x6a0] sm:$0xff]  ;;  %v1030_v43 = vld [vmem:[%s5060_s7 + $0x6b0] sm:$0xff]  ;;  %1027 = vst [vmem:[%s5065_s8 + $0x348] sm:$0xff] %v1026_v41 }
  0x4d   : > { %1029 = vst [vmem:[%s5065_s8 + $0x350] sm:$0xff] %v1028_v42  ;;  %1031 = vst [vmem:[%s5065_s8 + $0x358] sm:$0xff] %v1030_v43  ;;  %v1032_v44 = vld [vmem:[%s5060_s7 + $0x6c0] sm:$0xff]  ;;  %v1034_v45 = vld [vmem:[%s5060_s7 + $0x6d0] sm:$0xff] }
  0x4e   : > { %v1036_v46 = vld [vmem:[%s5060_s7 + $0x6e0] sm:$0xff]  ;;  %1033 = vst [vmem:[%s5065_s8 + $0x360] sm:$0xff] %v1032_v44  ;;  %1035 = vst [vmem:[%s5065_s8 + $0x368] sm:$0xff] %v1034_v45  ;;  %v1038_v47 = vld [vmem:[%s5060_s7 + $0x6f0] sm:$0xff] }
  0x4f   : > { %1037 = vst [vmem:[%s5065_s8 + $0x370] sm:$0xff] %v1036_v46  ;;  %v1040_v48 = vld [vmem:[%s5060_s7 + $0x700] sm:$0xff]  ;;  %v1042_v49 = vld [vmem:[%s5060_s7 + $0x710] sm:$0xff]  ;;  %1039 = vst [vmem:[%s5065_s8 + $0x378] sm:$0xff] %v1038_v47 }
  0x50   : > { %1041 = vst [vmem:[%s5065_s8 + $0x380] sm:$0xff] %v1040_v48  ;;  %1043 = vst [vmem:[%s5065_s8 + $0x388] sm:$0xff] %v1042_v49  ;;  %v1044_v50 = vld [vmem:[%s5060_s7 + $0x720] sm:$0xff]  ;;  %v1046_v51 = vld [vmem:[%s5060_s7 + $0x730] sm:$0xff] }
  0x51   : > { %v1048_v52 = vld [vmem:[%s5060_s7 + $0x740] sm:$0xff]  ;;  %1045 = vst [vmem:[%s5065_s8 + $0x390] sm:$0xff] %v1044_v50  ;;  %1047 = vst [vmem:[%s5065_s8 + $0x398] sm:$0xff] %v1046_v51  ;;  %v1050_v53 = vld [vmem:[%s5060_s7 + $0x750] sm:$0xff] }
  0x52   : > { %1049 = vst [vmem:[%s5065_s8 + $0x3a0] sm:$0xff] %v1048_v52  ;;  %v1052_v54 = vld [vmem:[%s5060_s7 + $0x760] sm:$0xff]  ;;  %v1054_v55 = vld [vmem:[%s5060_s7 + $0x770] sm:$0xff]  ;;  %1051 = vst [vmem:[%s5065_s8 + $0x3a8] sm:$0xff] %v1050_v53 }
  0x53   : > { %1053 = vst [vmem:[%s5065_s8 + $0x3b0] sm:$0xff] %v1052_v54  ;;  %1055 = vst [vmem:[%s5065_s8 + $0x3b8] sm:$0xff] %v1054_v55  ;;  %v1056_v56 = vld [vmem:[%s5060_s7 + $0x780] sm:$0xff]  ;;  %v1058_v57 = vld [vmem:[%s5060_s7 + $0x790] sm:$0xff] }
  0x54   : > { %v1060_v58 = vld [vmem:[%s5060_s7 + $0x7a0] sm:$0xff]  ;;  %1057 = vst [vmem:[%s5065_s8 + $0x3c0] sm:$0xff] %v1056_v56  ;;  %1059 = vst [vmem:[%s5065_s8 + $0x3c8] sm:$0xff] %v1058_v57  ;;  %v1062_v59 = vld [vmem:[%s5060_s7 + $0x7b0] sm:$0xff] }
  0x55   : > { %1061 = vst [vmem:[%s5065_s8 + $0x3d0] sm:$0xff] %v1060_v58  ;;  %v1064_v60 = vld [vmem:[%s5060_s7 + $0x7c0] sm:$0xff]  ;;  %v1066_v61 = vld [vmem:[%s5060_s7 + $0x7d0] sm:$0xff]  ;;  %1063 = vst [vmem:[%s5065_s8 + $0x3d8] sm:$0xff] %v1062_v59 }
  0x56   : > { %1065 = vst [vmem:[%s5065_s8 + $0x3e0] sm:$0xff] %v1064_v60  ;;  %1067 = vst [vmem:[%s5065_s8 + $0x3e8] sm:$0xff] %v1066_v61  ;;  %v1068_v62 = vld [vmem:[%s5060_s7 + $0x7e0] sm:$0xff]  ;;  %v1070_v63 = vld [vmem:[%s5060_s7 + $0x7f0] sm:$0xff] }
  0x57   : > { %v1072_v0 = vld [vmem:[%s5060_s7 + $0x800] sm:$0xff]  ;;  %1069 = vst [vmem:[%s5065_s8 + $0x3f0] sm:$0xff] %v1068_v62  ;;  %1071 = vst [vmem:[%s5065_s8 + $0x3f8] sm:$0xff] %v1070_v63  ;;  %v1074_v1 = vld [vmem:[%s5060_s7 + $0x810] sm:$0xff] }
  0x58   : > { %1073 = vst [vmem:[%s5065_s8 + $0x400] sm:$0xff] %v1072_v0  ;;  %v1076_v2 = vld [vmem:[%s5060_s7 + $0x820] sm:$0xff]  ;;  %v1078_v3 = vld [vmem:[%s5060_s7 + $0x830] sm:$0xff]  ;;  %1075 = vst [vmem:[%s5065_s8 + $0x408] sm:$0xff] %v1074_v1 }
  0x59   : > { %1077 = vst [vmem:[%s5065_s8 + $0x410] sm:$0xff] %v1076_v2  ;;  %1079 = vst [vmem:[%s5065_s8 + $0x418] sm:$0xff] %v1078_v3  ;;  %v1080_v4 = vld [vmem:[%s5060_s7 + $0x840] sm:$0xff]  ;;  %v1082_v5 = vld [vmem:[%s5060_s7 + $0x850] sm:$0xff] }
  0x5a   : > { %v1084_v6 = vld [vmem:[%s5060_s7 + $0x860] sm:$0xff]  ;;  %1081 = vst [vmem:[%s5065_s8 + $0x420] sm:$0xff] %v1080_v4  ;;  %1083 = vst [vmem:[%s5065_s8 + $0x428] sm:$0xff] %v1082_v5  ;;  %v1086_v7 = vld [vmem:[%s5060_s7 + $0x870] sm:$0xff] }
  0x5b   : > { %1085 = vst [vmem:[%s5065_s8 + $0x430] sm:$0xff] %v1084_v6  ;;  %v1088_v8 = vld [vmem:[%s5060_s7 + $0x880] sm:$0xff]  ;;  %v1090_v9 = vld [vmem:[%s5060_s7 + $0x890] sm:$0xff]  ;;  %1087 = vst [vmem:[%s5065_s8 + $0x438] sm:$0xff] %v1086_v7 }
  0x5c   : > { %1089 = vst [vmem:[%s5065_s8 + $0x440] sm:$0xff] %v1088_v8  ;;  %1091 = vst [vmem:[%s5065_s8 + $0x448] sm:$0xff] %v1090_v9  ;;  %v1092_v10 = vld [vmem:[%s5060_s7 + $0x8a0] sm:$0xff]  ;;  %v1094_v11 = vld [vmem:[%s5060_s7 + $0x8b0] sm:$0xff] }
  0x5d   : > { %v1096_v12 = vld [vmem:[%s5060_s7 + $0x8c0] sm:$0xff]  ;;  %1093 = vst [vmem:[%s5065_s8 + $0x450] sm:$0xff] %v1092_v10  ;;  %1095 = vst [vmem:[%s5065_s8 + $0x458] sm:$0xff] %v1094_v11  ;;  %v1098_v13 = vld [vmem:[%s5060_s7 + $0x8d0] sm:$0xff] }
  0x5e   : > { %1097 = vst [vmem:[%s5065_s8 + $0x460] sm:$0xff] %v1096_v12  ;;  %v1100_v14 = vld [vmem:[%s5060_s7 + $0x8e0] sm:$0xff]  ;;  %v1102_v15 = vld [vmem:[%s5060_s7 + $0x8f0] sm:$0xff]  ;;  %1099 = vst [vmem:[%s5065_s8 + $0x468] sm:$0xff] %v1098_v13 }
  0x5f   : > { %1101 = vst [vmem:[%s5065_s8 + $0x470] sm:$0xff] %v1100_v14  ;;  %1103 = vst [vmem:[%s5065_s8 + $0x478] sm:$0xff] %v1102_v15  ;;  %v1104_v16 = vld [vmem:[%s5060_s7 + $0x900] sm:$0xff]  ;;  %v1106_v17 = vld [vmem:[%s5060_s7 + $0x910] sm:$0xff] }
  0x60   : > { %v1108_v18 = vld [vmem:[%s5060_s7 + $0x920] sm:$0xff]  ;;  %1105 = vst [vmem:[%s5065_s8 + $0x480] sm:$0xff] %v1104_v16  ;;  %1107 = vst [vmem:[%s5065_s8 + $0x488] sm:$0xff] %v1106_v17  ;;  %v1110_v19 = vld [vmem:[%s5060_s7 + $0x930] sm:$0xff] }
  0x61   : > { %1109 = vst [vmem:[%s5065_s8 + $0x490] sm:$0xff] %v1108_v18  ;;  %v1112_v20 = vld [vmem:[%s5060_s7 + $0x940] sm:$0xff]  ;;  %v1114_v21 = vld [vmem:[%s5060_s7 + $0x950] sm:$0xff]  ;;  %1111 = vst [vmem:[%s5065_s8 + $0x498] sm:$0xff] %v1110_v19 }
  0x62   : > { %1113 = vst [vmem:[%s5065_s8 + $0x4a0] sm:$0xff] %v1112_v20  ;;  %1115 = vst [vmem:[%s5065_s8 + $0x4a8] sm:$0xff] %v1114_v21  ;;  %v1116_v22 = vld [vmem:[%s5060_s7 + $0x960] sm:$0xff]  ;;  %v1118_v23 = vld [vmem:[%s5060_s7 + $0x970] sm:$0xff] }
  0x63   : > { %v1120_v24 = vld [vmem:[%s5060_s7 + $0x980] sm:$0xff]  ;;  %1117 = vst [vmem:[%s5065_s8 + $0x4b0] sm:$0xff] %v1116_v22  ;;  %1119 = vst [vmem:[%s5065_s8 + $0x4b8] sm:$0xff] %v1118_v23  ;;  %v1122_v25 = vld [vmem:[%s5060_s7 + $0x990] sm:$0xff] }
  0x64   : > { %1121 = vst [vmem:[%s5065_s8 + $0x4c0] sm:$0xff] %v1120_v24  ;;  %v1124_v26 = vld [vmem:[%s5060_s7 + $0x9a0] sm:$0xff]  ;;  %v1126_v27 = vld [vmem:[%s5060_s7 + $0x9b0] sm:$0xff]  ;;  %1123 = vst [vmem:[%s5065_s8 + $0x4c8] sm:$0xff] %v1122_v25 }
  0x65   : > { %1125 = vst [vmem:[%s5065_s8 + $0x4d0] sm:$0xff] %v1124_v26  ;;  %1127 = vst [vmem:[%s5065_s8 + $0x4d8] sm:$0xff] %v1126_v27  ;;  %v1128_v28 = vld [vmem:[%s5060_s7 + $0x9c0] sm:$0xff]  ;;  %v1130_v29 = vld [vmem:[%s5060_s7 + $0x9d0] sm:$0xff] }
  0x66   : > { %v1132_v30 = vld [vmem:[%s5060_s7 + $0x9e0] sm:$0xff]  ;;  %1129 = vst [vmem:[%s5065_s8 + $0x4e0] sm:$0xff] %v1128_v28  ;;  %1131 = vst [vmem:[%s5065_s8 + $0x4e8] sm:$0xff] %v1130_v29  ;;  %v1134_v31 = vld [vmem:[%s5060_s7 + $0x9f0] sm:$0xff] }
  0x67   : > { %1133 = vst [vmem:[%s5065_s8 + $0x4f0] sm:$0xff] %v1132_v30  ;;  %v1136_v32 = vld [vmem:[%s5060_s7 + $0xa00] sm:$0xff]  ;;  %v1138_v33 = vld [vmem:[%s5060_s7 + $0xa10] sm:$0xff]  ;;  %1135 = vst [vmem:[%s5065_s8 + $0x4f8] sm:$0xff] %v1134_v31 }
  0x68   : > { %1137 = vst [vmem:[%s5065_s8 + $0x500] sm:$0xff] %v1136_v32  ;;  %1139 = vst [vmem:[%s5065_s8 + $0x508] sm:$0xff] %v1138_v33  ;;  %v1140_v34 = vld [vmem:[%s5060_s7 + $0xa20] sm:$0xff]  ;;  %v1142_v35 = vld [vmem:[%s5060_s7 + $0xa30] sm:$0xff] }
  0x69   : > { %v1144_v36 = vld [vmem:[%s5060_s7 + $0xa40] sm:$0xff]  ;;  %1141 = vst [vmem:[%s5065_s8 + $0x510] sm:$0xff] %v1140_v34  ;;  %1143 = vst [vmem:[%s5065_s8 + $0x518] sm:$0xff] %v1142_v35  ;;  %v1146_v37 = vld [vmem:[%s5060_s7 + $0xa50] sm:$0xff] }
  0x6a   : > { %1145 = vst [vmem:[%s5065_s8 + $0x520] sm:$0xff] %v1144_v36  ;;  %v1148_v38 = vld [vmem:[%s5060_s7 + $0xa60] sm:$0xff]  ;;  %v1150_v39 = vld [vmem:[%s5060_s7 + $0xa70] sm:$0xff]  ;;  %1147 = vst [vmem:[%s5065_s8 + $0x528] sm:$0xff] %v1146_v37 }
  0x6b   : > { %1149 = vst [vmem:[%s5065_s8 + $0x530] sm:$0xff] %v1148_v38  ;;  %1151 = vst [vmem:[%s5065_s8 + $0x538] sm:$0xff] %v1150_v39  ;;  %v1152_v40 = vld [vmem:[%s5060_s7 + $0xa80] sm:$0xff]  ;;  %v1154_v41 = vld [vmem:[%s5060_s7 + $0xa90] sm:$0xff] }
  0x6c   : > { %v1156_v42 = vld [vmem:[%s5060_s7 + $0xaa0] sm:$0xff]  ;;  %1153 = vst [vmem:[%s5065_s8 + $0x540] sm:$0xff] %v1152_v40  ;;  %1155 = vst [vmem:[%s5065_s8 + $0x548] sm:$0xff] %v1154_v41  ;;  %v1158_v43 = vld [vmem:[%s5060_s7 + $0xab0] sm:$0xff] }
  0x6d   : > { %1157 = vst [vmem:[%s5065_s8 + $0x550] sm:$0xff] %v1156_v42  ;;  %v1160_v44 = vld [vmem:[%s5060_s7 + $0xac0] sm:$0xff]  ;;  %v1162_v45 = vld [vmem:[%s5060_s7 + $0xad0] sm:$0xff]  ;;  %1159 = vst [vmem:[%s5065_s8 + $0x558] sm:$0xff] %v1158_v43 }
  0x6e   : > { %1161 = vst [vmem:[%s5065_s8 + $0x560] sm:$0xff] %v1160_v44  ;;  %1163 = vst [vmem:[%s5065_s8 + $0x568] sm:$0xff] %v1162_v45  ;;  %v1164_v46 = vld [vmem:[%s5060_s7 + $0xae0] sm:$0xff]  ;;  %v1166_v47 = vld [vmem:[%s5060_s7 + $0xaf0] sm:$0xff] }
  0x6f   : > { %v1168_v48 = vld [vmem:[%s5060_s7 + $0xb00] sm:$0xff]  ;;  %1165 = vst [vmem:[%s5065_s8 + $0x570] sm:$0xff] %v1164_v46  ;;  %1167 = vst [vmem:[%s5065_s8 + $0x578] sm:$0xff] %v1166_v47  ;;  %v1170_v49 = vld [vmem:[%s5060_s7 + $0xb10] sm:$0xff] }
  0x70   : > { %1169 = vst [vmem:[%s5065_s8 + $0x580] sm:$0xff] %v1168_v48  ;;  %v1172_v50 = vld [vmem:[%s5060_s7 + $0xb20] sm:$0xff]  ;;  %v1174_v51 = vld [vmem:[%s5060_s7 + $0xb30] sm:$0xff]  ;;  %1171 = vst [vmem:[%s5065_s8 + $0x588] sm:$0xff] %v1170_v49 }
  0x71   : > { %1173 = vst [vmem:[%s5065_s8 + $0x590] sm:$0xff] %v1172_v50  ;;  %1175 = vst [vmem:[%s5065_s8 + $0x598] sm:$0xff] %v1174_v51  ;;  %v1176_v52 = vld [vmem:[%s5060_s7 + $0xb40] sm:$0xff]  ;;  %v1178_v53 = vld [vmem:[%s5060_s7 + $0xb50] sm:$0xff] }
  0x72   : > { %v1180_v54 = vld [vmem:[%s5060_s7 + $0xb60] sm:$0xff]  ;;  %1177 = vst [vmem:[%s5065_s8 + $0x5a0] sm:$0xff] %v1176_v52  ;;  %1179 = vst [vmem:[%s5065_s8 + $0x5a8] sm:$0xff] %v1178_v53  ;;  %v1182_v55 = vld [vmem:[%s5060_s7 + $0xb70] sm:$0xff] }
  0x73   : > { %1181 = vst [vmem:[%s5065_s8 + $0x5b0] sm:$0xff] %v1180_v54  ;;  %v1184_v56 = vld [vmem:[%s5060_s7 + $0xb80] sm:$0xff]  ;;  %v1186_v57 = vld [vmem:[%s5060_s7 + $0xb90] sm:$0xff]  ;;  %1183 = vst [vmem:[%s5065_s8 + $0x5b8] sm:$0xff] %v1182_v55 }
  0x74   : > { %1185 = vst [vmem:[%s5065_s8 + $0x5c0] sm:$0xff] %v1184_v56  ;;  %1187 = vst [vmem:[%s5065_s8 + $0x5c8] sm:$0xff] %v1186_v57  ;;  %v1188_v58 = vld [vmem:[%s5060_s7 + $0xba0] sm:$0xff]  ;;  %v1190_v59 = vld [vmem:[%s5060_s7 + $0xbb0] sm:$0xff] }
  0x75   : > { %v1192_v60 = vld [vmem:[%s5060_s7 + $0xbc0] sm:$0xff]  ;;  %1189 = vst [vmem:[%s5065_s8 + $0x5d0] sm:$0xff] %v1188_v58  ;;  %1191 = vst [vmem:[%s5065_s8 + $0x5d8] sm:$0xff] %v1190_v59  ;;  %v1194_v61 = vld [vmem:[%s5060_s7 + $0xbd0] sm:$0xff] }
  0x76   : > { %1193 = vst [vmem:[%s5065_s8 + $0x5e0] sm:$0xff] %v1192_v60  ;;  %v1196_v62 = vld [vmem:[%s5060_s7 + $0xbe0] sm:$0xff]  ;;  %v1198_v63 = vld [vmem:[%s5060_s7 + $0xbf0] sm:$0xff]  ;;  %1195 = vst [vmem:[%s5065_s8 + $0x5e8] sm:$0xff] %v1194_v61 }
  0x77   : > { %1197 = vst [vmem:[%s5065_s8 + $0x5f0] sm:$0xff] %v1196_v62  ;;  %1199 = vst [vmem:[%s5065_s8 + $0x5f8] sm:$0xff] %v1198_v63  ;;  %v1200_v0 = vld [vmem:[%s5060_s7 + $0xc00] sm:$0xff]  ;;  %v1202_v1 = vld [vmem:[%s5060_s7 + $0xc10] sm:$0xff] }
  0x78   : > { %v1204_v2 = vld [vmem:[%s5060_s7 + $0xc20] sm:$0xff]  ;;  %1201 = vst [vmem:[%s5065_s8 + $0x600] sm:$0xff] %v1200_v0  ;;  %1203 = vst [vmem:[%s5065_s8 + $0x608] sm:$0xff] %v1202_v1  ;;  %v1206_v3 = vld [vmem:[%s5060_s7 + $0xc30] sm:$0xff] }
  0x79   : > { %1205 = vst [vmem:[%s5065_s8 + $0x610] sm:$0xff] %v1204_v2  ;;  %v1208_v4 = vld [vmem:[%s5060_s7 + $0xc40] sm:$0xff]  ;;  %v1210_v5 = vld [vmem:[%s5060_s7 + $0xc50] sm:$0xff]  ;;  %1207 = vst [vmem:[%s5065_s8 + $0x618] sm:$0xff] %v1206_v3 }
  0x7a   : > { %1209 = vst [vmem:[%s5065_s8 + $0x620] sm:$0xff] %v1208_v4  ;;  %1211 = vst [vmem:[%s5065_s8 + $0x628] sm:$0xff] %v1210_v5  ;;  %v1212_v6 = vld [vmem:[%s5060_s7 + $0xc60] sm:$0xff]  ;;  %v1214_v7 = vld [vmem:[%s5060_s7 + $0xc70] sm:$0xff] }
  0x7b   : > { %v1216_v8 = vld [vmem:[%s5060_s7 + $0xc80] sm:$0xff]  ;;  %1213 = vst [vmem:[%s5065_s8 + $0x630] sm:$0xff] %v1212_v6  ;;  %1215 = vst [vmem:[%s5065_s8 + $0x638] sm:$0xff] %v1214_v7  ;;  %v1218_v9 = vld [vmem:[%s5060_s7 + $0xc90] sm:$0xff] }
  0x7c   : > { %1217 = vst [vmem:[%s5065_s8 + $0x640] sm:$0xff] %v1216_v8  ;;  %v1220_v10 = vld [vmem:[%s5060_s7 + $0xca0] sm:$0xff]  ;;  %v1222_v11 = vld [vmem:[%s5060_s7 + $0xcb0] sm:$0xff]  ;;  %1219 = vst [vmem:[%s5065_s8 + $0x648] sm:$0xff] %v1218_v9 }
  0x7d   : > { %1221 = vst [vmem:[%s5065_s8 + $0x650] sm:$0xff] %v1220_v10  ;;  %1223 = vst [vmem:[%s5065_s8 + $0x658] sm:$0xff] %v1222_v11  ;;  %v1224_v12 = vld [vmem:[%s5060_s7 + $0xcc0] sm:$0xff]  ;;  %v1226_v13 = vld [vmem:[%s5060_s7 + $0xcd0] sm:$0xff] }
  0x7e   : > { %v1228_v14 = vld [vmem:[%s5060_s7 + $0xce0] sm:$0xff]  ;;  %1225 = vst [vmem:[%s5065_s8 + $0x660] sm:$0xff] %v1224_v12  ;;  %1227 = vst [vmem:[%s5065_s8 + $0x668] sm:$0xff] %v1226_v13  ;;  %v1230_v15 = vld [vmem:[%s5060_s7 + $0xcf0] sm:$0xff] }
  0x7f   : > { %1229 = vst [vmem:[%s5065_s8 + $0x670] sm:$0xff] %v1228_v14  ;;  %v1232_v16 = vld [vmem:[%s5060_s7 + $0xd00] sm:$0xff]  ;;  %v1234_v17 = vld [vmem:[%s5060_s7 + $0xd10] sm:$0xff]  ;;  %1231 = vst [vmem:[%s5065_s8 + $0x678] sm:$0xff] %v1230_v15 }
  0x80   : > { %1233 = vst [vmem:[%s5065_s8 + $0x680] sm:$0xff] %v1232_v16  ;;  %1235 = vst [vmem:[%s5065_s8 + $0x688] sm:$0xff] %v1234_v17  ;;  %v1236_v18 = vld [vmem:[%s5060_s7 + $0xd20] sm:$0xff]  ;;  %v1238_v19 = vld [vmem:[%s5060_s7 + $0xd30] sm:$0xff] }
  0x81   : > { %v1240_v20 = vld [vmem:[%s5060_s7 + $0xd40] sm:$0xff]  ;;  %1237 = vst [vmem:[%s5065_s8 + $0x690] sm:$0xff] %v1236_v18  ;;  %1239 = vst [vmem:[%s5065_s8 + $0x698] sm:$0xff] %v1238_v19  ;;  %v1242_v21 = vld [vmem:[%s5060_s7 + $0xd50] sm:$0xff] }
  0x82   : > { %1241 = vst [vmem:[%s5065_s8 + $0x6a0] sm:$0xff] %v1240_v20  ;;  %v1244_v22 = vld [vmem:[%s5060_s7 + $0xd60] sm:$0xff]  ;;  %v1246_v23 = vld [vmem:[%s5060_s7 + $0xd70] sm:$0xff]  ;;  %1243 = vst [vmem:[%s5065_s8 + $0x6a8] sm:$0xff] %v1242_v21 }
  0x83   : > { %1245 = vst [vmem:[%s5065_s8 + $0x6b0] sm:$0xff] %v1244_v22  ;;  %1247 = vst [vmem:[%s5065_s8 + $0x6b8] sm:$0xff] %v1246_v23  ;;  %v1248_v24 = vld [vmem:[%s5060_s7 + $0xd80] sm:$0xff]  ;;  %v1250_v25 = vld [vmem:[%s5060_s7 + $0xd90] sm:$0xff] }
  0x84   : > { %v1252_v26 = vld [vmem:[%s5060_s7 + $0xda0] sm:$0xff]  ;;  %1249 = vst [vmem:[%s5065_s8 + $0x6c0] sm:$0xff] %v1248_v24  ;;  %1251 = vst [vmem:[%s5065_s8 + $0x6c8] sm:$0xff] %v1250_v25  ;;  %v1254_v27 = vld [vmem:[%s5060_s7 + $0xdb0] sm:$0xff] }
  0x85   : > { %1253 = vst [vmem:[%s5065_s8 + $0x6d0] sm:$0xff] %v1252_v26  ;;  %v1256_v28 = vld [vmem:[%s5060_s7 + $0xdc0] sm:$0xff]  ;;  %v1258_v29 = vld [vmem:[%s5060_s7 + $0xdd0] sm:$0xff]  ;;  %1255 = vst [vmem:[%s5065_s8 + $0x6d8] sm:$0xff] %v1254_v27 }
  0x86   : > { %1257 = vst [vmem:[%s5065_s8 + $0x6e0] sm:$0xff] %v1256_v28  ;;  %1259 = vst [vmem:[%s5065_s8 + $0x6e8] sm:$0xff] %v1258_v29  ;;  %v1260_v30 = vld [vmem:[%s5060_s7 + $0xde0] sm:$0xff]  ;;  %v1262_v31 = vld [vmem:[%s5060_s7 + $0xdf0] sm:$0xff] }
  0x87   : > { %v1264_v32 = vld [vmem:[%s5060_s7 + $0xe00] sm:$0xff]  ;;  %1261 = vst [vmem:[%s5065_s8 + $0x6f0] sm:$0xff] %v1260_v30  ;;  %1263 = vst [vmem:[%s5065_s8 + $0x6f8] sm:$0xff] %v1262_v31  ;;  %v1266_v33 = vld [vmem:[%s5060_s7 + $0xe10] sm:$0xff] }
  0x88   : > { %1265 = vst [vmem:[%s5065_s8 + $0x700] sm:$0xff] %v1264_v32  ;;  %v1268_v34 = vld [vmem:[%s5060_s7 + $0xe20] sm:$0xff]  ;;  %v1270_v35 = vld [vmem:[%s5060_s7 + $0xe30] sm:$0xff]  ;;  %1267 = vst [vmem:[%s5065_s8 + $0x708] sm:$0xff] %v1266_v33 }
  0x89   : > { %1269 = vst [vmem:[%s5065_s8 + $0x710] sm:$0xff] %v1268_v34  ;;  %1271 = vst [vmem:[%s5065_s8 + $0x718] sm:$0xff] %v1270_v35  ;;  %v1272_v36 = vld [vmem:[%s5060_s7 + $0xe40] sm:$0xff]  ;;  %v1274_v37 = vld [vmem:[%s5060_s7 + $0xe50] sm:$0xff] }
  0x8a   : > { %v1276_v38 = vld [vmem:[%s5060_s7 + $0xe60] sm:$0xff]  ;;  %1273 = vst [vmem:[%s5065_s8 + $0x720] sm:$0xff] %v1272_v36  ;;  %1275 = vst [vmem:[%s5065_s8 + $0x728] sm:$0xff] %v1274_v37  ;;  %v1278_v39 = vld [vmem:[%s5060_s7 + $0xe70] sm:$0xff] }
  0x8b   : > { %1277 = vst [vmem:[%s5065_s8 + $0x730] sm:$0xff] %v1276_v38  ;;  %v1280_v40 = vld [vmem:[%s5060_s7 + $0xe80] sm:$0xff]  ;;  %v1282_v41 = vld [vmem:[%s5060_s7 + $0xe90] sm:$0xff]  ;;  %1279 = vst [vmem:[%s5065_s8 + $0x738] sm:$0xff] %v1278_v39 }
  0x8c   : > { %1281 = vst [vmem:[%s5065_s8 + $0x740] sm:$0xff] %v1280_v40  ;;  %1283 = vst [vmem:[%s5065_s8 + $0x748] sm:$0xff] %v1282_v41  ;;  %v1284_v42 = vld [vmem:[%s5060_s7 + $0xea0] sm:$0xff]  ;;  %v1286_v43 = vld [vmem:[%s5060_s7 + $0xeb0] sm:$0xff] }
  0x8d   : > { %v1288_v44 = vld [vmem:[%s5060_s7 + $0xec0] sm:$0xff]  ;;  %1285 = vst [vmem:[%s5065_s8 + $0x750] sm:$0xff] %v1284_v42  ;;  %1287 = vst [vmem:[%s5065_s8 + $0x758] sm:$0xff] %v1286_v43  ;;  %v1290_v45 = vld [vmem:[%s5060_s7 + $0xed0] sm:$0xff] }
  0x8e   : > { %1289 = vst [vmem:[%s5065_s8 + $0x760] sm:$0xff] %v1288_v44  ;;  %v1292_v46 = vld [vmem:[%s5060_s7 + $0xee0] sm:$0xff]  ;;  %v1294_v47 = vld [vmem:[%s5060_s7 + $0xef0] sm:$0xff]  ;;  %1291 = vst [vmem:[%s5065_s8 + $0x768] sm:$0xff] %v1290_v45 }
  0x8f   : > { %1293 = vst [vmem:[%s5065_s8 + $0x770] sm:$0xff] %v1292_v46  ;;  %1295 = vst [vmem:[%s5065_s8 + $0x778] sm:$0xff] %v1294_v47  ;;  %v1296_v48 = vld [vmem:[%s5060_s7 + $0xf00] sm:$0xff]  ;;  %v1298_v49 = vld [vmem:[%s5060_s7 + $0xf10] sm:$0xff] }
  0x90   : > { %v1300_v50 = vld [vmem:[%s5060_s7 + $0xf20] sm:$0xff]  ;;  %1297 = vst [vmem:[%s5065_s8 + $0x780] sm:$0xff] %v1296_v48  ;;  %1299 = vst [vmem:[%s5065_s8 + $0x788] sm:$0xff] %v1298_v49  ;;  %v1302_v51 = vld [vmem:[%s5060_s7 + $0xf30] sm:$0xff] }
  0x91   : > { %1301 = vst [vmem:[%s5065_s8 + $0x790] sm:$0xff] %v1300_v50  ;;  %v1304_v52 = vld [vmem:[%s5060_s7 + $0xf40] sm:$0xff]  ;;  %v1306_v53 = vld [vmem:[%s5060_s7 + $0xf50] sm:$0xff]  ;;  %1303 = vst [vmem:[%s5065_s8 + $0x798] sm:$0xff] %v1302_v51 }
  0x92   : > { %1305 = vst [vmem:[%s5065_s8 + $0x7a0] sm:$0xff] %v1304_v52  ;;  %1307 = vst [vmem:[%s5065_s8 + $0x7a8] sm:$0xff] %v1306_v53  ;;  %v1308_v54 = vld [vmem:[%s5060_s7 + $0xf60] sm:$0xff]  ;;  %v1310_v55 = vld [vmem:[%s5060_s7 + $0xf70] sm:$0xff] }
  0x93   : > { %v1312_v56 = vld [vmem:[%s5060_s7 + $0xf80] sm:$0xff]  ;;  %1309 = vst [vmem:[%s5065_s8 + $0x7b0] sm:$0xff] %v1308_v54  ;;  %1311 = vst [vmem:[%s5065_s8 + $0x7b8] sm:$0xff] %v1310_v55  ;;  %v1314_v57 = vld [vmem:[%s5060_s7 + $0xf90] sm:$0xff] }
  0x94   : > { %1313 = vst [vmem:[%s5065_s8 + $0x7c0] sm:$0xff] %v1312_v56  ;;  %v1316_v58 = vld [vmem:[%s5060_s7 + $0xfa0] sm:$0xff]  ;;  %v1318_v59 = vld [vmem:[%s5060_s7 + $0xfb0] sm:$0xff]  ;;  %1315 = vst [vmem:[%s5065_s8 + $0x7c8] sm:$0xff] %v1314_v57 }
  0x95   : > { %1317 = vst [vmem:[%s5065_s8 + $0x7d0] sm:$0xff] %v1316_v58  ;;  %1319 = vst [vmem:[%s5065_s8 + $0x7d8] sm:$0xff] %v1318_v59  ;;  %v1320_v60 = vld [vmem:[%s5060_s7 + $0xfc0] sm:$0xff]  ;;  %v1322_v61 = vld [vmem:[%s5060_s7 + $0xfd0] sm:$0xff] }
  0x96   : > { %v1324_v62 = vld [vmem:[%s5060_s7 + $0xfe0] sm:$0xff]  ;;  %1321 = vst [vmem:[%s5065_s8 + $0x7e0] sm:$0xff] %v1320_v60  ;;  %1323 = vst [vmem:[%s5065_s8 + $0x7e8] sm:$0xff] %v1322_v61  ;;  %v1326_v63 = vld [vmem:[%s5060_s7 + $0xff0] sm:$0xff] }
  0x97   : > { %1325 = vst [vmem:[%s5065_s8 + $0x7f0] sm:$0xff] %v1324_v62  ;;  %v1328_v0 = vld [vmem:[%s5060_s7 + $0x1000] sm:$0xff]  ;;  %v1330_v1 = vld [vmem:[%s5060_s7 + $0x1010] sm:$0xff]  ;;  %1327 = vst [vmem:[%s5065_s8 + $0x7f8] sm:$0xff] %v1326_v63 }
  0x98   : > { %1329 = vst [vmem:[%s5065_s8 + $0x800] sm:$0xff] %v1328_v0  ;;  %1331 = vst [vmem:[%s5065_s8 + $0x808] sm:$0xff] %v1330_v1  ;;  %v1332_v2 = vld [vmem:[%s5060_s7 + $0x1020] sm:$0xff]  ;;  %v1334_v3 = vld [vmem:[%s5060_s7 + $0x1030] sm:$0xff] }
  0x99   : > { %v1336_v4 = vld [vmem:[%s5060_s7 + $0x1040] sm:$0xff]  ;;  %1333 = vst [vmem:[%s5065_s8 + $0x810] sm:$0xff] %v1332_v2  ;;  %1335 = vst [vmem:[%s5065_s8 + $0x818] sm:$0xff] %v1334_v3  ;;  %v1338_v5 = vld [vmem:[%s5060_s7 + $0x1050] sm:$0xff] }
  0x9a   : > { %1337 = vst [vmem:[%s5065_s8 + $0x820] sm:$0xff] %v1336_v4  ;;  %v1340_v6 = vld [vmem:[%s5060_s7 + $0x1060] sm:$0xff]  ;;  %v1342_v7 = vld [vmem:[%s5060_s7 + $0x1070] sm:$0xff]  ;;  %1339 = vst [vmem:[%s5065_s8 + $0x828] sm:$0xff] %v1338_v5 }
  0x9b   : > { %1341 = vst [vmem:[%s5065_s8 + $0x830] sm:$0xff] %v1340_v6  ;;  %1343 = vst [vmem:[%s5065_s8 + $0x838] sm:$0xff] %v1342_v7  ;;  %v1344_v8 = vld [vmem:[%s5060_s7 + $0x1080] sm:$0xff]  ;;  %v1346_v9 = vld [vmem:[%s5060_s7 + $0x1090] sm:$0xff] }
  0x9c   : > { %v1348_v10 = vld [vmem:[%s5060_s7 + $0x10a0] sm:$0xff]  ;;  %1345 = vst [vmem:[%s5065_s8 + $0x840] sm:$0xff] %v1344_v8  ;;  %1347 = vst [vmem:[%s5065_s8 + $0x848] sm:$0xff] %v1346_v9  ;;  %v1350_v11 = vld [vmem:[%s5060_s7 + $0x10b0] sm:$0xff] }
  0x9d   : > { %1349 = vst [vmem:[%s5065_s8 + $0x850] sm:$0xff] %v1348_v10  ;;  %v1352_v12 = vld [vmem:[%s5060_s7 + $0x10c0] sm:$0xff]  ;;  %v1354_v13 = vld [vmem:[%s5060_s7 + $0x10d0] sm:$0xff]  ;;  %1351 = vst [vmem:[%s5065_s8 + $0x858] sm:$0xff] %v1350_v11 }
  0x9e   : > { %1353 = vst [vmem:[%s5065_s8 + $0x860] sm:$0xff] %v1352_v12  ;;  %1355 = vst [vmem:[%s5065_s8 + $0x868] sm:$0xff] %v1354_v13  ;;  %v1356_v14 = vld [vmem:[%s5060_s7 + $0x10e0] sm:$0xff]  ;;  %v1358_v15 = vld [vmem:[%s5060_s7 + $0x10f0] sm:$0xff] }
  0x9f   : > { %v1360_v16 = vld [vmem:[%s5060_s7 + $0x1100] sm:$0xff]  ;;  %1357 = vst [vmem:[%s5065_s8 + $0x870] sm:$0xff] %v1356_v14  ;;  %1359 = vst [vmem:[%s5065_s8 + $0x878] sm:$0xff] %v1358_v15  ;;  %v1362_v17 = vld [vmem:[%s5060_s7 + $0x1110] sm:$0xff] }
  0xa0   : > { %1361 = vst [vmem:[%s5065_s8 + $0x880] sm:$0xff] %v1360_v16  ;;  %v1364_v18 = vld [vmem:[%s5060_s7 + $0x1120] sm:$0xff]  ;;  %v1366_v19 = vld [vmem:[%s5060_s7 + $0x1130] sm:$0xff]  ;;  %1363 = vst [vmem:[%s5065_s8 + $0x888] sm:$0xff] %v1362_v17 }
  0xa1   : > { %1365 = vst [vmem:[%s5065_s8 + $0x890] sm:$0xff] %v1364_v18  ;;  %1367 = vst [vmem:[%s5065_s8 + $0x898] sm:$0xff] %v1366_v19  ;;  %v1368_v20 = vld [vmem:[%s5060_s7 + $0x1140] sm:$0xff]  ;;  %v1370_v21 = vld [vmem:[%s5060_s7 + $0x1150] sm:$0xff] }
  0xa2   : > { %v1372_v22 = vld [vmem:[%s5060_s7 + $0x1160] sm:$0xff]  ;;  %1369 = vst [vmem:[%s5065_s8 + $0x8a0] sm:$0xff] %v1368_v20  ;;  %1371 = vst [vmem:[%s5065_s8 + $0x8a8] sm:$0xff] %v1370_v21  ;;  %v1374_v23 = vld [vmem:[%s5060_s7 + $0x1170] sm:$0xff] }
  0xa3   : > { %1373 = vst [vmem:[%s5065_s8 + $0x8b0] sm:$0xff] %v1372_v22  ;;  %v1376_v24 = vld [vmem:[%s5060_s7 + $0x1180] sm:$0xff]  ;;  %v1378_v25 = vld [vmem:[%s5060_s7 + $0x1190] sm:$0xff]  ;;  %1375 = vst [vmem:[%s5065_s8 + $0x8b8] sm:$0xff] %v1374_v23 }
  0xa4   : > { %1377 = vst [vmem:[%s5065_s8 + $0x8c0] sm:$0xff] %v1376_v24  ;;  %1379 = vst [vmem:[%s5065_s8 + $0x8c8] sm:$0xff] %v1378_v25  ;;  %v1380_v26 = vld [vmem:[%s5060_s7 + $0x11a0] sm:$0xff]  ;;  %v1382_v27 = vld [vmem:[%s5060_s7 + $0x11b0] sm:$0xff] }
  0xa5   : > { %v1384_v28 = vld [vmem:[%s5060_s7 + $0x11c0] sm:$0xff]  ;;  %1381 = vst [vmem:[%s5065_s8 + $0x8d0] sm:$0xff] %v1380_v26  ;;  %1383 = vst [vmem:[%s5065_s8 + $0x8d8] sm:$0xff] %v1382_v27  ;;  %v1386_v29 = vld [vmem:[%s5060_s7 + $0x11d0] sm:$0xff] }
  0xa6   : > { %1385 = vst [vmem:[%s5065_s8 + $0x8e0] sm:$0xff] %v1384_v28  ;;  %v1388_v30 = vld [vmem:[%s5060_s7 + $0x11e0] sm:$0xff]  ;;  %v1390_v31 = vld [vmem:[%s5060_s7 + $0x11f0] sm:$0xff]  ;;  %1387 = vst [vmem:[%s5065_s8 + $0x8e8] sm:$0xff] %v1386_v29 }
  0xa7   : > { %1389 = vst [vmem:[%s5065_s8 + $0x8f0] sm:$0xff] %v1388_v30  ;;  %1391 = vst [vmem:[%s5065_s8 + $0x8f8] sm:$0xff] %v1390_v31  ;;  %v1392_v32 = vld [vmem:[%s5060_s7 + $0x1200] sm:$0xff]  ;;  %v1394_v33 = vld [vmem:[%s5060_s7 + $0x1210] sm:$0xff] }
  0xa8   : > { %v1396_v34 = vld [vmem:[%s5060_s7 + $0x1220] sm:$0xff]  ;;  %1393 = vst [vmem:[%s5065_s8 + $0x900] sm:$0xff] %v1392_v32  ;;  %1395 = vst [vmem:[%s5065_s8 + $0x908] sm:$0xff] %v1394_v33  ;;  %v1398_v35 = vld [vmem:[%s5060_s7 + $0x1230] sm:$0xff] }
  0xa9   : > { %1397 = vst [vmem:[%s5065_s8 + $0x910] sm:$0xff] %v1396_v34  ;;  %v1400_v36 = vld [vmem:[%s5060_s7 + $0x1240] sm:$0xff]  ;;  %v1402_v37 = vld [vmem:[%s5060_s7 + $0x1250] sm:$0xff]  ;;  %1399 = vst [vmem:[%s5065_s8 + $0x918] sm:$0xff] %v1398_v35 }
  0xaa   : > { %1401 = vst [vmem:[%s5065_s8 + $0x920] sm:$0xff] %v1400_v36  ;;  %1403 = vst [vmem:[%s5065_s8 + $0x928] sm:$0xff] %v1402_v37  ;;  %v1404_v38 = vld [vmem:[%s5060_s7 + $0x1260] sm:$0xff]  ;;  %v1406_v39 = vld [vmem:[%s5060_s7 + $0x1270] sm:$0xff] }
  0xab   : > { %v1408_v40 = vld [vmem:[%s5060_s7 + $0x1280] sm:$0xff]  ;;  %1405 = vst [vmem:[%s5065_s8 + $0x930] sm:$0xff] %v1404_v38  ;;  %1407 = vst [vmem:[%s5065_s8 + $0x938] sm:$0xff] %v1406_v39  ;;  %v1410_v41 = vld [vmem:[%s5060_s7 + $0x1290] sm:$0xff] }
  0xac   : > { %1409 = vst [vmem:[%s5065_s8 + $0x940] sm:$0xff] %v1408_v40  ;;  %v1412_v42 = vld [vmem:[%s5060_s7 + $0x12a0] sm:$0xff]  ;;  %v1414_v43 = vld [vmem:[%s5060_s7 + $0x12b0] sm:$0xff]  ;;  %1411 = vst [vmem:[%s5065_s8 + $0x948] sm:$0xff] %v1410_v41 }
  0xad   : > { %1413 = vst [vmem:[%s5065_s8 + $0x950] sm:$0xff] %v1412_v42  ;;  %1415 = vst [vmem:[%s5065_s8 + $0x958] sm:$0xff] %v1414_v43  ;;  %v1416_v44 = vld [vmem:[%s5060_s7 + $0x12c0] sm:$0xff]  ;;  %v1418_v45 = vld [vmem:[%s5060_s7 + $0x12d0] sm:$0xff] }
  0xae   : > { %v1420_v46 = vld [vmem:[%s5060_s7 + $0x12e0] sm:$0xff]  ;;  %1417 = vst [vmem:[%s5065_s8 + $0x960] sm:$0xff] %v1416_v44  ;;  %1419 = vst [vmem:[%s5065_s8 + $0x968] sm:$0xff] %v1418_v45  ;;  %v1422_v47 = vld [vmem:[%s5060_s7 + $0x12f0] sm:$0xff] }
  0xaf   : > { %1421 = vst [vmem:[%s5065_s8 + $0x970] sm:$0xff] %v1420_v46  ;;  %1423 = vst [vmem:[%s5065_s8 + $0x978] sm:$0xff] %v1422_v47 }
  0xb0 PF: > { %p4085_p7 = scmp.ge.s32.totalorder %s4974_s18, 1  ;;  %p1436_p8 = scmp.lt.s32.totalorder %s4974_s18, 17 }
  0xb2   : > { %p1437_p9 = pnand %p4085_p7, %p1436_p8 }
  0xb3   : > { %s1443_s9 = sand.u32 (!%p1437_p9), 1, %s4950_s12   ;;  %s1481_s10 = smul.u32 (!%p1437_p9), 19, %s4958_s14 }
  0xb4   : > { %1440 = sbr.rel (%p1437_p9) target bundleno = 742 (0x2e6), region = 66  ;;  %s4086_s21 = sshll.u32 (!%p1437_p9), %s4962_s15, 1 }
  0xb5   : > { %s4401_s11 = smul.u32 (!%p1437_p9), 2432, %s1443_s9  ;;  %p1484_p10 = scmp.lt.s32.totalorder (!%p1437_p9), %s1481_s10, 151 }
  0xb6   : > { %p1493_p11 = scmp.lt.s32.totalorder (!%p1437_p9), %s4086_s21, 3  ;;  %p4088_p12 = scmp.ne.s32.totalorder (!%p1437_p9), %s4958_s14, 0 }
  0xb7   : > { %s5692_s30 = scalar_lea.vmem (!%p1437_p9), [#allocation3], %s4401_s11 }
  0xb9   : > { %s6105_s10 = smov (!%p1484_p10, %s1481_s10), 151  ;;  %s6107_s21 = smov (!%p1493_p11, %s4086_s21), 3 }
  0xba   : > { %s5682_s24 = scalar_lea.vmem %s6088_s0, %s6105_s10  ;;  %s1495_s28 = scalar_lea.vmem %s6090_s2, %s6107_s21 }
  0xbb   : > { %s1504_s15 = scalar_lea.vmem %s6091_s3, %s6107_s21  ;;  %1510 = sbr.rel (%p4088_p12) target bundleno = 194 (0xc2), region = 74 }
  0xc0   : > { %v4976_v48 = vmov 0.0  }
  0xc1   : > { %1511 = vst [vmem:[#allocation2] sm:$0xf] %v4976_v48 }
  0xc2 PF: > { %v4462_v49 = vld [vmem:[%s5692_s30 + $0x74] ss:$8 sps:$4 sm:$0xff]   ;;  %v4466_v51 = vld [vmem:[%s5692_s30 + $0x70] ss:$8 sps:$4 sm:$0xff]   ;;  %v4468_v53 = vld [vmem:[%s5692_s30 + $0x64] ss:$8 sps:$4 sm:$0xff]   ;;  %v1827_v23 = vlaneseq }
  0xc3   : > { %v4464_v50 = vld [vmem:[%s5692_s30 + $0x174] ss:$8 sps:$4 sm:$0xff]   ;;  %3483 = vmatprep.subr.bf16.mxu0 %v4462_v49  ;;  %v4467_v52 = vld [vmem:[%s5692_s30 + $0x170] ss:$8 sps:$4 sm:$0xff]   ;;  %v4470_v54 = vld [vmem:[%s5692_s30 + $0x164] ss:$8 sps:$4 sm:$0xff]  }
  0xc4   : > { %3524 = vmatprep.subr.bf16.mxu1 %v4464_v50  ;;  %3484 = vmatpush1.bf16.msra.mxu0 %v4466_v51  ;;  %v4472_v55 = vld [vmem:[%s5692_s30 + $0x60] ss:$8 sps:$4 sm:$0xff]   ;;  %v4474_v57 = vld [vmem:[%s5692_s30 + $0x54] ss:$8 sps:$4 sm:$0xff]   ;;  %v4478_v59 = vld [vmem:[%s5692_s30 + $0x50] ss:$8 sps:$4 sm:$0xff]  }
  0xc5   : > { %3525 = vmatpush1.bf16.msra.mxu1 %v4467_v52  ;;  %3485 = vmatprep.subr.bf16.mxu0 %v4468_v53  ;;  %v4473_v56 = vld [vmem:[%s5692_s30 + $0x160] ss:$8 sps:$4 sm:$0xff]   ;;  %v4476_v58 = vld [vmem:[%s5692_s30 + $0x154] ss:$8 sps:$4 sm:$0xff]   ;;  %v4479_v60 = vld [vmem:[%s5692_s30 + $0x150] ss:$8 sps:$4 sm:$0xff]  }
  0xc6   : > { %3526 = vmatprep.subr.bf16.mxu1 %v4470_v54  ;;  %v4480_v61 = vld [vmem:[%s5692_s30 + $0x44] ss:$8 sps:$4 sm:$0xff]   ;;  %v4484_v63 = vld [vmem:[%s5692_s30 + $0x40] ss:$8 sps:$4 sm:$0xff]   ;;  %v4486_v1 = vld [vmem:[%s5692_s30 + $0x34] ss:$8 sps:$4 sm:$0xff]  }
  0xc7   : > { %v4482_v62 = vld [vmem:[%s5692_s30 + $0x144] ss:$8 sps:$4 sm:$0xff]   ;;  %v4485_v0 = vld [vmem:[%s5692_s30 + $0x140] ss:$8 sps:$4 sm:$0xff]   ;;  %v4488_v2 = vld [vmem:[%s5692_s30 + $0x134] ss:$8 sps:$4 sm:$0xff]  }
  0xc8   : > { %3486 = vmatpush1.bf16.msra.mxu0 %v4472_v55  ;;  %v4490_v3 = vld [vmem:[%s5692_s30 + $0x30] ss:$8 sps:$4 sm:$0xff]   ;;  %v4492_v5 = vld [vmem:[%s5692_s30 + $0x24] ss:$8 sps:$4 sm:$0xff]   ;;  %v4496_v7 = vld [vmem:[%s5692_s30 + $0x20] ss:$8 sps:$4 sm:$0xff]  }
  0xc9   : > { %3527 = vmatpush1.bf16.msra.mxu1 %v4473_v56  ;;  %3487 = vmatprep.subr.bf16.mxu0 %v4474_v57  ;;  %v4491_v4 = vld [vmem:[%s5692_s30 + $0x130] ss:$8 sps:$4 sm:$0xff]   ;;  %v4494_v6 = vld [vmem:[%s5692_s30 + $0x124] ss:$8 sps:$4 sm:$0xff]   ;;  %v4497_v8 = vld [vmem:[%s5692_s30 + $0x120] ss:$8 sps:$4 sm:$0xff]  }
  0xca   : > { %3528 = vmatprep.subr.bf16.mxu1 %v4476_v58  ;;  %v4498_v9 = vld [vmem:[%s5692_s30 + $0x14] ss:$8 sps:$4 sm:$0xff]   ;;  %v4502_v11 = vld [vmem:[%s5692_s30 + $0x10] ss:$8 sps:$4 sm:$0xff]   ;;  %v4504_v13 = vld [vmem:[%s5692_s30 + $0x4] ss:$8 sps:$4 sm:$0xff]  }
  0xcb   : > { %v4500_v10 = vld [vmem:[%s5692_s30 + $0x114] ss:$8 sps:$4 sm:$0xff]   ;;  %v4503_v12 = vld [vmem:[%s5692_s30 + $0x110] ss:$8 sps:$4 sm:$0xff]   ;;  %v4506_v14 = vld [vmem:[%s5692_s30 + $0x104] ss:$8 sps:$4 sm:$0xff]  }
  0xcc   : > { %3488 = vmatpush1.bf16.msra.mxu0 %v4478_v59  ;;  %v4508_v15 = vld [vmem:[%s5692_s30] ss:$8 sps:$4 sm:$0xff]   ;;  %v4510_v17 = vld [vmem:[%s5692_s30 + $0xf4] ss:$8 sps:$4 sm:$0xff]   ;;  %v4514_v19 = vld [vmem:[%s5692_s30 + $0xf0] ss:$8 sps:$4 sm:$0xff]  }
  0xcd   : > { %3529 = vmatpush1.bf16.msra.mxu1 %v4479_v60  ;;  %3489 = vmatprep.subr.bf16.mxu0 %v4480_v61  ;;  %v4509_v16 = vld [vmem:[%s5692_s30 + $0x100] ss:$8 sps:$4 sm:$0xff]   ;;  %v4512_v18 = vld [vmem:[%s5692_s30 + $0x1f4] ss:$8 sps:$4 sm:$0xff]   ;;  %v4515_v20 = vld [vmem:[%s5692_s30 + $0x1f0] ss:$8 sps:$4 sm:$0xff]  }
  0xce   : > { %3530 = vmatprep.subr.bf16.mxu1 %v4482_v62  ;;  %v4977_v21 = vmov 1966171168   ;;  %v4516_v24 = vld [vmem:[%s5692_s30 + $0xe4] ss:$8 sps:$4 sm:$0xff]   ;;  %v4520_v26 = vld [vmem:[%s5692_s30 + $0xe0] ss:$8 sps:$4 sm:$0xff]  }
  0xcf   : > { %v1825_v22 = vunpack.c.l.s4 %v4977_v21  ;;  %v4518_v25 = vld [vmem:[%s5692_s30 + $0x1e4] ss:$8 sps:$4 sm:$0xff]   ;;  %v5734_v28 = vshrl.u32 %v1827_v23, 7  ;;  %v4521_v29 = vld [vmem:[%s5692_s30 + $0x1e0] ss:$8 sps:$4 sm:$0xff]   ;;  %p4394_p13 = scmp.ne.s32.totalorder %s4958_s14, 7 }
  0xd0   : > { %3490 = vmatpush1.bf16.msra.mxu0 %v4484_v63  ;;  %v4522_v30 = vld [vmem:[%s5692_s30 + $0xd4] ss:$8 sps:$4 sm:$0xff]   ;;  %v4526_v32 = vld [vmem:[%s5692_s30 + $0xd0] ss:$8 sps:$4 sm:$0xff]   ;;  %v4528_v35 = vld [vmem:[%s5692_s30 + $0xc4] ss:$8 sps:$4 sm:$0xff]  }
  0xd1   : > { %3531 = vmatpush1.bf16.msra.mxu1 %v4485_v0  ;;  %3491 = vmatprep.subr.bf16.mxu0 %v4486_v1  ;;  %v1826_v27 = vunpack.c.0.s8 %v1825_v22  ;;  %v4524_v31 = vld [vmem:[%s5692_s30 + $0x1d4] ss:$8 sps:$4 sm:$0xff]   ;;  %v4527_v33 = vld [vmem:[%s5692_s30 + $0x1d0] ss:$8 sps:$4 sm:$0xff]   ;;  %v4530_v36 = vld [vmem:[%s5692_s30 + $0x1c4] ss:$8 sps:$4 sm:$0xff]  }
  0xd2   : > { %3532 = vmatprep.subr.bf16.mxu1 %v4488_v2  ;;  %v1513_v37 = vld [vmem:[%s5682_s24] sm:$0xff]  ;;  %v4538_v44 = vld [vmem:[%s5692_s30 + $0xb0] ss:$8 sps:$4 sm:$0xff]   ;;  %v4540_v47 = vld [vmem:[%s5692_s30 + $0xa4] ss:$8 sps:$4 sm:$0xff]  }
  0xd3   : > { %v5742_v34 = vsub.s32 %v1826_v27, %v5734_v28  ;;  %v4532_v38 = vld [vmem:[%s5692_s30 + $0xc0] ss:$8 sps:$4 sm:$0xff]   ;;  %v4534_v41 = vld [vmem:[%s5692_s30 + $0xb4] ss:$8 sps:$4 sm:$0xff]   ;;  %v4539_v46 = vld [vmem:[%s5692_s30 + $0x1b0] ss:$8 sps:$4 sm:$0xff]   ;;  %v1823_v50 = vcombine.high %v1513_v37, %v1513_v37 }
  0xd4   : > { %3492 = vmatpush1.bf16.msra.mxu0 %v4490_v3  ;;  %v4533_v40 = vld [vmem:[%s5692_s30 + $0x1c0] ss:$8 sps:$4 sm:$0xff]   ;;  %v4536_v42 = vld [vmem:[%s5692_s30 + $0x1b4] ss:$8 sps:$4 sm:$0xff]   ;;  %v4542_v48 = vld [vmem:[%s5692_s30 + $0x1a4] ss:$8 sps:$4 sm:$0xff]  }
  0xd5   : > { %3533 = vmatpush1.bf16.msra.mxu1 %v4491_v4  ;;  %3493 = vmatprep.subr.bf16.mxu0 %v4492_v5  ;;  %v1830_v39 = vrot.slane %v1513_v37, %v5742_v34  ;;  %v4544_v51 = vld [vmem:[%s5692_s30 + $0xa0] ss:$8 sps:$4 sm:$0xff]   ;;  %v4546_v53 = vld [vmem:[%s5692_s30 + $0x94] ss:$8 sps:$4 sm:$0xff]   ;;  %v5762_v55 = vrot.slane %v1823_v50, %v5742_v34  ;;  %v4550_v56 = vld [vmem:[%s5692_s30 + $0x90] ss:$8 sps:$4 sm:$0xff]  }
  0xd6   : > { %3534 = vmatprep.subr.bf16.mxu1 %v4494_v6  ;;  %v4545_v52 = vld [vmem:[%s5692_s30 + $0x1a0] ss:$8 sps:$4 sm:$0xff]   ;;  %v4548_v54 = vld [vmem:[%s5692_s30 + $0x194] ss:$8 sps:$4 sm:$0xff]   ;;  %v4551_v57 = vld [vmem:[%s5692_s30 + $0x190] ss:$8 sps:$4 sm:$0xff]  }
  0xd7   : > { %v1838_v43 = vcombine.high %v1830_v39, %v1830_v39  ;;  %v4552_v58 = vld [vmem:[%s5692_s30 + $0x84] ss:$8 sps:$4 sm:$0xff]   ;;  %v1839_v60 = vcombine.high %v5762_v55, %v5762_v55  ;;  %v4556_v61 = vld [vmem:[%s5692_s30 + $0x80] ss:$8 sps:$4 sm:$0xff]   ;;  %v1846_v62 = vrot.slane %v1830_v39, %v5742_v34  ;;  %v4561_v0 = vld [vmem:[%s5692_s30 + $0x274] ss:$8 sps:$4 sm:$0xff]  }
  0xd8   : > { %3494 = vmatpush1.bf16.msra.mxu0 %v4496_v7  ;;  %v4554_v59 = vld [vmem:[%s5692_s30 + $0x184] ss:$8 sps:$4 sm:$0xff]   ;;  %v4557_v63 = vld [vmem:[%s5692_s30 + $0x180] ss:$8 sps:$4 sm:$0xff]   ;;  %v4564_v1 = vld [vmem:[%s5692_s30 + $0x374] ss:$8 sps:$4 sm:$0xff]  }
  0xd9   : > { %3535 = vmatpush1.bf16.msra.mxu1 %v4497_v8  ;;  %3495 = vmatprep.subr.bf16.mxu0 %v4498_v9  ;;  %v1860_v45 = vrot.slane %v1838_v43, %v5742_v34  ;;  %v1867_v2 = vrot.slane %v1839_v60, %v5742_v34  ;;  %v1868_v3 = vcombine.high %v1846_v62, %v1846_v62  ;;  %v4559_v4 = vld [vmem:[%s5692_s30 + $0x270] ss:$8 sps:$4 sm:$0xff]   ;;  %v4567_v6 = vld [vmem:[%s5692_s30 + $0x264] ss:$8 sps:$4 sm:$0xff]   ;;  %v4565_v9 = vld [vmem:[%s5692_s30 + $0x260] ss:$8 sps:$4 sm:$0xff]  }
  0xda   : > { %3536 = vmatprep.subr.bf16.mxu1 %v4500_v10  ;;  %v4562_v5 = vld [vmem:[%s5692_s30 + $0x370] ss:$8 sps:$4 sm:$0xff]   ;;  %v4570_v7 = vld [vmem:[%s5692_s30 + $0x364] ss:$8 sps:$4 sm:$0xff]   ;;  %v4568_v10 = vld [vmem:[%s5692_s30 + $0x360] ss:$8 sps:$4 sm:$0xff]  }
  0xdb   : > { %v1870_v49 = vcombine.high %v1860_v45, %v1860_v45  ;;  %3515 = vmatprep.mubr.bf16.mxu0 %v1860_v45  ;;  %v1871_v8 = vcombine.high %v1867_v2, %v1867_v2  ;;  %v4583_v21 = vld [vmem:[%s5692_s30 + $0x230] ss:$8 sps:$4 sm:$0xff]   ;;  %v4591_v23 = vld [vmem:[%s5692_s30 + $0x224] ss:$8 sps:$4 sm:$0xff]   ;;  %v4597_v27 = vld [vmem:[%s5692_s30 + $0x214] ss:$8 sps:$4 sm:$0xff]  }
  0xdc   : > { %3496 = vmatpush1.bf16.msra.mxu0 %v4502_v11  ;;  %v4573_v11 = vld [vmem:[%s5692_s30 + $0x254] ss:$8 sps:$4 sm:$0xff]   ;;  %v4586_v22 = vld [vmem:[%s5692_s30 + $0x330] ss:$8 sps:$4 sm:$0xff]   ;;  %v4613_v43 = vld [vmem:[%s5692_s30 + $0x2e0] ss:$8 sps:$4 sm:$0xff]  }
  0xdd   : > { %3537 = vmatpush1.bf16.msra.mxu1 %v4503_v12  ;;  %3497 = vmatprep.subr.bf16.mxu0 %v4504_v13  ;;  %v4576_v12 = vld [vmem:[%s5692_s30 + $0x354] ss:$8 sps:$4 sm:$0xff]   ;;  %v4571_v13 = vld [vmem:[%s5692_s30 + $0x250] ss:$8 sps:$4 sm:$0xff]   ;;  %v4630_v50 = vld [vmem:[%s5692_s30 + $0x3c4] ss:$8 sps:$4 sm:$0xff]  }
  0xde   : > { %3538 = vmatprep.subr.bf16.mxu1 %v4506_v14  ;;  %3556 = vmatprep.mubr.bf16.mxu1 %v1870_v49  ;;  %v4574_v14 = vld [vmem:[%s5692_s30 + $0x350] ss:$8 sps:$4 sm:$0xff]   ;;  %v4609_v37 = vld [vmem:[%s5692_s30 + $0x2f4] ss:$8 sps:$4 sm:$0xff]   ;;  %v4627_v49 = vld [vmem:[%s5692_s30 + $0x2c4] ss:$8 sps:$4 sm:$0xff]  }
  0xdf   : > { %v4607_v39 = vld [vmem:[%s5692_s30 + $0x2f0] ss:$8 sps:$4 sm:$0xff]   ;;  %v4621_v45 = vld [vmem:[%s5692_s30 + $0x2d4] ss:$8 sps:$4 sm:$0xff]   ;;  %v4637_v60 = vld [vmem:[%s5692_s30 + $0x2a0] ss:$8 sps:$4 sm:$0xff]  }
  0xe0   : > { %3498 = vmatpush1.bf16.msra.mxu0 %v4508_v15  ;;  %v4579_v15 = vld [vmem:[%s5692_s30 + $0x244] ss:$8 sps:$4 sm:$0xff]  }
  0xe1   : > { %3539 = vmatpush1.bf16.msra.mxu1 %v4509_v16  ;;  %3499 = vmatprep.subr.bf16.mxu0 %v4510_v17  ;;  %v4582_v16 = vld [vmem:[%s5692_s30 + $0x344] ss:$8 sps:$4 sm:$0xff]   ;;  %v4577_v17 = vld [vmem:[%s5692_s30 + $0x240] ss:$8 sps:$4 sm:$0xff]  }
  0xe2   : > { %3540 = vmatprep.subr.bf16.mxu1 %v4512_v18  ;;  %v4580_v18 = vld [vmem:[%s5692_s30 + $0x340] ss:$8 sps:$4 sm:$0xff]  }
  0xe4   : > { %3500 = vmatpush2.bf16.msra.mxu0 %v4514_v19  ;;  %v4585_v19 = vld [vmem:[%s5692_s30 + $0x234] ss:$8 sps:$4 sm:$0xff]  }
  0xe5   : > { %3541 = vmatpush2.bf16.msra.mxu1 %v4515_v20  ;;  %3501 = vmatprep.subr.bf16.mxu0 %v4516_v24  ;;  %v4588_v20 = vld [vmem:[%s5692_s30 + $0x334] ss:$8 sps:$4 sm:$0xff]   ;;  %v4594_v24 = vld [vmem:[%s5692_s30 + $0x324] ss:$8 sps:$4 sm:$0xff]  }
  0xe6   : > { %3542 = vmatprep.subr.bf16.mxu1 %v4518_v25  ;;  %v4589_v25 = vld [vmem:[%s5692_s30 + $0x220] ss:$8 sps:$4 sm:$0xff]  }
  0xe8   : > { %3502 = vmatpush2.bf16.msra.mxu0 %v4520_v26  ;;  %v4592_v26 = vld [vmem:[%s5692_s30 + $0x320] ss:$8 sps:$4 sm:$0xff]  }
  0xe9   : > { %3543 = vmatpush2.bf16.msra.mxu1 %v4521_v29  ;;  %3503 = vmatprep.subr.bf16.mxu0 %v4522_v30  ;;  %v4600_v29 = vld [vmem:[%s5692_s30 + $0x314] ss:$8 sps:$4 sm:$0xff]   ;;  %v4595_v30 = vld [vmem:[%s5692_s30 + $0x210] ss:$8 sps:$4 sm:$0xff]  }
  0xea   : > { %3544 = vmatprep.subr.bf16.mxu1 %v4524_v31  ;;  %v4598_v31 = vld [vmem:[%s5692_s30 + $0x310] ss:$8 sps:$4 sm:$0xff]  }
  0xec   : > { %3504 = vmatpush2.bf16.msra.mxu0 %v4526_v32  ;;  %v4603_v32 = vld [vmem:[%s5692_s30 + $0x204] ss:$8 sps:$4 sm:$0xff]  }
  0xed   : > { %3545 = vmatpush2.bf16.msra.mxu1 %v4527_v33  ;;  %3505 = vmatprep.subr.bf16.mxu0 %v4528_v35  ;;  %v4606_v33 = vld [vmem:[%s5692_s30 + $0x304] ss:$8 sps:$4 sm:$0xff]   ;;  %v4601_v35 = vld [vmem:[%s5692_s30 + $0x200] ss:$8 sps:$4 sm:$0xff]  }
  0xee   : > { %3546 = vmatprep.subr.bf16.mxu1 %v4530_v36  ;;  %v4604_v36 = vld [vmem:[%s5692_s30 + $0x300] ss:$8 sps:$4 sm:$0xff]  }
  0xf0   : > { %3506 = vmatpush2.bf16.msra.mxu0 %v4532_v38  ;;  %v4612_v38 = vld [vmem:[%s5692_s30 + $0x3f4] ss:$8 sps:$4 sm:$0xff]  }
  0xf1   : > { %3547 = vmatpush2.bf16.msra.mxu1 %v4533_v40  ;;  %3507 = vmatprep.subr.bf16.mxu0 %v4534_v41  ;;  %v4610_v40 = vld [vmem:[%s5692_s30 + $0x3f0] ss:$8 sps:$4 sm:$0xff]   ;;  %v4615_v41 = vld [vmem:[%s5692_s30 + $0x2e4] ss:$8 sps:$4 sm:$0xff]  }
  0xf2   : > { %3548 = vmatprep.subr.bf16.mxu1 %v4536_v42  ;;  %v4618_v42 = vld [vmem:[%s5692_s30 + $0x3e4] ss:$8 sps:$4 sm:$0xff]  }
  0xf4   : > { %3508 = vmatpush2.bf16.msra.mxu0 %v4538_v44  ;;  %v4616_v44 = vld [vmem:[%s5692_s30 + $0x3e0] ss:$8 sps:$4 sm:$0xff]  }
  0xf5   : > { %3549 = vmatpush2.bf16.msra.mxu1 %v4539_v46  ;;  %3509 = vmatprep.subr.bf16.mxu0 %v4540_v47  ;;  %v4624_v46 = vld [vmem:[%s5692_s30 + $0x3d4] ss:$8 sps:$4 sm:$0xff]   ;;  %v4619_v47 = vld [vmem:[%s5692_s30 + $0x2d0] ss:$8 sps:$4 sm:$0xff]  }
  0xf6   : > { %3550 = vmatprep.subr.bf16.mxu1 %v4542_v48  ;;  %v4622_v48 = vld [vmem:[%s5692_s30 + $0x3d0] ss:$8 sps:$4 sm:$0xff]  }
  0xf8   : > { %3510 = vmatpush2.bf16.msra.mxu0 %v4544_v51  ;;  %v4625_v51 = vld [vmem:[%s5692_s30 + $0x2c0] ss:$8 sps:$4 sm:$0xff]  }
  0xf9   : > { %3551 = vmatpush2.bf16.msra.mxu1 %v4545_v52  ;;  %3511 = vmatprep.subr.bf16.mxu0 %v4546_v53  ;;  %v4628_v52 = vld [vmem:[%s5692_s30 + $0x3c0] ss:$8 sps:$4 sm:$0xff]   ;;  %v4633_v53 = vld [vmem:[%s5692_s30 + $0x2b4] ss:$8 sps:$4 sm:$0xff]  }
  0xfa   : > { %3552 = vmatprep.subr.bf16.mxu1 %v4548_v54  ;;  %v4636_v54 = vld [vmem:[%s5692_s30 + $0x3b4] ss:$8 sps:$4 sm:$0xff]  }
  0xfc   : > { %3512 = vmatpush2.bf16.msra.mxu0 %v4550_v56  ;;  %v4631_v56 = vld [vmem:[%s5692_s30 + $0x2b0] ss:$8 sps:$4 sm:$0xff]  }
  0xfd   : > { %3553 = vmatpush2.bf16.msra.mxu1 %v4551_v57  ;;  %3513 = vmatprep.subr.bf16.mxu0 %v4552_v58  ;;  %v4634_v57 = vld [vmem:[%s5692_s30 + $0x3b0] ss:$8 sps:$4 sm:$0xff]   ;;  %v4639_v58 = vld [vmem:[%s5692_s30 + $0x2a4] ss:$8 sps:$4 sm:$0xff]  }
  0xfe   : > { %3554 = vmatprep.subr.bf16.mxu1 %v4554_v59  ;;  %v4642_v59 = vld [vmem:[%s5692_s30 + $0x3a4] ss:$8 sps:$4 sm:$0xff]  }
 0x100   : > { %3514 = vmatpush2.bf16.msra.mxu0 %v4556_v61  ;;  %v4640_v61 = vld [vmem:[%s5692_s30 + $0x3a0] ss:$8 sps:$4 sm:$0xff]  }
 0x101   : > { %3555 = vmatpush2.bf16.msra.mxu1 %v4557_v63  ;;  %3565 = vmatprep.subr.bf16.mxu0 %v4561_v0  ;;  %v4648_v63 = vld [vmem:[%s5692_s30 + $0x394] ss:$8 sps:$4 sm:$0xff]   ;;  %v4643_v0 = vld [vmem:[%s5692_s30 + $0x290] ss:$8 sps:$4 sm:$0xff]  }
 0x102   : > { %3606 = vmatprep.subr.bf16.mxu1 %v4564_v1  ;;  %v4646_v1 = vld [vmem:[%s5692_s30 + $0x390] ss:$8 sps:$4 sm:$0xff]  }
 0x103   : > { %3516 = vmatmul.mubr.bf16.vlgmr.msra.gmra.mxu0 %v1846_v62  ;;  %v4645_v62 = vld [vmem:[%s5692_s30 + $0x294] ss:$8 sps:$4 sm:$0xff]  }
 0x104   : > { %3557 = vmatmul.mubr.bf16.vlgmr.msra.gmra.mxu1 %v1868_v3  ;;  %3566 = vmatpush1.bf16.msra.mxu0 %v4559_v4  ;;  %v4654_v3 = vld [vmem:[%s5692_s30 + $0x384] ss:$8 sps:$4 sm:$0xff]   ;;  %v4649_v4 = vld [vmem:[%s5692_s30 + $0x280] ss:$8 sps:$4 sm:$0xff]  }
 0x105   : > { %3607 = vmatpush1.bf16.msra.mxu1 %v4562_v5  ;;  %3567 = vmatprep.subr.bf16.mxu0 %v4567_v6  ;;  %v1853_v5 = vrot.slane %v5762_v55, %v5742_v34  ;;  %v4652_v6 = vld [vmem:[%s5692_s30 + $0x380] ss:$8 sps:$4 sm:$0xff]   ;;  %v4663_v55 = vld [vmem:[%s5692_s30 + $0x464] ss:$8 sps:$4 sm:$0xff]  }
 0x106   : > { %3608 = vmatprep.subr.bf16.mxu1 %v4570_v7  ;;  %3597 = vmatprep.mubr.bf16.mxu0 %v1867_v2  ;;  %v4651_v2 = vld [vmem:[%s5692_s30 + $0x284] ss:$8 sps:$4 sm:$0xff]   ;;  %v4657_v7 = vld [vmem:[%s5692_s30 + $0x474] ss:$8 sps:$4 sm:$0xff]  }
 0x107   : > { %3638 = vmatprep.mubr.bf16.mxu1 %v1871_v8  ;;  %v4660_v8 = vld [vmem:[%s5692_s30 + $0x574] ss:$8 sps:$4 sm:$0xff]  }
 0x108   : > { %3568 = vmatpush1.bf16.msra.mxu0 %v4565_v9  ;;  %v4655_v9 = vld [vmem:[%s5692_s30 + $0x470] ss:$8 sps:$4 sm:$0xff]  }
 0x109   : > { %3609 = vmatpush1.bf16.msra.mxu1 %v4568_v10  ;;  %3569 = vmatprep.subr.bf16.mxu0 %v4573_v11  ;;  %v1869_v10 = vcombine.high %v1853_v5, %v1853_v5  ;;  %v4658_v11 = vld [vmem:[%s5692_s30 + $0x570] ss:$8 sps:$4 sm:$0xff]  }
 0x10a   : > { %3610 = vmatprep.subr.bf16.mxu1 %v4576_v12  ;;  %v5845_v12 = vld [vmem:[%s5682_s24 + $0x8] sm:$0xff] }
 0x10c   : > { %3570 = vmatpush1.bf16.msra.mxu0 %v4571_v13  ;;  %v4666_v13 = vld [vmem:[%s5692_s30 + $0x564] ss:$8 sps:$4 sm:$0xff]  }
 0x10d   : > { %3611 = vmatpush1.bf16.msra.mxu1 %v4574_v14  ;;  %3571 = vmatprep.subr.bf16.mxu0 %v4579_v15  ;;  %v5851_v14 = vrot.slane %v5845_v12, %v5742_v34 }
 0x10e   : > { %3612 = vmatprep.subr.bf16.mxu1 %v4582_v16  ;;  %v4661_v16 = vld [vmem:[%s5692_s30 + $0x460] ss:$8 sps:$4 sm:$0xff]  }
 0x10f   : > { %v1887_v15 = vcombine.high %v5851_v14, %v5851_v14 }
 0x110   : > { %3572 = vmatpush1.bf16.msra.mxu0 %v4577_v17  ;;  %v4664_v17 = vld [vmem:[%s5692_s30 + $0x560] ss:$8 sps:$4 sm:$0xff]  }
 0x111   : > { %3613 = vmatpush1.bf16.msra.mxu1 %v4580_v18  ;;  %3573 = vmatprep.subr.bf16.mxu0 %v4585_v19  ;;  %v4669_v18 = vld [vmem:[%s5692_s30 + $0x454] ss:$8 sps:$4 sm:$0xff]  }
 0x112   : > { %3614 = vmatprep.subr.bf16.mxu1 %v4588_v20  ;;  %v4672_v19 = vld [vmem:[%s5692_s30 + $0x554] ss:$8 sps:$4 sm:$0xff]   ;;  %v1909_v20 = vrot.slane %v1887_v15, %v5742_v34 }
 0x114   : > { %3574 = vmatpush1.bf16.msra.mxu0 %v4583_v21  ;;  %v1919_v21 = vcombine.high %v1909_v20, %v1909_v20 }
 0x115   : > { %3615 = vmatpush1.bf16.msra.mxu1 %v4586_v22  ;;  %3575 = vmatprep.subr.bf16.mxu0 %v4591_v23  ;;  %v4667_v22 = vld [vmem:[%s5692_s30 + $0x450] ss:$8 sps:$4 sm:$0xff]  }
 0x116   : > { %3616 = vmatprep.subr.bf16.mxu1 %v4594_v24  ;;  %v4670_v23 = vld [vmem:[%s5692_s30 + $0x550] ss:$8 sps:$4 sm:$0xff]   ;;  %v4675_v24 = vld [vmem:[%s5692_s30 + $0x444] ss:$8 sps:$4 sm:$0xff]  }
 0x118   : > { %3576 = vmatpush1.bf16.msra.mxu0 %v4589_v25  ;;  %v4678_v25 = vld [vmem:[%s5692_s30 + $0x544] ss:$8 sps:$4 sm:$0xff]  }
 0x119   : > { %3617 = vmatpush1.bf16.msra.mxu1 %v4592_v26  ;;  %3577 = vmatprep.subr.bf16.mxu0 %v4597_v27  ;;  %v4673_v26 = vld [vmem:[%s5692_s30 + $0x440] ss:$8 sps:$4 sm:$0xff]  }
 0x11a   : > { %3618 = vmatprep.subr.bf16.mxu1 %v4600_v29  ;;  %v4676_v27 = vld [vmem:[%s5692_s30 + $0x540] ss:$8 sps:$4 sm:$0xff]   ;;  %v4681_v29 = vld [vmem:[%s5692_s30 + $0x434] ss:$8 sps:$4 sm:$0xff]  }
 0x11c   : > { %3578 = vmatpush1.bf16.msra.mxu0 %v4595_v30  ;;  %v4684_v30 = vld [vmem:[%s5692_s30 + $0x534] ss:$8 sps:$4 sm:$0xff]  }
 0x11d   : > { %3619 = vmatpush1.bf16.msra.mxu1 %v4598_v31  ;;  %3579 = vmatprep.subr.bf16.mxu0 %v4603_v32  ;;  %v4679_v31 = vld [vmem:[%s5692_s30 + $0x430] ss:$8 sps:$4 sm:$0xff]  }
 0x11e   : > { %3620 = vmatprep.subr.bf16.mxu1 %v4606_v33  ;;  %v4682_v32 = vld [vmem:[%s5692_s30 + $0x530] ss:$8 sps:$4 sm:$0xff]   ;;  %v4687_v33 = vld [vmem:[%s5692_s30 + $0x424] ss:$8 sps:$4 sm:$0xff]  }
 0x120   : > { %3580 = vmatpush1.bf16.msra.mxu0 %v4601_v35  ;;  %v4690_v35 = vld [vmem:[%s5692_s30 + $0x524] ss:$8 sps:$4 sm:$0xff]  }
 0x121   : > { %3621 = vmatpush1.bf16.msra.mxu1 %v4604_v36  ;;  %3581 = vmatprep.subr.bf16.mxu0 %v4609_v37  ;;  %v4685_v36 = vld [vmem:[%s5692_s30 + $0x420] ss:$8 sps:$4 sm:$0xff]  }
 0x122   : > { %3622 = vmatprep.subr.bf16.mxu1 %v4612_v38  ;;  %v4688_v37 = vld [vmem:[%s5692_s30 + $0x520] ss:$8 sps:$4 sm:$0xff]   ;;  %v4693_v38 = vld [vmem:[%s5692_s30 + $0x414] ss:$8 sps:$4 sm:$0xff]  }
 0x124   : > { %3582 = vmatpush2.bf16.msra.mxu0 %v4607_v39  ;;  %v4696_v39 = vld [vmem:[%s5692_s30 + $0x514] ss:$8 sps:$4 sm:$0xff]  }
 0x125   : > { %3623 = vmatpush2.bf16.msra.mxu1 %v4610_v40  ;;  %3583 = vmatprep.subr.bf16.mxu0 %v4615_v41  ;;  %v4691_v40 = vld [vmem:[%s5692_s30 + $0x410] ss:$8 sps:$4 sm:$0xff]  }
 0x126   : > { %3624 = vmatprep.subr.bf16.mxu1 %v4618_v42  ;;  %v4694_v41 = vld [vmem:[%s5692_s30 + $0x510] ss:$8 sps:$4 sm:$0xff]   ;;  %v4699_v42 = vld [vmem:[%s5692_s30 + $0x404] ss:$8 sps:$4 sm:$0xff]  }
 0x128   : > { %3584 = vmatpush2.bf16.msra.mxu0 %v4613_v43  ;;  %v4702_v43 = vld [vmem:[%s5692_s30 + $0x504] ss:$8 sps:$4 sm:$0xff]  }
 0x129   : > { %3625 = vmatpush2.bf16.msra.mxu1 %v4616_v44  ;;  %3585 = vmatprep.subr.bf16.mxu0 %v4621_v45  ;;  %v4697_v44 = vld [vmem:[%s5692_s30 + $0x400] ss:$8 sps:$4 sm:$0xff]  }
 0x12a   : > { %3626 = vmatprep.subr.bf16.mxu1 %v4624_v46  ;;  %v4700_v45 = vld [vmem:[%s5692_s30 + $0x500] ss:$8 sps:$4 sm:$0xff]   ;;  %v4705_v46 = vld [vmem:[%s5692_s30 + $0x4f4] ss:$8 sps:$4 sm:$0xff]  }
 0x12c   : > { %3586 = vmatpush2.bf16.msra.mxu0 %v4619_v47  ;;  %v4708_v47 = vld [vmem:[%s5692_s30 + $0x5f4] ss:$8 sps:$4 sm:$0xff]  }
 0x12d   : > { %3627 = vmatpush2.bf16.msra.mxu1 %v4622_v48  ;;  %3587 = vmatprep.subr.bf16.mxu0 %v4627_v49  ;;  %v4703_v48 = vld [vmem:[%s5692_s30 + $0x4f0] ss:$8 sps:$4 sm:$0xff]  }
 0x12e   : > { %3628 = vmatprep.subr.bf16.mxu1 %v4630_v50  ;;  %v4706_v49 = vld [vmem:[%s5692_s30 + $0x5f0] ss:$8 sps:$4 sm:$0xff]   ;;  %v4711_v50 = vld [vmem:[%s5692_s30 + $0x4e4] ss:$8 sps:$4 sm:$0xff]  }
 0x130   : > { %3588 = vmatpush2.bf16.msra.mxu0 %v4625_v51  ;;  %v4714_v51 = vld [vmem:[%s5692_s30 + $0x5e4] ss:$8 sps:$4 sm:$0xff]  }
 0x131   : > { %3629 = vmatpush2.bf16.msra.mxu1 %v4628_v52  ;;  %3589 = vmatprep.subr.bf16.mxu0 %v4633_v53  ;;  %v4709_v52 = vld [vmem:[%s5692_s30 + $0x4e0] ss:$8 sps:$4 sm:$0xff]  }
 0x132   : > { %3630 = vmatprep.subr.bf16.mxu1 %v4636_v54  ;;  %v4712_v53 = vld [vmem:[%s5692_s30 + $0x5e0] ss:$8 sps:$4 sm:$0xff]   ;;  %v4717_v54 = vld [vmem:[%s5692_s30 + $0x4d4] ss:$8 sps:$4 sm:$0xff]  }
 0x134   : > { %3590 = vmatpush2.bf16.msra.mxu0 %v4631_v56  ;;  %v4720_v56 = vld [vmem:[%s5692_s30 + $0x5d4] ss:$8 sps:$4 sm:$0xff]  }
 0x135   : > { %3631 = vmatpush2.bf16.msra.mxu1 %v4634_v57  ;;  %3591 = vmatprep.subr.bf16.mxu0 %v4639_v58  ;;  %v4715_v57 = vld [vmem:[%s5692_s30 + $0x4d0] ss:$8 sps:$4 sm:$0xff]  }
 0x136   : > { %3632 = vmatprep.subr.bf16.mxu1 %v4642_v59  ;;  %v4718_v58 = vld [vmem:[%s5692_s30 + $0x5d0] ss:$8 sps:$4 sm:$0xff]   ;;  %v4723_v59 = vld [vmem:[%s5692_s30 + $0x4c4] ss:$8 sps:$4 sm:$0xff]  }
 0x138   : > { %3592 = vmatpush2.bf16.msra.mxu0 %v4637_v60  ;;  %v4726_v60 = vld [vmem:[%s5692_s30 + $0x5c4] ss:$8 sps:$4 sm:$0xff]  }
 0x139   : > { %3633 = vmatpush2.bf16.msra.mxu1 %v4640_v61  ;;  %3593 = vmatprep.subr.bf16.mxu0 %v4645_v62  ;;  %v4721_v61 = vld [vmem:[%s5692_s30 + $0x4c0] ss:$8 sps:$4 sm:$0xff]  }
 0x13a   : > { %3634 = vmatprep.subr.bf16.mxu1 %v4648_v63  ;;  %v4724_v62 = vld [vmem:[%s5692_s30 + $0x5c0] ss:$8 sps:$4 sm:$0xff]   ;;  %v4729_v63 = vld [vmem:[%s5692_s30 + $0x4b4] ss:$8 sps:$4 sm:$0xff]  }
 0x13c   : > { %3594 = vmatpush2.bf16.msra.mxu0 %v4643_v0  ;;  %v4732_v0 = vld [vmem:[%s5692_s30 + $0x5b4] ss:$8 sps:$4 sm:$0xff]  }
 0x13d   : > { %3635 = vmatpush2.bf16.msra.mxu1 %v4646_v1  ;;  %3595 = vmatprep.subr.bf16.mxu0 %v4651_v2  ;;  %v4727_v1 = vld [vmem:[%s5692_s30 + $0x4b0] ss:$8 sps:$4 sm:$0xff]  }
 0x13e   : > { %3636 = vmatprep.subr.bf16.mxu1 %v4654_v3  ;;  %v4730_v2 = vld [vmem:[%s5692_s30 + $0x5b0] ss:$8 sps:$4 sm:$0xff]   ;;  %v4735_v3 = vld [vmem:[%s5692_s30 + $0x4a4] ss:$8 sps:$4 sm:$0xff]  }
 0x140   : > { %3596 = vmatpush2.bf16.msra.mxu0 %v4649_v4  ;;  %v4738_v4 = vld [vmem:[%s5692_s30 + $0x5a4] ss:$8 sps:$4 sm:$0xff]  }
 0x141   : > { %3637 = vmatpush2.bf16.msra.mxu1 %v4652_v6  ;;  %3647 = vmatprep.subr.bf16.mxu0 %v4657_v7  ;;  %v4733_v6 = vld [vmem:[%s5692_s30 + $0x4a0] ss:$8 sps:$4 sm:$0xff]  }
 0x142   : > { %3688 = vmatprep.subr.bf16.mxu1 %v4660_v8  ;;  %v4736_v7 = vld [vmem:[%s5692_s30 + $0x5a0] ss:$8 sps:$4 sm:$0xff]   ;;  %v4741_v8 = vld [vmem:[%s5692_s30 + $0x494] ss:$8 sps:$4 sm:$0xff]  }
 0x143   : > { %3598 = vmatmul.mubr.bf16.vlgmr.msra.gmra.mxu0 %v1853_v5  ;;  %v1872_v5 = vcombine.high %v5845_v12, %v5845_v12  ;;  %v4742_v12 = vld [vmem:[%s5692_s30 + $0x590] ss:$8 sps:$4 sm:$0xff]  }
 0x144   : > { %3639 = vmatmul.mubr.bf16.vlgmr.msra.gmra.mxu1 %v1869_v10  ;;  %3648 = vmatpush1.bf16.msra.mxu0 %v4655_v9  ;;  %v4744_v9 = vld [vmem:[%s5692_s30 + $0x594] ss:$8 sps:$4 sm:$0xff]  }
 0x145   : > { %3689 = vmatpush1.bf16.msra.mxu1 %v4658_v11  ;;  %3649 = vmatprep.subr.bf16.mxu0 %v4663_v55  ;;  %v5911_v10 = vrot.slane %v1872_v5, %v5742_v34  ;;  %v4739_v11 = vld [vmem:[%s5692_s30 + $0x490] ss:$8 sps:$4 sm:$0xff]   ;;  %v4747_v55 = vld [vmem:[%s5692_s30 + $0x484] ss:$8 sps:$4 sm:$0xff]  }
 0x146   : > { %3690 = vmatprep.subr.bf16.mxu1 %v4666_v13  ;;  %3679 = vmatprep.mubr.bf16.mxu0 %v1909_v20  ;;  %v4750_v13 = vld [vmem:[%s5692_s30 + $0x584] ss:$8 sps:$4 sm:$0xff]   ;;  %v4756_v20 = vld [vmem:[%s5692_s30 + $0x774] ss:$8 sps:$4 sm:$0xff]  }
 0x147   : > { %3720 = vmatprep.mubr.bf16.mxu1 %v1919_v21  ;;  %v1888_v15 = vcombine.high %v5911_v10, %v5911_v10  ;;  %v4822_v5 = vld [vmem:[%s5692_s30 + $0x7c4] ss:$8 sps:$4 sm:$0xff]  }
 0x148   : > { %3650 = vmatpush1.bf16.msra.mxu0 %v4661_v16  ;;  %v1895_v16 = vrot.slane %v5851_v14, %v5742_v34  ;;  %v4754_v14 = vld [vmem:[%s5692_s30 + $0x770] ss:$8 sps:$4 sm:$0xff]  }
 0x149   : > { %3691 = vmatpush1.bf16.msra.mxu1 %v4664_v17  ;;  %3651 = vmatprep.subr.bf16.mxu0 %v4669_v18  ;;  %v4745_v17 = vld [vmem:[%s5692_s30 + $0x480] ss:$8 sps:$4 sm:$0xff]   ;;  %v1916_v21 = vrot.slane %v1888_v15, %v5742_v34 }
 0x14a   : > { %3692 = vmatprep.subr.bf16.mxu1 %v4672_v19  ;;  %v4748_v18 = vld [vmem:[%s5692_s30 + $0x580] ss:$8 sps:$4 sm:$0xff]   ;;  %v4753_v19 = vld [vmem:[%s5692_s30 + $0x674] ss:$8 sps:$4 sm:$0xff]  }
 0x14b   : > { %v4829_v15 = vld [vmem:[%s5692_s30 + $0x6a0] ss:$8 sps:$4 sm:$0xff]  }
 0x14c   : > { %3652 = vmatpush1.bf16.msra.mxu0 %v4667_v22  ;;  %v1917_v22 = vcombine.high %v1895_v16, %v1895_v16 }
 0x14d   : > { %3693 = vmatpush1.bf16.msra.mxu1 %v4670_v23  ;;  %3653 = vmatprep.subr.bf16.mxu0 %v4675_v24  ;;  %v4751_v23 = vld [vmem:[%s5692_s30 + $0x670] ss:$8 sps:$4 sm:$0xff]   ;;  %v4759_v24 = vld [vmem:[%s5692_s30 + $0x664] ss:$8 sps:$4 sm:$0xff]  }
 0x14e   : > { %3694 = vmatprep.subr.bf16.mxu1 %v4678_v25  ;;  %v4762_v25 = vld [vmem:[%s5692_s30 + $0x764] ss:$8 sps:$4 sm:$0xff]  }
 0x150   : > { %3654 = vmatpush1.bf16.msra.mxu0 %v4673_v26  ;;  %v1920_v26 = vcombine.high %v1916_v21, %v1916_v21 }
 0x151   : > { %3695 = vmatpush1.bf16.msra.mxu1 %v4676_v27  ;;  %3655 = vmatprep.subr.bf16.mxu0 %v4681_v29  ;;  %v4757_v27 = vld [vmem:[%s5692_s30 + $0x660] ss:$8 sps:$4 sm:$0xff]  }
 0x152   : > { %3696 = vmatprep.subr.bf16.mxu1 %v4684_v30  ;;  %v4760_v29 = vld [vmem:[%s5692_s30 + $0x760] ss:$8 sps:$4 sm:$0xff]   ;;  %v4765_v30 = vld [vmem:[%s5692_s30 + $0x654] ss:$8 sps:$4 sm:$0xff]  }
 0x154   : > { %3656 = vmatpush1.bf16.msra.mxu0 %v4679_v31  ;;  %v4768_v31 = vld [vmem:[%s5692_s30 + $0x754] ss:$8 sps:$4 sm:$0xff]  }
 0x155   : > { %3697 = vmatpush1.bf16.msra.mxu1 %v4682_v32  ;;  %3657 = vmatprep.subr.bf16.mxu0 %v4687_v33  ;;  %v4763_v32 = vld [vmem:[%s5692_s30 + $0x650] ss:$8 sps:$4 sm:$0xff]  }
 0x156   : > { %3698 = vmatprep.subr.bf16.mxu1 %v4690_v35  ;;  %v4766_v33 = vld [vmem:[%s5692_s30 + $0x750] ss:$8 sps:$4 sm:$0xff]   ;;  %v4771_v35 = vld [vmem:[%s5692_s30 + $0x644] ss:$8 sps:$4 sm:$0xff]  }
 0x158   : > { %3658 = vmatpush1.bf16.msra.mxu0 %v4685_v36  ;;  %v4774_v36 = vld [vmem:[%s5692_s30 + $0x744] ss:$8 sps:$4 sm:$0xff]  }
 0x159   : > { %3699 = vmatpush1.bf16.msra.mxu1 %v4688_v37  ;;  %3659 = vmatprep.subr.bf16.mxu0 %v4693_v38  ;;  %v4769_v37 = vld [vmem:[%s5692_s30 + $0x640] ss:$8 sps:$4 sm:$0xff]  }
 0x15a   : > { %3700 = vmatprep.subr.bf16.mxu1 %v4696_v39  ;;  %v4772_v38 = vld [vmem:[%s5692_s30 + $0x740] ss:$8 sps:$4 sm:$0xff]   ;;  %v4777_v39 = vld [vmem:[%s5692_s30 + $0x634] ss:$8 sps:$4 sm:$0xff]  }
 0x15c   : > { %3660 = vmatpush1.bf16.msra.mxu0 %v4691_v40  ;;  %v4780_v40 = vld [vmem:[%s5692_s30 + $0x734] ss:$8 sps:$4 sm:$0xff]  }
 0x15d   : > { %3701 = vmatpush1.bf16.msra.mxu1 %v4694_v41  ;;  %3661 = vmatprep.subr.bf16.mxu0 %v4699_v42  ;;  %v4775_v41 = vld [vmem:[%s5692_s30 + $0x630] ss:$8 sps:$4 sm:$0xff]  }
 0x15e   : > { %3702 = vmatprep.subr.bf16.mxu1 %v4702_v43  ;;  %v4778_v42 = vld [vmem:[%s5692_s30 + $0x730] ss:$8 sps:$4 sm:$0xff]   ;;  %v4783_v43 = vld [vmem:[%s5692_s30 + $0x624] ss:$8 sps:$4 sm:$0xff]  }
 0x160   : > { %3662 = vmatpush1.bf16.msra.mxu0 %v4697_v44  ;;  %v4786_v44 = vld [vmem:[%s5692_s30 + $0x724] ss:$8 sps:$4 sm:$0xff]  }
 0x161   : > { %3703 = vmatpush1.bf16.msra.mxu1 %v4700_v45  ;;  %3663 = vmatprep.subr.bf16.mxu0 %v4705_v46  ;;  %v4781_v45 = vld [vmem:[%s5692_s30 + $0x620] ss:$8 sps:$4 sm:$0xff]  }
 0x162   : > { %3704 = vmatprep.subr.bf16.mxu1 %v4708_v47  ;;  %v4784_v46 = vld [vmem:[%s5692_s30 + $0x720] ss:$8 sps:$4 sm:$0xff]   ;;  %v4789_v47 = vld [vmem:[%s5692_s30 + $0x614] ss:$8 sps:$4 sm:$0xff]  }
 0x164   : > { %3664 = vmatpush2.bf16.msra.mxu0 %v4703_v48  ;;  %v4792_v48 = vld [vmem:[%s5692_s30 + $0x714] ss:$8 sps:$4 sm:$0xff]  }
 0x165   : > { %3705 = vmatpush2.bf16.msra.mxu1 %v4706_v49  ;;  %3665 = vmatprep.subr.bf16.mxu0 %v4711_v50  ;;  %v4787_v49 = vld [vmem:[%s5692_s30 + $0x610] ss:$8 sps:$4 sm:$0xff]  }
 0x166   : > { %3706 = vmatprep.subr.bf16.mxu1 %v4714_v51  ;;  %v4790_v50 = vld [vmem:[%s5692_s30 + $0x710] ss:$8 sps:$4 sm:$0xff]   ;;  %v4795_v51 = vld [vmem:[%s5692_s30 + $0x604] ss:$8 sps:$4 sm:$0xff]  }
 0x168   : > { %3666 = vmatpush2.bf16.msra.mxu0 %v4709_v52  ;;  %v4798_v52 = vld [vmem:[%s5692_s30 + $0x704] ss:$8 sps:$4 sm:$0xff]  }
 0x169   : > { %3707 = vmatpush2.bf16.msra.mxu1 %v4712_v53  ;;  %3667 = vmatprep.subr.bf16.mxu0 %v4717_v54  ;;  %v4793_v53 = vld [vmem:[%s5692_s30 + $0x600] ss:$8 sps:$4 sm:$0xff]  }
 0x16a   : > { %3708 = vmatprep.subr.bf16.mxu1 %v4720_v56  ;;  %v4796_v54 = vld [vmem:[%s5692_s30 + $0x700] ss:$8 sps:$4 sm:$0xff]   ;;  %v4801_v56 = vld [vmem:[%s5692_s30 + $0x6f4] ss:$8 sps:$4 sm:$0xff]  }
 0x16c   : > { %3668 = vmatpush2.bf16.msra.mxu0 %v4715_v57  ;;  %v4804_v57 = vld [vmem:[%s5692_s30 + $0x7f4] ss:$8 sps:$4 sm:$0xff]  }
 0x16d   : > { %3709 = vmatpush2.bf16.msra.mxu1 %v4718_v58  ;;  %3669 = vmatprep.subr.bf16.mxu0 %v4723_v59  ;;  %v4799_v58 = vld [vmem:[%s5692_s30 + $0x6f0] ss:$8 sps:$4 sm:$0xff]  }
 0x16e   : > { %3710 = vmatprep.subr.bf16.mxu1 %v4726_v60  ;;  %v4802_v59 = vld [vmem:[%s5692_s30 + $0x7f0] ss:$8 sps:$4 sm:$0xff]   ;;  %v4807_v60 = vld [vmem:[%s5692_s30 + $0x6e4] ss:$8 sps:$4 sm:$0xff]  }
 0x170   : > { %3670 = vmatpush2.bf16.msra.mxu0 %v4721_v61  ;;  %v4810_v61 = vld [vmem:[%s5692_s30 + $0x7e4] ss:$8 sps:$4 sm:$0xff]  }
 0x171   : > { %3711 = vmatpush2.bf16.msra.mxu1 %v4724_v62  ;;  %3671 = vmatprep.subr.bf16.mxu0 %v4729_v63  ;;  %v4805_v62 = vld [vmem:[%s5692_s30 + $0x6e0] ss:$8 sps:$4 sm:$0xff]  }
 0x172   : > { %3712 = vmatprep.subr.bf16.mxu1 %v4732_v0  ;;  %v4808_v63 = vld [vmem:[%s5692_s30 + $0x7e0] ss:$8 sps:$4 sm:$0xff]   ;;  %v4813_v0 = vld [vmem:[%s5692_s30 + $0x6d4] ss:$8 sps:$4 sm:$0xff]  }
 0x174   : > { %3672 = vmatpush2.bf16.msra.mxu0 %v4727_v1  ;;  %v4816_v1 = vld [vmem:[%s5692_s30 + $0x7d4] ss:$8 sps:$4 sm:$0xff]  }
 0x175   : > { %3713 = vmatpush2.bf16.msra.mxu1 %v4730_v2  ;;  %3673 = vmatprep.subr.bf16.mxu0 %v4735_v3  ;;  %v4811_v2 = vld [vmem:[%s5692_s30 + $0x6d0] ss:$8 sps:$4 sm:$0xff]  }
 0x176   : > { %3714 = vmatprep.subr.bf16.mxu1 %v4738_v4  ;;  %v4814_v3 = vld [vmem:[%s5692_s30 + $0x7d0] ss:$8 sps:$4 sm:$0xff]   ;;  %v4819_v4 = vld [vmem:[%s5692_s30 + $0x6c4] ss:$8 sps:$4 sm:$0xff]  }
 0x178   : > { %3674 = vmatpush2.bf16.msra.mxu0 %v4733_v6  ;;  %v4817_v6 = vld [vmem:[%s5692_s30 + $0x6c0] ss:$8 sps:$4 sm:$0xff]  }
 0x179   : > { %3715 = vmatpush2.bf16.msra.mxu1 %v4736_v7  ;;  %3675 = vmatprep.subr.bf16.mxu0 %v4741_v8  ;;  %v4820_v7 = vld [vmem:[%s5692_s30 + $0x7c0] ss:$8 sps:$4 sm:$0xff]   ;;  %v4825_v8 = vld [vmem:[%s5692_s30 + $0x6b4] ss:$8 sps:$4 sm:$0xff]  }
 0x17a   : > { %3716 = vmatprep.subr.bf16.mxu1 %v4744_v9  ;;  %v4828_v9 = vld [vmem:[%s5692_s30 + $0x7b4] ss:$8 sps:$4 sm:$0xff]  }
 0x17c   : > { %3676 = vmatpush2.bf16.msra.mxu0 %v4739_v11  ;;  %v4823_v11 = vld [vmem:[%s5692_s30 + $0x6b0] ss:$8 sps:$4 sm:$0xff]  }
 0x17d   : > { %3717 = vmatpush2.bf16.msra.mxu1 %v4742_v12  ;;  %3677 = vmatprep.subr.bf16.mxu0 %v4747_v55  ;;  %v4826_v12 = vld [vmem:[%s5692_s30 + $0x7b0] ss:$8 sps:$4 sm:$0xff]   ;;  %v4831_v55 = vld [vmem:[%s5692_s30 + $0x6a4] ss:$8 sps:$4 sm:$0xff]  }
 0x17e   : > { %3718 = vmatprep.subr.bf16.mxu1 %v4750_v13  ;;  %v4834_v13 = vld [vmem:[%s5692_s30 + $0x7a4] ss:$8 sps:$4 sm:$0xff]  }
 0x180   : > { %3678 = vmatpush2.bf16.msra.mxu0 %v4745_v17  ;;  %v4837_v17 = vld [vmem:[%s5692_s30 + $0x694] ss:$8 sps:$4 sm:$0xff]  }
 0x181   : > { %3719 = vmatpush2.bf16.msra.mxu1 %v4748_v18  ;;  %3729 = vmatprep.subr.bf16.mxu0 %v4753_v19  ;;  %v4840_v18 = vld [vmem:[%s5692_s30 + $0x794] ss:$8 sps:$4 sm:$0xff]   ;;  %v4835_v19 = vld [vmem:[%s5692_s30 + $0x690] ss:$8 sps:$4 sm:$0xff]  }
 0x182   : > { %3770 = vmatprep.subr.bf16.mxu1 %v4756_v20  ;;  %v4838_v20 = vld [vmem:[%s5692_s30 + $0x790] ss:$8 sps:$4 sm:$0xff]  }
 0x183   : > { %3680 = vmatmul.mubr.bf16.vlgmr.msra.gmra.mxu0 %v1895_v16  ;;  %v4832_v16 = vld [vmem:[%s5692_s30 + $0x7a0] ss:$8 sps:$4 sm:$0xff]  }
 0x184   : > { %3721 = vmatmul.mubr.bf16.vlgmr.msra.gmra.mxu1 %v1917_v22  ;;  %3730 = vmatpush1.bf16.msra.mxu0 %v4751_v23  ;;  %v4846_v22 = vld [vmem:[%s5692_s30 + $0x784] ss:$8 sps:$4 sm:$0xff]   ;;  %v1902_v23 = vrot.slane %v5911_v10, %v5742_v34  ;;  %v4848_v10 = vld [vmem:[%s5692_s30 + $0x870] ss:$8 sps:$4 sm:$0xff]  }
 0x185   : > { %3771 = vmatpush1.bf16.msra.mxu1 %v4754_v14  ;;  %3731 = vmatprep.subr.bf16.mxu0 %v4759_v24  ;;  %v4841_v14 = vld [vmem:[%s5692_s30 + $0x680] ss:$8 sps:$4 sm:$0xff]  }
 0x186   : > { %3772 = vmatprep.subr.bf16.mxu1 %v4762_v25  ;;  %3761 = vmatprep.mubr.bf16.mxu0 %v1916_v21  ;;  %v4843_v21 = vld [vmem:[%s5692_s30 + $0x684] ss:$8 sps:$4 sm:$0xff]   ;;  %v4844_v24 = vld [vmem:[%s5692_s30 + $0x780] ss:$8 sps:$4 sm:$0xff]   ;;  %v4850_v25 = vld [vmem:[%s5692_s30 + $0x874] ss:$8 sps:$4 sm:$0xff]  }
 0x187   : > { %3802 = vmatprep.mubr.bf16.mxu1 %v1920_v26  ;;  %v4874_v26 = vld [vmem:[%s5692_s30 + $0x974] ss:$8 sps:$4 sm:$0xff]  }
 0x188   : > { %3732 = vmatpush1.bf16.msra.mxu0 %v4757_v27  ;;  %v5993_v27 = vld.sshfl [vmem:[%s5682_s24 + $0x10] sm:$0x13 pattern:$0x75316420] }
 0x189   : > { %3773 = vmatpush1.bf16.msra.mxu1 %v4760_v29  ;;  %3733 = vmatprep.subr.bf16.mxu0 %v4765_v30  ;;  %v1928_v29 = vcombine.high %v5993_v27, %v5993_v27  ;;  %v1918_v30 = vcombine.high %v1902_v23, %v1902_v23 }
 0x18a   : > { %3774 = vmatprep.subr.bf16.mxu1 %v4768_v31  ;;  %v4872_v31 = vld [vmem:[%s5692_s30 + $0x970] ss:$8 sps:$4 sm:$0xff]  }
 0x18c   : > { %3734 = vmatpush1.bf16.msra.mxu0 %v4763_v32  ;;  %v4853_v32 = vld [vmem:[%s5692_s30 + $0x864] ss:$8 sps:$4 sm:$0xff]  }
 0x18d   : > { %3775 = vmatpush1.bf16.msra.mxu1 %v4766_v33  ;;  %3735 = vmatprep.subr.bf16.mxu0 %v4771_v35  ;;  %v4880_v33 = vld [vmem:[%s5692_s30 + $0x964] ss:$8 sps:$4 sm:$0xff]   ;;  %v1942_v35 = vrot.slane %v1928_v29, %v5742_v34 }
 0x18e   : > { %3776 = vmatprep.subr.bf16.mxu1 %v4774_v36 }
 0x190   : > { %3736 = vmatpush1.bf16.msra.mxu0 %v4769_v37 }
 0x191   : > { %3777 = vmatpush1.bf16.msra.mxu1 %v4772_v38  ;;  %3737 = vmatprep.subr.bf16.mxu0 %v4777_v39  ;;  %v4851_v39 = vld [vmem:[%s5692_s30 + $0x860] ss:$8 sps:$4 sm:$0xff]  }
 0x192   : > { %3778 = vmatprep.subr.bf16.mxu1 %v4780_v40  ;;  %v4878_v40 = vld [vmem:[%s5692_s30 + $0x960] ss:$8 sps:$4 sm:$0xff]  }
 0x194   : > { %3738 = vmatpush1.bf16.msra.mxu0 %v4775_v41 }
 0x195   : > { %3779 = vmatpush1.bf16.msra.mxu1 %v4778_v42  ;;  %3739 = vmatprep.subr.bf16.mxu0 %v4783_v43  ;;  %v4856_v43 = vld [vmem:[%s5692_s30 + $0x854] ss:$8 sps:$4 sm:$0xff]  }
 0x196   : > { %3780 = vmatprep.subr.bf16.mxu1 %v4786_v44  ;;  %v4886_v44 = vld [vmem:[%s5692_s30 + $0x954] ss:$8 sps:$4 sm:$0xff]  }
 0x198   : > { %3740 = vmatpush1.bf16.msra.mxu0 %v4781_v45 }
 0x199   : > { %3781 = vmatpush1.bf16.msra.mxu1 %v4784_v46  ;;  %3741 = vmatprep.subr.bf16.mxu0 %v4789_v47  ;;  %v4978_v46 = vmov 0  }
 0x19a   : > { %3782 = vmatprep.subr.bf16.mxu1 %v4792_v48 }
 0x19c   : > { %3742 = vmatpush1.bf16.msra.mxu0 %v4787_v49  ;;  %v4854_v49 = vld [vmem:[%s5692_s30 + $0x850] ss:$8 sps:$4 sm:$0xff]  }
 0x19d   : > { %3783 = vmatpush1.bf16.msra.mxu1 %v4790_v50  ;;  %3743 = vmatprep.subr.bf16.mxu0 %v4795_v51  ;;  %v4884_v50 = vld [vmem:[%s5692_s30 + $0x950] ss:$8 sps:$4 sm:$0xff]  }
 0x19e   : > { %3784 = vmatprep.subr.bf16.mxu1 %v4798_v52  ;;  %v4859_v52 = vld [vmem:[%s5692_s30 + $0x844] ss:$8 sps:$4 sm:$0xff]  }
 0x1a0   : > { %3744 = vmatpush1.bf16.msra.mxu0 %v4793_v53 }
 0x1a1   : > { %3785 = vmatpush1.bf16.msra.mxu1 %v4796_v54  ;;  %3745 = vmatprep.subr.bf16.mxu0 %v4801_v56  ;;  %v4892_v54 = vld [vmem:[%s5692_s30 + $0x944] ss:$8 sps:$4 sm:$0xff]   ;;  %v4857_v56 = vld [vmem:[%s5692_s30 + $0x840] ss:$8 sps:$4 sm:$0xff]  }
 0x1a2   : > { %3786 = vmatprep.subr.bf16.mxu1 %v4804_v57  ;;  %v4890_v57 = vld [vmem:[%s5692_s30 + $0x940] ss:$8 sps:$4 sm:$0xff]  }
 0x1a4   : > { %3746 = vmatpush2.bf16.msra.mxu0 %v4799_v58  ;;  %v4862_v58 = vld [vmem:[%s5692_s30 + $0x834] ss:$8 sps:$4 sm:$0xff]  }
 0x1a5   : > { %3787 = vmatpush2.bf16.msra.mxu1 %v4802_v59  ;;  %3747 = vmatprep.subr.bf16.mxu0 %v4807_v60  ;;  %v4898_v59 = vld [vmem:[%s5692_s30 + $0x934] ss:$8 sps:$4 sm:$0xff]   ;;  %v4860_v60 = vld [vmem:[%s5692_s30 + $0x830] ss:$8 sps:$4 sm:$0xff]  }
 0x1a6   : > { %3788 = vmatprep.subr.bf16.mxu1 %v4810_v61  ;;  %v4896_v61 = vld [vmem:[%s5692_s30 + $0x930] ss:$8 sps:$4 sm:$0xff]  }
 0x1a8   : > { %3748 = vmatpush2.bf16.msra.mxu0 %v4805_v62  ;;  %v4865_v62 = vld [vmem:[%s5692_s30 + $0x824] ss:$8 sps:$4 sm:$0xff]  }
 0x1a9   : > { %3789 = vmatpush2.bf16.msra.mxu1 %v4808_v63  ;;  %3749 = vmatprep.subr.bf16.mxu0 %v4813_v0  ;;  %v4904_v63 = vld [vmem:[%s5692_s30 + $0x924] ss:$8 sps:$4 sm:$0xff]   ;;  %v4863_v0 = vld [vmem:[%s5692_s30 + $0x820] ss:$8 sps:$4 sm:$0xff]  }
 0x1aa   : > { %3790 = vmatprep.subr.bf16.mxu1 %v4816_v1  ;;  %v4902_v1 = vld [vmem:[%s5692_s30 + $0x920] ss:$8 sps:$4 sm:$0xff]  }
 0x1ac   : > { %3750 = vmatpush2.bf16.msra.mxu0 %v4811_v2  ;;  %v4868_v2 = vld [vmem:[%s5692_s30 + $0x814] ss:$8 sps:$4 sm:$0xff]  }
 0x1ad   : > { %3791 = vmatpush2.bf16.msra.mxu1 %v4814_v3  ;;  %3751 = vmatprep.subr.bf16.mxu0 %v4819_v4  ;;  %v4910_v3 = vld [vmem:[%s5692_s30 + $0x914] ss:$8 sps:$4 sm:$0xff]   ;;  %v4866_v4 = vld [vmem:[%s5692_s30 + $0x810] ss:$8 sps:$4 sm:$0xff]  }
 0x1ae   : > { %3792 = vmatprep.subr.bf16.mxu1 %v4822_v5  ;;  %v4908_v5 = vld [vmem:[%s5692_s30 + $0x910] ss:$8 sps:$4 sm:$0xff]  }
 0x1b0   : > { %3752 = vmatpush2.bf16.msra.mxu0 %v4817_v6  ;;  %v4871_v6 = vld [vmem:[%s5692_s30 + $0x804] ss:$8 sps:$4 sm:$0xff]  }
 0x1b1   : > { %3793 = vmatpush2.bf16.msra.mxu1 %v4820_v7  ;;  %3753 = vmatprep.subr.bf16.mxu0 %v4825_v8  ;;  %v4916_v7 = vld [vmem:[%s5692_s30 + $0x904] ss:$8 sps:$4 sm:$0xff]   ;;  %v1935_v8 = vrot.slane %v5993_v27, %v5742_v34  ;;  %v4917_v27 = vld [vmem:[%s5692_s30 + $0x880] ss:$8 sps:$4 sm:$0xff]  }
 0x1b2   : > { %3794 = vmatprep.subr.bf16.mxu1 %v4828_v9  ;;  %v4869_v9 = vld [vmem:[%s5692_s30 + $0x800] ss:$8 sps:$4 sm:$0xff]  }
 0x1b4   : > { %3754 = vmatpush2.bf16.msra.mxu0 %v4823_v11  ;;  %v4914_v11 = vld [vmem:[%s5692_s30 + $0x900] ss:$8 sps:$4 sm:$0xff]  }
 0x1b5   : > { %3795 = vmatpush2.bf16.msra.mxu1 %v4826_v12  ;;  %3755 = vmatprep.subr.bf16.mxu0 %v4831_v55  ;;  %v4877_v12 = vld [vmem:[%s5692_s30 + $0x8f4] ss:$8 sps:$4 sm:$0xff]   ;;  %v1943_v55 = vcombine.high %v1935_v8, %v1935_v8 }
 0x1b6   : > { %3796 = vmatprep.subr.bf16.mxu1 %v4834_v13  ;;  %v4875_v13 = vld [vmem:[%s5692_s30 + $0x8f0] ss:$8 sps:$4 sm:$0xff]  }
 0x1b8   : > { %3756 = vmatpush2.bf16.msra.mxu0 %v4829_v15  ;;  %v4883_v15 = vld [vmem:[%s5692_s30 + $0x8e4] ss:$8 sps:$4 sm:$0xff]  }
 0x1b9   : > { %3797 = vmatpush2.bf16.msra.mxu1 %v4832_v16  ;;  %3757 = vmatprep.subr.bf16.mxu0 %v4837_v17  ;;  %v4881_v16 = vld [vmem:[%s5692_s30 + $0x8e0] ss:$8 sps:$4 sm:$0xff]   ;;  %v4889_v17 = vld [vmem:[%s5692_s30 + $0x8d4] ss:$8 sps:$4 sm:$0xff]  }
 0x1ba   : > { %3798 = vmatprep.subr.bf16.mxu1 %v4840_v18  ;;  %v4887_v18 = vld [vmem:[%s5692_s30 + $0x8d0] ss:$8 sps:$4 sm:$0xff]  }
 0x1bc   : > { %3758 = vmatpush2.bf16.msra.mxu0 %v4835_v19  ;;  %v4895_v19 = vld [vmem:[%s5692_s30 + $0x8c4] ss:$8 sps:$4 sm:$0xff]  }
 0x1bd   : > { %3799 = vmatpush2.bf16.msra.mxu1 %v4838_v20  ;;  %3759 = vmatprep.subr.bf16.mxu0 %v4843_v21  ;;  %v4893_v20 = vld [vmem:[%s5692_s30 + $0x8c0] ss:$8 sps:$4 sm:$0xff]   ;;  %v4901_v21 = vld [vmem:[%s5692_s30 + $0x8b4] ss:$8 sps:$4 sm:$0xff]  }
 0x1be   : > { %3800 = vmatprep.subr.bf16.mxu1 %v4846_v22  ;;  %v4899_v22 = vld [vmem:[%s5692_s30 + $0x8b0] ss:$8 sps:$4 sm:$0xff]  }
 0x1c0   : > { %3760 = vmatpush2.bf16.msra.mxu0 %v4841_v14  ;;  %v4905_v14 = vld [vmem:[%s5692_s30 + $0x8a0] ss:$8 sps:$4 sm:$0xff]  }
 0x1c1   : > { %3801 = vmatpush2.bf16.msra.mxu1 %v4844_v24  ;;  %3811 = vmatprep.subr.bf16.mxu0 %v4850_v25  ;;  %v4913_v24 = vld [vmem:[%s5692_s30 + $0x894] ss:$8 sps:$4 sm:$0xff]   ;;  %v4911_v25 = vld [vmem:[%s5692_s30 + $0x890] ss:$8 sps:$4 sm:$0xff]  }
 0x1c2   : > { %3852 = vmatprep.subr.bf16.mxu1 %v4874_v26  ;;  %v4919_v26 = vld [vmem:[%s5692_s30 + $0x884] ss:$8 sps:$4 sm:$0xff]  }
 0x1c3   : > { %v3517_v36 = vpop.f32.mrf.mxu0  ;;  %3762 = vmatmul.mubr.bf16.vlgmr.msra.gmra.mxu0 %v1902_v23  ;;  %v4907_v23 = vld [vmem:[%s5692_s30 + $0x8a4] ss:$8 sps:$4 sm:$0xff]  }
 0x1c4   : > { %v3558_v37 = vpop.f32.mrf.mxu1  ;;  %3803 = vmatmul.mubr.bf16.vlgmr.msra.gmra.mxu1 %v1918_v30  ;;  %3812 = vmatpush1.bf16.msra.mxu0 %v4848_v10 }
 0x1c5   : > { %v6002_v38 = vadd.f32 %v3558_v37, %v3517_v36  ;;  %3853 = vmatpush1.bf16.msra.mxu1 %v4872_v31  ;;  %v3519_v41 = vpop.f32.mrf.mxu0  ;;  %3813 = vmatprep.subr.bf16.mxu0 %v4853_v32 }
 0x1c6   : > { %v3560_v42 = vpop.f32.mrf.mxu1  ;;  %3854 = vmatprep.subr.bf16.mxu1 %v4880_v33  ;;  %3884 = vmatprep.mubr.bf16.mxu1 %v4978_v46 }
 0x1c7   : > { %v6008_v45 = vadd.f32 %v3560_v42, %v3519_v41  ;;  %3843 = vmatprep.mubr.bf16.mxu0 %v1942_v35  ;;  %v3521_v47 = vpop.f32.mrf.mxu0 }
 0x1c8   : > { %v3562_v48 = vpop.f32.mrf.mxu1  ;;  %3814 = vmatpush1.bf16.msra.mxu0 %v4851_v39 }
 0x1c9   : > { %3855 = vmatpush1.bf16.msra.mxu1 %v4878_v40  ;;  %v3522_v51 = vpop.f32.mrf.mxu0  ;;  %3815 = vmatprep.subr.bf16.mxu0 %v4856_v43 }
 0x1ca   : > { %v3563_v53 = vpop.f32.mrf.mxu1  ;;  %3856 = vmatprep.subr.bf16.mxu1 %v4886_v44 }
 0x1cc   : > { %3816 = vmatpush1.bf16.msra.mxu0 %v4854_v49 }
 0x1cd   : > { %3857 = vmatpush1.bf16.msra.mxu1 %v4884_v50  ;;  %3817 = vmatprep.subr.bf16.mxu0 %v4859_v52 }
 0x1ce   : > { %3858 = vmatprep.subr.bf16.mxu1 %v4892_v54 }
 0x1d0   : > { %3818 = vmatpush1.bf16.msra.mxu0 %v4857_v56 }
 0x1d1   : > { %3859 = vmatpush1.bf16.msra.mxu1 %v4890_v57  ;;  %3819 = vmatprep.subr.bf16.mxu0 %v4862_v58 }
 0x1d2   : > { %3860 = vmatprep.subr.bf16.mxu1 %v4898_v59 }
 0x1d4   : > { %3820 = vmatpush1.bf16.msra.mxu0 %v4860_v60 }
 0x1d5   : > { %3861 = vmatpush1.bf16.msra.mxu1 %v4896_v61  ;;  %3821 = vmatprep.subr.bf16.mxu0 %v4865_v62 }
 0x1d6   : > { %3862 = vmatprep.subr.bf16.mxu1 %v4904_v63 }
 0x1d8   : > { %3822 = vmatpush1.bf16.msra.mxu0 %v4863_v0 }
 0x1d9   : > { %3863 = vmatpush1.bf16.msra.mxu1 %v4902_v1  ;;  %3823 = vmatprep.subr.bf16.mxu0 %v4868_v2 }
 0x1da   : > { %3864 = vmatprep.subr.bf16.mxu1 %v4910_v3 }
 0x1dc   : > { %3824 = vmatpush1.bf16.msra.mxu0 %v4866_v4 }
 0x1dd   : > { %3865 = vmatpush1.bf16.msra.mxu1 %v4908_v5  ;;  %3825 = vmatprep.subr.bf16.mxu0 %v4871_v6  ;;  %v4979_v5 = vmov 1983009808  }
 0x1de   : > { %3866 = vmatprep.subr.bf16.mxu1 %v4916_v7  ;;  %v3897_v6 = vunpack.c.l.s4 %v4979_v5 }
 0x1e0   : > { %3826 = vmatpush1.bf16.msra.mxu0 %v4869_v9 }
 0x1e1   : > { %3867 = vmatpush1.bf16.msra.mxu1 %v4914_v11  ;;  %3827 = vmatprep.subr.bf16.mxu0 %v4877_v12  ;;  %v3898_v11 = vunpack.c.0.s8 %v3897_v6 }
 0x1e4   : > { %3885 = vmatmul.mubr.bf16.vlgmr.msra.gmra.mxu1 %v1943_v55  ;;  %3828 = vmatpush2.bf16.msra.mxu0 %v4875_v13 }
 0x1e5   : > { %3829 = vmatprep.subr.bf16.mxu0 %v4883_v15 }
 0x1e8   : > { %3830 = vmatpush2.bf16.msra.mxu0 %v4881_v16 }
 0x1e9   : > { %3831 = vmatprep.subr.bf16.mxu0 %v4889_v17  ;;  %v3901_v17 = vsub.s32 %v3898_v11, %v5734_v28 }
 0x1ec   : > { %3832 = vmatpush2.bf16.msra.mxu0 %v4887_v18 }
 0x1ed   : > { %3833 = vmatprep.subr.bf16.mxu0 %v4895_v19 }
 0x1f0   : > { %3834 = vmatpush2.bf16.msra.mxu0 %v4893_v20  ;;  %v1512_v20 = vld [vmem:[#allocation2] sm:$0xf] }
 0x1f1   : > { %3835 = vmatprep.subr.bf16.mxu0 %v4901_v21 }
 0x1f4   : > { %3836 = vmatpush2.bf16.msra.mxu0 %v4899_v22 }
 0x1f5   : > { %3837 = vmatprep.subr.bf16.mxu0 %v4907_v23 }
 0x1f8   : > { %3838 = vmatpush2.bf16.msra.mxu0 %v4905_v14 }
 0x1f9   : > { %3839 = vmatprep.subr.bf16.mxu0 %v4913_v24 }
 0x1fc   : > { %3840 = vmatpush2.bf16.msra.mxu0 %v4911_v25 }
 0x1fd   : > { %3841 = vmatprep.subr.bf16.mxu0 %v4919_v26 }
 0x200   : > { %3842 = vmatpush2.bf16.msra.mxu0 %v4917_v27 }
 0x203   : > { %v3599_v29 = vpop.f32.mrf.mxu0  ;;  %3844 = vmatmul.mubr.bf16.vlgmr.msra.gmra.mxu0 %v1935_v8 }
 0x204   : > { %v3640_v30 = vpop.f32.mrf.mxu1  ;;  %v3600_v10 = vadd.f32 %v3599_v29, %v6002_v38 }
 0x205   : > { %v3601_v31 = vpop.f32.mrf.mxu0 }
 0x206   : > { %v3642_v32 = vpop.f32.mrf.mxu1  ;;  %v3602_v33 = vadd.f32 %v3601_v31, %v6008_v45  ;;  %v3641_v35 = vadd.f32 %v3640_v30, %v3600_v10 }
 0x207   : > { %v3603_v36 = vpop.f32.mrf.mxu0 }
 0x208   : > { %v3644_v37 = vpop.f32.mrf.mxu1  ;;  %v3643_v39 = vadd.f32 %v3642_v32, %v3602_v33 }
 0x209   : > { %v3604_v40 = vpop.f32.mrf.mxu0 }
 0x20a   : > { %v3645_v41 = vpop.f32.mrf.mxu1 }
 0x243   : > { %v3681_v42 = vpop.f32.mrf.mxu0 }
 0x244   : > { %v3722_v43 = vpop.f32.mrf.mxu1  ;;  %v3682_v44 = vadd.f32 %v3681_v42, %v3641_v35 }
 0x245   : > { %v3683_v46 = vpop.f32.mrf.mxu0 }
 0x246   : > { %v3724_v47 = vpop.f32.mrf.mxu1  ;;  %v3684_v48 = vadd.f32 %v3683_v46, %v3643_v39  ;;  %v3723_v49 = vadd.f32 %v3722_v43, %v3682_v44 }
 0x247   : > { %v3685_v50 = vpop.f32.mrf.mxu0 }
 0x248   : > { %v3726_v51 = vpop.f32.mrf.mxu1  ;;  %v3725_v38 = vadd.f32 %v3724_v47, %v3684_v48 }
 0x249   : > { %v3686_v52 = vpop.f32.mrf.mxu0 }
 0x24a   : > { %v3727_v53 = vpop.f32.mrf.mxu1 }
 0x283   : > { %v3763_v54 = vpop.f32.mrf.mxu0 }
 0x284   : > { %v3804_v45 = vpop.f32.mrf.mxu1  ;;  %v3764_v56 = vadd.f32 %v3763_v54, %v3723_v49 }
 0x285   : > { %v3765_v57 = vpop.f32.mrf.mxu0 }
 0x286   : > { %v3806_v58 = vpop.f32.mrf.mxu1  ;;  %v3805_v59 = vadd.f32 %v3804_v45, %v3764_v56  ;;  %v3766_v4 = vadd.f32 %v3765_v57, %v3725_v38 }
 0x287   : > { %v3767_v60 = vpop.f32.mrf.mxu0 }
 0x288   : > { %v3808_v61 = vpop.f32.mrf.mxu1  ;;  %v3807_v8 = vadd.f32 %v3806_v58, %v3766_v4 }
 0x289   : > { %v3768_v62 = vpop.f32.mrf.mxu0 }
 0x28a   : > { %v3809_v63 = vpop.f32.mrf.mxu1 }
 0x2a4   : > { %v3886_v0 = vpop.f32.mrf.mxu1 }
 0x2a6   : > { %v3888_v1 = vpop.f32.mrf.mxu1 }
 0x2a8   : > { %v3890_v2 = vpop.f32.mrf.mxu1 }
 0x2aa   : > { %v3891_v3 = vpop.f32.mrf.mxu1 }
 0x2c3   : > { %v3845_v7 = vpop.f32.mrf.mxu0 }
 0x2c4   : > { %v3846_v9 = vadd.f32 %v3845_v7, %v3805_v59 }
 0x2c5   : > { %v3847_v12 = vpop.f32.mrf.mxu0 }
 0x2c6   : > { %v3848_v55 = vadd.f32 %v3847_v12, %v3807_v8  ;;  %v3887_v15 = vadd.f32 %v3886_v0, %v3846_v9 }
 0x2c7   : > { %v3849_v13 = vpop.f32.mrf.mxu0 }
 0x2c8   : > { %v3889_v16 = vadd.f32 %v3888_v1, %v3848_v55 }
 0x2c9   : > { %v3850_v18 = vpop.f32.mrf.mxu0 }
 0x2ca   : > { %v3895_v19 = vcombine.low %v3887_v15, %v3889_v16 }
 0x2cc   : > { %v3902_v21 = vrot.slane %v3895_v19, %v3901_v17  ;;  %3909 = sbr.rel (%p4394_p13) target bundleno = 742 (0x2e6), region = 78 }
 0x2ce   : > { %v3904_v22 = vadd.f32 %v3902_v21, %v1512_v20 }
 0x2d0   : > { %3905 = vst [vmem:[#allocation2] sm:$0xf] %v3904_v22 }
 0x2d1   : > { %v3911_v23 = vld [vmem:[%s1495_s28] sm:$0x3]  ;;  %v3915_v14 = vsub.s32 0, %v5734_v28  ;;  %v3919_v24 = vsub.s32 1, %v5734_v28 }
 0x2d3   : > { %v3916_v25 = vrot.slane %v3911_v23, %v3915_v14  ;;  %v3920_v26 = vrot.slane %v3911_v23, %v3919_v24 }
 0x2d5   : > { %v3921_v27 = vcombine.low %v3916_v25, %v3920_v26 }
 0x2d7   : > { %v3910_v29 = vld [vmem:[#allocation2] sm:$0xf]  ;;  %v3928_v30 = vrot.slane %v3921_v27, %v3901_v17 }
 0x2d9   : > { %v3930_v10 = vadd.f32 %v3928_v30, %v3910_v29 }
 0x2db   : > { %v3931_v31 = vmax.f32 %v3930_v10, 0.0 }
 0x2dd   : > { %v3939_v32 = vrot.slane %v3931_v31, %v3901_v17 }
 0x2df   : > { %v3940_v33 = vcombine.high %v3939_v32, %v3939_v32 }
 0x2e1   : > { %v4395_v35 = vpack.c.bf16 %v3940_v33, %v3939_v32 }
 0x2e3   : > { %v3954_v36 = vrot.slane %v4395_v35, %v5742_v34 }
 0x2e5   : > { %4396 = vst.sshfl [vmem:[%s1504_s15] sm:$0x5 pattern:$0x73625140] %v3954_v36 }
 0x2e6 PF: > { %s13_s18 = sadd.s32 1, %s4974_s18   ;;  %s6092_s12 = smov %s4954_s13 }
 0x2e7   : > { %p10_p0 = scmp.ge.s32.totalorder %s13_s18, 18   ;;  %s6093_s13 = smov %s5051_s25 }
 0x2e8   : > { %s6094_s14 = smov %s4966_s16  ;;  %s6095_s15 = smov %s4970_s17 }
 0x2e9   : > { %s6096_s16 = smov %s6099_s19  ;;  %s6097_s17 = smov %s6103_s20 }
 0x2ea   :  { %12 = sbr.rel (!%p10_p0) target bundleno = 4 (0x4), region = 119 }

</bundles_post_ra>
